<compile_context>
chip_gen: v7x
topology: tpu7x:2x2x1
jax: 0.10.0
libtpu: 0.0.40
codegen_flags: <defaults>
</compile_context>

<pallas_src>
import jax
import jax.numpy as jnp
from jax import lax
from jax.experimental import pallas as pl
from jax.experimental.pallas import tpu as pltpu


def _conv_encoder_kernel(x_ref, w1_ref, b1_ref, w2_ref, b2_ref, w3_ref, b3_ref,
                         o_ref, pf1, pf2, pf3, ps1, ps2, ps3):
    """One batch element through conv->relu->pool x3, fully VMEM resident.

    x_ref : (1, H, W, 3)          input image (NHWC block)
    wK_ref: (9, CinK, CoutK)      3x3 weights, tap-major (kh*3 + kw)
    bK_ref: (1, CoutK)            bias
    o_ref : (1, Ho*Wo, Cout3)     flattened-spatial output of layer 3
    pfK   : ((HK+2)*(WK+2)+8, CinK)  f32  zero-padded layer-K input, row = y*(WK+2)+x
    psK   : ((HK-1)*(WK+2)-1, CoutK) f32  2x2-windowed max of the conv output
    """
    H1, W1 = x_ref.shape[1], x_ref.shape[2]
    H2, W2 = H1 // 2, W1 // 2
    H3, W3 = H1 // 4, W1 // 4
    Wp1, Wp2, Wp3 = W1 + 2, W2 + 2, W3 + 2

    # SAME padding lives in VMEM: zero the padded buffers, then fill interiors.
    pf1[...] = jnp.zeros_like(pf1)
    pf2[...] = jnp.zeros_like(pf2)
    pf3[...] = jnp.zeros_like(pf3)
    for h in range(H1):                                   # layer-1 interior copy
        pf1[pl.ds((h + 1) * Wp1 + 1, W1), :] = x_ref[0, h]

    def conv_relu_pool(pf_ref, w_ref, b_ref, ps_ref, H, W, emit_row):
        """3x3 SAME conv + bias + ReLU + 2x2/stride-2 max-pool on the flat layout."""
        Wp = W + 2
        Cout = w_ref.shape[2]
        Ho, Wo = H // 2, W // 2
        M = H * Wp                                        # rows incl. 2 junk cols/row

        # 9 whole-image tap matmuls: lhs is a row-shifted window of the padded image.
        acc = jnp.zeros((M, Cout), jnp.float32)
        for kh in range(3):
            for kw in range(3):
                acc = acc + jnp.dot(
                    pf_ref[pl.ds(kh * Wp + kw, M), :],    # (M, Cin)
                    w_ref[kh * 3 + kw],                   # (Cin, Cout)
                    preferred_element_type=jnp.float32)
        y = jnp.maximum(acc + b_ref[...], 0.0)            # bias + ReLU, once

        # 2x2 max-pool: shifted maxima along W (row+1) and H (row+Wp), then
        # extract the even (h, w) positions row-by-row.
        zw = jnp.maximum(y[:-1, :], y[1:, :])
        zh = jnp.maximum(zw[:-Wp, :], zw[Wp:, :])
        ps_ref[...] = zh
        for i in range(Ho):
            emit_row(i, ps_ref[pl.ds(2 * i * Wp, Wo, 2), :], Wo)

    def to_pf2(i, row, wo):
        pf2[pl.ds((i + 1) * Wp2 + 1, wo), :] = row

    def to_pf3(i, row, wo):
        pf3[pl.ds((i + 1) * Wp3 + 1, wo), :] = row

    def to_out(i, row, wo):
        o_ref[0, pl.ds(i * wo, wo), :] = row.astype(o_ref.dtype)

    conv_relu_pool(pf1, w1_ref, b1_ref, ps1, H1, W1, to_pf2)
    conv_relu_pool(pf2, w2_ref, b2_ref, ps2, H2, W2, to_pf3)
    conv_relu_pool(pf3, w3_ref, b3_ref, ps3, H3, W3, to_out)


def conv_encoder_fused(x_nhwc, params):
    """Fused 3-layer ConvEncoder forward on NHWC input; returns NHWC output."""
    N, H, W, Cin = x_nhwc.shape
    assert H % 8 == 0 and W % 8 == 0, "H and W must be divisible by 8"
    (w1, b1), (w2, b2), (w3, b3) = params
    C1, C2, C3 = w1.shape[-1], w2.shape[-1], w3.shape[-1]
    H2, W2, H3, W3 = H // 2, W // 2, H // 4, W // 4
    Ho, Wo = H // 8, W // 8

    pack_w = lambda w: w.reshape(9, w.shape[2], w.shape[3])   # (kh,kw) tap-major
    pack_b = lambda b: b.reshape(1, -1)

    grid_spec = pltpu.PrefetchScalarGridSpec(
        num_scalar_prefetch=0,
        grid=(N,),
        in_specs=[
            pl.BlockSpec((1, H, W, Cin), lambda n: (n, 0, 0, 0)),
            pl.BlockSpec((9, Cin, C1), lambda n: (0, 0, 0)),
            pl.BlockSpec((1, C1), lambda n: (0, 0)),
            pl.BlockSpec((9, C1, C2), lambda n: (0, 0, 0)),
            pl.BlockSpec((1, C2), lambda n: (0, 0)),
            pl.BlockSpec((9, C2, C3), lambda n: (0, 0, 0)),
            pl.BlockSpec((1, C3), lambda n: (0, 0)),
        ],
        out_specs=pl.BlockSpec((1, Ho * Wo, C3), lambda n: (n, 0, 0)),
        scratch_shapes=[
            pltpu.VMEM(((H + 2) * (W + 2) + 8, Cin), jnp.float32),     # pf1
            pltpu.VMEM(((H2 + 2) * (W2 + 2) + 8, C1), jnp.float32),    # pf2
            pltpu.VMEM(((H3 + 2) * (W3 + 2) + 8, C2), jnp.float32),    # pf3
            pltpu.VMEM(((H - 1) * (W + 2) - 1, C1), jnp.float32),      # ps1
            pltpu.VMEM(((H2 - 1) * (W2 + 2) - 1, C2), jnp.float32),    # ps2
            pltpu.VMEM(((H3 - 1) * (W3 + 2) - 1, C3), jnp.float32),    # ps3
        ],
    )
    out_flat = pl.pallas_call(
        _conv_encoder_kernel,
        out_shape=jax.ShapeDtypeStruct((N, Ho * Wo, C3), x_nhwc.dtype),
        grid_spec=grid_spec,
        compiler_params=pltpu.CompilerParams(
            dimension_semantics=("parallel",)),
    )(x_nhwc, pack_w(w1), pack_b(b1), pack_w(w2), pack_b(b2),
      pack_w(w3), pack_b(b3))
    return out_flat.reshape(N, Ho, Wo, C3)


def init_params(key):
    """Deterministic synthetic init (PyTorch-like uniform(-1/sqrt(fan_in), ..))."""
    specs = [(3, 16), (16, 32), (32, 64)]
    params = []
    for i, (cin, cout) in enumerate(specs):
        kw_, kb_ = jax.random.split(jax.random.fold_in(key, i))
        bound = 1.0 / (cin * 9) ** 0.5
        w = jax.random.uniform(kw_, (3, 3, cin, cout), jnp.float32, -bound, bound)
        b = jax.random.uniform(kb_, (cout,), jnp.float32, -bound, bound)
        params.append((w, b))
    return params


@jax.jit
def conv_encoder(x_nchw, params):
    x = jnp.transpose(x_nchw, (0, 2, 3, 1))          # NCHW -> NHWC
    y = conv_encoder_fused(x, params)                # (N, Ho, Wo, 64)
    return jnp.transpose(y, (0, 3, 1, 2))            # NHWC -> NCHW


def conv_encoder_ref(x_nchw, params):
    """Pure-JAX reference (XLA conv / reduce_window) for correctness check."""
    x = jnp.transpose(x_nchw, (0, 2, 3, 1))
    for w, b in params:
        y = lax.conv_general_dilated(
            x, w, window_strides=(1, 1), padding="SAME",
            dimension_numbers=("NHWC", "HWIO", "NHWC"))
        y = jnp.maximum(y + b, 0.0)
        x = lax.reduce_window(y, -jnp.inf, lax.max,
                              (1, 2, 2, 1), (1, 2, 2, 1), "VALID")
    return jnp.transpose(x, (0, 3, 1, 2))


if __name__ == "__main__":
    key = jax.random.PRNGKey(0)
    kx, kp = jax.random.split(key)

    # PyTorch convention: NCHW input, in_channels=3 (fixed by the module).
    x_nchw = jax.random.normal(kx, (2, 3, 16, 16), dtype=jnp.float32)
    params = init_params(kp)

    out = conv_encoder(x_nchw, params)
    out = jax.block_until_ready(out)

    assert out.shape == (2, 64, 2, 2), out.shape

    ref = conv_encoder_ref(x_nchw, params)
    if not bool(jnp.allclose(out, ref, rtol=1e-5, atol=1e-5)):
        raise AssertionError(
            f"mismatch vs reference, max abs err = {float(jnp.max(jnp.abs(out - ref)))}")

    print("KERNEL_OK")
</pallas_src>

<mosaic_0001>
module attributes {stable_mosaic.version = 11 : i64} {
  func.func @_conv_encoder_kernel(%arg0: i32, %arg1: memref<1x16x16x3xf32, #tpu.memory_space<vmem>>, %arg2: memref<9x3x16xf32, #tpu.memory_space<vmem>>, %arg3: memref<1x16xf32, #tpu.memory_space<vmem>>, %arg4: memref<9x16x32xf32, #tpu.memory_space<vmem>>, %arg5: memref<1x32xf32, #tpu.memory_space<vmem>>, %arg6: memref<9x32x64xf32, #tpu.memory_space<vmem>>, %arg7: memref<1x64xf32, #tpu.memory_space<vmem>>, %arg8: memref<1x4x64xf32, #tpu.memory_space<vmem>>, %arg9: memref<332x3xf32, #tpu.memory_space<vmem>>, %arg10: memref<108x16xf32, #tpu.memory_space<vmem>>, %arg11: memref<44x32xf32, #tpu.memory_space<vmem>>, %arg12: memref<269x16xf32, #tpu.memory_space<vmem>>, %arg13: memref<69x32xf32, #tpu.memory_space<vmem>>, %arg14: memref<17x64xf32, #tpu.memory_space<vmem>>) attributes {dimension_semantics = [#tpu.dimension_semantics<parallel>], iteration_bounds = array<i64: 2>, scalar_prefetch = 0 : i64, scratch_operands = 6 : i64, tpu.core_type = #tpu.core_type<tc>, window_params = [{transform_indices = @transform_0, window_bounds = array<i64: 1, 16, 16, 3>}, {pipeline_mode = #tpu.pipeline_mode<synchronous>, transform_indices = @transform_1, window_bounds = array<i64: 9, 3, 16>}, {pipeline_mode = #tpu.pipeline_mode<synchronous>, transform_indices = @transform_2, window_bounds = array<i64: 1, 16>}, {pipeline_mode = #tpu.pipeline_mode<synchronous>, transform_indices = @transform_3, window_bounds = array<i64: 9, 16, 32>}, {pipeline_mode = #tpu.pipeline_mode<synchronous>, transform_indices = @transform_4, window_bounds = array<i64: 1, 32>}, {pipeline_mode = #tpu.pipeline_mode<synchronous>, transform_indices = @transform_5, window_bounds = array<i64: 9, 32, 64>}, {pipeline_mode = #tpu.pipeline_mode<synchronous>, transform_indices = @transform_6, window_bounds = array<i64: 1, 64>}, {transform_indices = @transform_7, window_bounds = array<i64: 1, 4, 64>}]} {
    %cst = arith.constant 0.000000e+00 : f32
    %0 = vector.broadcast %cst : f32 to vector<332x3xf32>
    %c0 = arith.constant 0 : index
    %c0_0 = arith.constant 0 : index
    %1 = vector.load %arg9[%c0, %c0_0] : memref<332x3xf32, #tpu.memory_space<vmem>>, vector<332x3xf32>
    tpu.vector_store %arg9[%c0, %c0_0], %0 {strides = array<i32>} : memref<332x3xf32, #tpu.memory_space<vmem>>, vector<332x3xf32>,
    %cst_1 = arith.constant 0.000000e+00 : f32
    %2 = vector.broadcast %cst_1 : f32 to vector<108x16xf32>
    %c0_2 = arith.constant 0 : index
    %c0_3 = arith.constant 0 : index
    %3 = vector.load %arg10[%c0_2, %c0_3] : memref<108x16xf32, #tpu.memory_space<vmem>>, vector<108x16xf32>
    tpu.vector_store %arg10[%c0_2, %c0_3], %2 {strides = array<i32>} : memref<108x16xf32, #tpu.memory_space<vmem>>, vector<108x16xf32>,
    %cst_4 = arith.constant 0.000000e+00 : f32
    %4 = vector.broadcast %cst_4 : f32 to vector<44x32xf32>
    %c0_5 = arith.constant 0 : index
    %c0_6 = arith.constant 0 : index
    %5 = vector.load %arg11[%c0_5, %c0_6] : memref<44x32xf32, #tpu.memory_space<vmem>>, vector<44x32xf32>
    tpu.vector_store %arg11[%c0_5, %c0_6], %4 {strides = array<i32>} : memref<44x32xf32, #tpu.memory_space<vmem>>, vector<44x32xf32>,
    %c0_7 = arith.constant 0 : index
    %c0_8 = arith.constant 0 : index
    %c0_9 = arith.constant 0 : index
    %c0_10 = arith.constant 0 : index
    %6 = vector.load %arg1[%c0_7, %c0_8, %c0_9, %c0_10] : memref<1x16x16x3xf32, #tpu.memory_space<vmem>>, vector<1x1x16x3xf32>
    %7 = vector.shape_cast %6 : vector<1x1x16x3xf32> to vector<16x3xf32>
    %c19 = arith.constant 19 : index
    %c0_11 = arith.constant 0 : index
    %8 = vector.load %arg9[%c19, %c0_11] : memref<332x3xf32, #tpu.memory_space<vmem>>, vector<16x3xf32>
    tpu.vector_store %arg9[%c19, %c0_11], %7 {strides = array<i32>} : memref<332x3xf32, #tpu.memory_space<vmem>>, vector<16x3xf32>,
    %c0_12 = arith.constant 0 : index
    %c1 = arith.constant 1 : index
    %c0_13 = arith.constant 0 : index
    %c0_14 = arith.constant 0 : index
    %9 = vector.load %arg1[%c0_12, %c1, %c0_13, %c0_14] : memref<1x16x16x3xf32, #tpu.memory_space<vmem>>, vector<1x1x16x3xf32>
    %10 = vector.shape_cast %9 : vector<1x1x16x3xf32> to vector<16x3xf32>
    %c37 = arith.constant 37 : index
    %c0_15 = arith.constant 0 : index
    %11 = vector.load %arg9[%c37, %c0_15] : memref<332x3xf32, #tpu.memory_space<vmem>>, vector<16x3xf32>
    tpu.vector_store %arg9[%c37, %c0_15], %10 {strides = array<i32>} : memref<332x3xf32, #tpu.memory_space<vmem>>, vector<16x3xf32>,
    %c0_16 = arith.constant 0 : index
    %c2 = arith.constant 2 : index
    %c0_17 = arith.constant 0 : index
    %c0_18 = arith.constant 0 : index
    %12 = vector.load %arg1[%c0_16, %c2, %c0_17, %c0_18] : memref<1x16x16x3xf32, #tpu.memory_space<vmem>>, vector<1x1x16x3xf32>
    %13 = vector.shape_cast %12 : vector<1x1x16x3xf32> to vector<16x3xf32>
    %c55 = arith.constant 55 : index
    %c0_19 = arith.constant 0 : index
    %14 = vector.load %arg9[%c55, %c0_19] : memref<332x3xf32, #tpu.memory_space<vmem>>, vector<16x3xf32>
    tpu.vector_store %arg9[%c55, %c0_19], %13 {strides = array<i32>} : memref<332x3xf32, #tpu.memory_space<vmem>>, vector<16x3xf32>,
    %c0_20 = arith.constant 0 : index
    %c3 = arith.constant 3 : index
    %c0_21 = arith.constant 0 : index
    %c0_22 = arith.constant 0 : index
    %15 = vector.load %arg1[%c0_20, %c3, %c0_21, %c0_22] : memref<1x16x16x3xf32, #tpu.memory_space<vmem>>, vector<1x1x16x3xf32>
    %16 = vector.shape_cast %15 : vector<1x1x16x3xf32> to vector<16x3xf32>
    %c73 = arith.constant 73 : index
    %c0_23 = arith.constant 0 : index
    %17 = vector.load %arg9[%c73, %c0_23] : memref<332x3xf32, #tpu.memory_space<vmem>>, vector<16x3xf32>
    tpu.vector_store %arg9[%c73, %c0_23], %16 {strides = array<i32>} : memref<332x3xf32, #tpu.memory_space<vmem>>, vector<16x3xf32>,
    %c0_24 = arith.constant 0 : index
    %c4 = arith.constant 4 : index
    %c0_25 = arith.constant 0 : index
    %c0_26 = arith.constant 0 : index
    %18 = vector.load %arg1[%c0_24, %c4, %c0_25, %c0_26] : memref<1x16x16x3xf32, #tpu.memory_space<vmem>>, vector<1x1x16x3xf32>
    %19 = vector.shape_cast %18 : vector<1x1x16x3xf32> to vector<16x3xf32>
    %c91 = arith.constant 91 : index
    %c0_27 = arith.constant 0 : index
    %20 = vector.load %arg9[%c91, %c0_27] : memref<332x3xf32, #tpu.memory_space<vmem>>, vector<16x3xf32>
    tpu.vector_store %arg9[%c91, %c0_27], %19 {strides = array<i32>} : memref<332x3xf32, #tpu.memory_space<vmem>>, vector<16x3xf32>,
    %c0_28 = arith.constant 0 : index
    %c5 = arith.constant 5 : index
    %c0_29 = arith.constant 0 : index
    %c0_30 = arith.constant 0 : index
    %21 = vector.load %arg1[%c0_28, %c5, %c0_29, %c0_30] : memref<1x16x16x3xf32, #tpu.memory_space<vmem>>, vector<1x1x16x3xf32>
    %22 = vector.shape_cast %21 : vector<1x1x16x3xf32> to vector<16x3xf32>
    %c109 = arith.constant 109 : index
    %c0_31 = arith.constant 0 : index
    %23 = vector.load %arg9[%c109, %c0_31] : memref<332x3xf32, #tpu.memory_space<vmem>>, vector<16x3xf32>
    tpu.vector_store %arg9[%c109, %c0_31], %22 {strides = array<i32>} : memref<332x3xf32, #tpu.memory_space<vmem>>, vector<16x3xf32>,
    %c0_32 = arith.constant 0 : index
    %c6 = arith.constant 6 : index
    %c0_33 = arith.constant 0 : index
    %c0_34 = arith.constant 0 : index
    %24 = vector.load %arg1[%c0_32, %c6, %c0_33, %c0_34] : memref<1x16x16x3xf32, #tpu.memory_space<vmem>>, vector<1x1x16x3xf32>
    %25 = vector.shape_cast %24 : vector<1x1x16x3xf32> to vector<16x3xf32>
    %c127 = arith.constant 127 : index
    %c0_35 = arith.constant 0 : index
    %26 = vector.load %arg9[%c127, %c0_35] : memref<332x3xf32, #tpu.memory_space<vmem>>, vector<16x3xf32>
    tpu.vector_store %arg9[%c127, %c0_35], %25 {strides = array<i32>} : memref<332x3xf32, #tpu.memory_space<vmem>>, vector<16x3xf32>,
    %c0_36 = arith.constant 0 : index
    %c7 = arith.constant 7 : index
    %c0_37 = arith.constant 0 : index
    %c0_38 = arith.constant 0 : index
    %27 = vector.load %arg1[%c0_36, %c7, %c0_37, %c0_38] : memref<1x16x16x3xf32, #tpu.memory_space<vmem>>, vector<1x1x16x3xf32>
    %28 = vector.shape_cast %27 : vector<1x1x16x3xf32> to vector<16x3xf32>
    %c145 = arith.constant 145 : index
    %c0_39 = arith.constant 0 : index
    %29 = vector.load %arg9[%c145, %c0_39] : memref<332x3xf32, #tpu.memory_space<vmem>>, vector<16x3xf32>
    tpu.vector_store %arg9[%c145, %c0_39], %28 {strides = array<i32>} : memref<332x3xf32, #tpu.memory_space<vmem>>, vector<16x3xf32>,
    %c0_40 = arith.constant 0 : index
    %c8 = arith.constant 8 : index
    %c0_41 = arith.constant 0 : index
    %c0_42 = arith.constant 0 : index
    %30 = vector.load %arg1[%c0_40, %c8, %c0_41, %c0_42] : memref<1x16x16x3xf32, #tpu.memory_space<vmem>>, vector<1x1x16x3xf32>
    %31 = vector.shape_cast %30 : vector<1x1x16x3xf32> to vector<16x3xf32>
    %c163 = arith.constant 163 : index
    %c0_43 = arith.constant 0 : index
    %32 = vector.load %arg9[%c163, %c0_43] : memref<332x3xf32, #tpu.memory_space<vmem>>, vector<16x3xf32>
    tpu.vector_store %arg9[%c163, %c0_43], %31 {strides = array<i32>} : memref<332x3xf32, #tpu.memory_space<vmem>>, vector<16x3xf32>,
    %c0_44 = arith.constant 0 : index
    %c9 = arith.constant 9 : index
    %c0_45 = arith.constant 0 : index
    %c0_46 = arith.constant 0 : index
    %33 = vector.load %arg1[%c0_44, %c9, %c0_45, %c0_46] : memref<1x16x16x3xf32, #tpu.memory_space<vmem>>, vector<1x1x16x3xf32>
    %34 = vector.shape_cast %33 : vector<1x1x16x3xf32> to vector<16x3xf32>
    %c181 = arith.constant 181 : index
    %c0_47 = arith.constant 0 : index
    %35 = vector.load %arg9[%c181, %c0_47] : memref<332x3xf32, #tpu.memory_space<vmem>>, vector<16x3xf32>
    tpu.vector_store %arg9[%c181, %c0_47], %34 {strides = array<i32>} : memref<332x3xf32, #tpu.memory_space<vmem>>, vector<16x3xf32>,
    %c0_48 = arith.constant 0 : index
    %c10 = arith.constant 10 : index
    %c0_49 = arith.constant 0 : index
    %c0_50 = arith.constant 0 : index
    %36 = vector.load %arg1[%c0_48, %c10, %c0_49, %c0_50] : memref<1x16x16x3xf32, #tpu.memory_space<vmem>>, vector<1x1x16x3xf32>
    %37 = vector.shape_cast %36 : vector<1x1x16x3xf32> to vector<16x3xf32>
    %c199 = arith.constant 199 : index
    %c0_51 = arith.constant 0 : index
    %38 = vector.load %arg9[%c199, %c0_51] : memref<332x3xf32, #tpu.memory_space<vmem>>, vector<16x3xf32>
    tpu.vector_store %arg9[%c199, %c0_51], %37 {strides = array<i32>} : memref<332x3xf32, #tpu.memory_space<vmem>>, vector<16x3xf32>,
    %c0_52 = arith.constant 0 : index
    %c11 = arith.constant 11 : index
    %c0_53 = arith.constant 0 : index
    %c0_54 = arith.constant 0 : index
    %39 = vector.load %arg1[%c0_52, %c11, %c0_53, %c0_54] : memref<1x16x16x3xf32, #tpu.memory_space<vmem>>, vector<1x1x16x3xf32>
    %40 = vector.shape_cast %39 : vector<1x1x16x3xf32> to vector<16x3xf32>
    %c217 = arith.constant 217 : index
    %c0_55 = arith.constant 0 : index
    %41 = vector.load %arg9[%c217, %c0_55] : memref<332x3xf32, #tpu.memory_space<vmem>>, vector<16x3xf32>
    tpu.vector_store %arg9[%c217, %c0_55], %40 {strides = array<i32>} : memref<332x3xf32, #tpu.memory_space<vmem>>, vector<16x3xf32>,
    %c0_56 = arith.constant 0 : index
    %c12 = arith.constant 12 : index
    %c0_57 = arith.constant 0 : index
    %c0_58 = arith.constant 0 : index
    %42 = vector.load %arg1[%c0_56, %c12, %c0_57, %c0_58] : memref<1x16x16x3xf32, #tpu.memory_space<vmem>>, vector<1x1x16x3xf32>
    %43 = vector.shape_cast %42 : vector<1x1x16x3xf32> to vector<16x3xf32>
    %c235 = arith.constant 235 : index
    %c0_59 = arith.constant 0 : index
    %44 = vector.load %arg9[%c235, %c0_59] : memref<332x3xf32, #tpu.memory_space<vmem>>, vector<16x3xf32>
    tpu.vector_store %arg9[%c235, %c0_59], %43 {strides = array<i32>} : memref<332x3xf32, #tpu.memory_space<vmem>>, vector<16x3xf32>,
    %c0_60 = arith.constant 0 : index
    %c13 = arith.constant 13 : index
    %c0_61 = arith.constant 0 : index
    %c0_62 = arith.constant 0 : index
    %45 = vector.load %arg1[%c0_60, %c13, %c0_61, %c0_62] : memref<1x16x16x3xf32, #tpu.memory_space<vmem>>, vector<1x1x16x3xf32>
    %46 = vector.shape_cast %45 : vector<1x1x16x3xf32> to vector<16x3xf32>
    %c253 = arith.constant 253 : index
    %c0_63 = arith.constant 0 : index
    %47 = vector.load %arg9[%c253, %c0_63] : memref<332x3xf32, #tpu.memory_space<vmem>>, vector<16x3xf32>
    tpu.vector_store %arg9[%c253, %c0_63], %46 {strides = array<i32>} : memref<332x3xf32, #tpu.memory_space<vmem>>, vector<16x3xf32>,
    %c0_64 = arith.constant 0 : index
    %c14 = arith.constant 14 : index
    %c0_65 = arith.constant 0 : index
    %c0_66 = arith.constant 0 : index
    %48 = vector.load %arg1[%c0_64, %c14, %c0_65, %c0_66] : memref<1x16x16x3xf32, #tpu.memory_space<vmem>>, vector<1x1x16x3xf32>
    %49 = vector.shape_cast %48 : vector<1x1x16x3xf32> to vector<16x3xf32>
    %c271 = arith.constant 271 : index
    %c0_67 = arith.constant 0 : index
    %50 = vector.load %arg9[%c271, %c0_67] : memref<332x3xf32, #tpu.memory_space<vmem>>, vector<16x3xf32>
    tpu.vector_store %arg9[%c271, %c0_67], %49 {strides = array<i32>} : memref<332x3xf32, #tpu.memory_space<vmem>>, vector<16x3xf32>,
    %c0_68 = arith.constant 0 : index
    %c15 = arith.constant 15 : index
    %c0_69 = arith.constant 0 : index
    %c0_70 = arith.constant 0 : index
    %51 = vector.load %arg1[%c0_68, %c15, %c0_69, %c0_70] : memref<1x16x16x3xf32, #tpu.memory_space<vmem>>, vector<1x1x16x3xf32>
    %52 = vector.shape_cast %51 : vector<1x1x16x3xf32> to vector<16x3xf32>
    %c289 = arith.constant 289 : index
    %c0_71 = arith.constant 0 : index
    %53 = vector.load %arg9[%c289, %c0_71] : memref<332x3xf32, #tpu.memory_space<vmem>>, vector<16x3xf32>
    tpu.vector_store %arg9[%c289, %c0_71], %52 {strides = array<i32>} : memref<332x3xf32, #tpu.memory_space<vmem>>, vector<16x3xf32>,
    %cst_72 = arith.constant 0.000000e+00 : f32
    %54 = vector.broadcast %cst_72 : f32 to vector<288x16xf32>
    %c0_73 = arith.constant 0 : index
    %c0_74 = arith.constant 0 : index
    %55 = vector.load %arg9[%c0_73, %c0_74] : memref<332x3xf32, #tpu.memory_space<vmem>>, vector<288x3xf32>
    %c0_75 = arith.constant 0 : index
    %c0_76 = arith.constant 0 : index
    %c0_77 = arith.constant 0 : index
    %56 = vector.load %arg2[%c0_75, %c0_76, %c0_77] : memref<9x3x16xf32, #tpu.memory_space<vmem>>, vector<1x3x16xf32>
    %57 = vector.shape_cast %56 : vector<1x3x16xf32> to vector<3x16xf32>
    %cst_78 = arith.constant dense<0.000000e+00> : vector<288x16xf32>
    %58 = tpu.matmul %55, %57, %cst_78 {dimension_numbers = #tpu.dot_dimension_numbers<[1], [0], [0], [1], [0, 0, 1, 1], [], []>} : vector<288x3xf32>, vector<3x16xf32>, vector<288x16xf32> -> vector<288x16xf32>
    %59 = arith.addf %54, %58 : vector<288x16xf32>
    %c1_79 = arith.constant 1 : index
    %c0_80 = arith.constant 0 : index
    %60 = vector.load %arg9[%c1_79, %c0_80] : memref<332x3xf32, #tpu.memory_space<vmem>>, vector<288x3xf32>
    %c1_81 = arith.constant 1 : index
    %c0_82 = arith.constant 0 : index
    %c0_83 = arith.constant 0 : index
    %61 = vector.load %arg2[%c1_81, %c0_82, %c0_83] : memref<9x3x16xf32, #tpu.memory_space<vmem>>, vector<1x3x16xf32>
    %62 = vector.shape_cast %61 : vector<1x3x16xf32> to vector<3x16xf32>
    %cst_84 = arith.constant dense<0.000000e+00> : vector<288x16xf32>
    %63 = tpu.matmul %60, %62, %cst_84 {dimension_numbers = #tpu.dot_dimension_numbers<[1], [0], [0], [1], [0, 0, 1, 1], [], []>} : vector<288x3xf32>, vector<3x16xf32>, vector<288x16xf32> -> vector<288x16xf32>
    %64 = arith.addf %59, %63 : vector<288x16xf32>
    %c2_85 = arith.constant 2 : index
    %c0_86 = arith.constant 0 : index
    %65 = vector.load %arg9[%c2_85, %c0_86] : memref<332x3xf32, #tpu.memory_space<vmem>>, vector<288x3xf32>
    %c2_87 = arith.constant 2 : index
    %c0_88 = arith.constant 0 : index
    %c0_89 = arith.constant 0 : index
    %66 = vector.load %arg2[%c2_87, %c0_88, %c0_89] : memref<9x3x16xf32, #tpu.memory_space<vmem>>, vector<1x3x16xf32>
    %67 = vector.shape_cast %66 : vector<1x3x16xf32> to vector<3x16xf32>
    %cst_90 = arith.constant dense<0.000000e+00> : vector<288x16xf32>
    %68 = tpu.matmul %65, %67, %cst_90 {dimension_numbers = #tpu.dot_dimension_numbers<[1], [0], [0], [1], [0, 0, 1, 1], [], []>} : vector<288x3xf32>, vector<3x16xf32>, vector<288x16xf32> -> vector<288x16xf32>
    %69 = arith.addf %64, %68 : vector<288x16xf32>
    %c18 = arith.constant 18 : index
    %c0_91 = arith.constant 0 : index
    %70 = vector.load %arg9[%c18, %c0_91] : memref<332x3xf32, #tpu.memory_space<vmem>>, vector<288x3xf32>
    %c3_92 = arith.constant 3 : index
    %c0_93 = arith.constant 0 : index
    %c0_94 = arith.constant 0 : index
    %71 = vector.load %arg2[%c3_92, %c0_93, %c0_94] : memref<9x3x16xf32, #tpu.memory_space<vmem>>, vector<1x3x16xf32>
    %72 = vector.shape_cast %71 : vector<1x3x16xf32> to vector<3x16xf32>
    %cst_95 = arith.constant dense<0.000000e+00> : vector<288x16xf32>
    %73 = tpu.matmul %70, %72, %cst_95 {dimension_numbers = #tpu.dot_dimension_numbers<[1], [0], [0], [1], [0, 0, 1, 1], [], []>} : vector<288x3xf32>, vector<3x16xf32>, vector<288x16xf32> -> vector<288x16xf32>
    %74 = arith.addf %69, %73 : vector<288x16xf32>
    %c19_96 = arith.constant 19 : index
    %c0_97 = arith.constant 0 : index
    %75 = vector.load %arg9[%c19_96, %c0_97] : memref<332x3xf32, #tpu.memory_space<vmem>>, vector<288x3xf32>
    %c4_98 = arith.constant 4 : index
    %c0_99 = arith.constant 0 : index
    %c0_100 = arith.constant 0 : index
    %76 = vector.load %arg2[%c4_98, %c0_99, %c0_100] : memref<9x3x16xf32, #tpu.memory_space<vmem>>, vector<1x3x16xf32>
    %77 = vector.shape_cast %76 : vector<1x3x16xf32> to vector<3x16xf32>
    %cst_101 = arith.constant dense<0.000000e+00> : vector<288x16xf32>
    %78 = tpu.matmul %75, %77, %cst_101 {dimension_numbers = #tpu.dot_dimension_numbers<[1], [0], [0], [1], [0, 0, 1, 1], [], []>} : vector<288x3xf32>, vector<3x16xf32>, vector<288x16xf32> -> vector<288x16xf32>
    %79 = arith.addf %74, %78 : vector<288x16xf32>
    %c20 = arith.constant 20 : index
    %c0_102 = arith.constant 0 : index
    %80 = vector.load %arg9[%c20, %c0_102] : memref<332x3xf32, #tpu.memory_space<vmem>>, vector<288x3xf32>
    %c5_103 = arith.constant 5 : index
    %c0_104 = arith.constant 0 : index
    %c0_105 = arith.constant 0 : index
    %81 = vector.load %arg2[%c5_103, %c0_104, %c0_105] : memref<9x3x16xf32, #tpu.memory_space<vmem>>, vector<1x3x16xf32>
    %82 = vector.shape_cast %81 : vector<1x3x16xf32> to vector<3x16xf32>
    %cst_106 = arith.constant dense<0.000000e+00> : vector<288x16xf32>
    %83 = tpu.matmul %80, %82, %cst_106 {dimension_numbers = #tpu.dot_dimension_numbers<[1], [0], [0], [1], [0, 0, 1, 1], [], []>} : vector<288x3xf32>, vector<3x16xf32>, vector<288x16xf32> -> vector<288x16xf32>
    %84 = arith.addf %79, %83 : vector<288x16xf32>
    %c36 = arith.constant 36 : index
    %c0_107 = arith.constant 0 : index
    %85 = vector.load %arg9[%c36, %c0_107] : memref<332x3xf32, #tpu.memory_space<vmem>>, vector<288x3xf32>
    %c6_108 = arith.constant 6 : index
    %c0_109 = arith.constant 0 : index
    %c0_110 = arith.constant 0 : index
    %86 = vector.load %arg2[%c6_108, %c0_109, %c0_110] : memref<9x3x16xf32, #tpu.memory_space<vmem>>, vector<1x3x16xf32>
    %87 = vector.shape_cast %86 : vector<1x3x16xf32> to vector<3x16xf32>
    %cst_111 = arith.constant dense<0.000000e+00> : vector<288x16xf32>
    %88 = tpu.matmul %85, %87, %cst_111 {dimension_numbers = #tpu.dot_dimension_numbers<[1], [0], [0], [1], [0, 0, 1, 1], [], []>} : vector<288x3xf32>, vector<3x16xf32>, vector<288x16xf32> -> vector<288x16xf32>
    %89 = arith.addf %84, %88 : vector<288x16xf32>
    %c37_112 = arith.constant 37 : index
    %c0_113 = arith.constant 0 : index
    %90 = vector.load %arg9[%c37_112, %c0_113] : memref<332x3xf32, #tpu.memory_space<vmem>>, vector<288x3xf32>
    %c7_114 = arith.constant 7 : index
    %c0_115 = arith.constant 0 : index
    %c0_116 = arith.constant 0 : index
    %91 = vector.load %arg2[%c7_114, %c0_115, %c0_116] : memref<9x3x16xf32, #tpu.memory_space<vmem>>, vector<1x3x16xf32>
    %92 = vector.shape_cast %91 : vector<1x3x16xf32> to vector<3x16xf32>
    %cst_117 = arith.constant dense<0.000000e+00> : vector<288x16xf32>
    %93 = tpu.matmul %90, %92, %cst_117 {dimension_numbers = #tpu.dot_dimension_numbers<[1], [0], [0], [1], [0, 0, 1, 1], [], []>} : vector<288x3xf32>, vector<3x16xf32>, vector<288x16xf32> -> vector<288x16xf32>
    %94 = arith.addf %89, %93 : vector<288x16xf32>
    %c38 = arith.constant 38 : index
    %c0_118 = arith.constant 0 : index
    %95 = vector.load %arg9[%c38, %c0_118] : memref<332x3xf32, #tpu.memory_space<vmem>>, vector<288x3xf32>
    %c8_119 = arith.constant 8 : index
    %c0_120 = arith.constant 0 : index
    %c0_121 = arith.constant 0 : index
    %96 = vector.load %arg2[%c8_119, %c0_120, %c0_121] : memref<9x3x16xf32, #tpu.memory_space<vmem>>, vector<1x3x16xf32>
    %97 = vector.shape_cast %96 : vector<1x3x16xf32> to vector<3x16xf32>
    %cst_122 = arith.constant dense<0.000000e+00> : vector<288x16xf32>
    %98 = tpu.matmul %95, %97, %cst_122 {dimension_numbers = #tpu.dot_dimension_numbers<[1], [0], [0], [1], [0, 0, 1, 1], [], []>} : vector<288x3xf32>, vector<3x16xf32>, vector<288x16xf32> -> vector<288x16xf32>
    %99 = arith.addf %94, %98 : vector<288x16xf32>
    %c0_123 = arith.constant 0 : index
    %c0_124 = arith.constant 0 : index
    %100 = vector.load %arg3[%c0_123, %c0_124] : memref<1x16xf32, #tpu.memory_space<vmem>>, vector<1x16xf32>
    %101 = vector.broadcast %100 : vector<1x16xf32> to vector<288x16xf32>
    %102 = arith.addf %99, %101 : vector<288x16xf32>
    %cst_125 = arith.constant 0.000000e+00 : f32
    %103 = vector.broadcast %cst_125 : f32 to vector<288x16xf32>
    %104 = arith.maximumf %102, %103 : vector<288x16xf32>
    %105 = vector.extract_strided_slice %104 {offsets = [0, 0], sizes = [287, 16], strides = [1, 1]} : vector<288x16xf32> to vector<287x16xf32>
    %106 = vector.extract_strided_slice %104 {offsets = [1, 0], sizes = [287, 16], strides = [1, 1]} : vector<288x16xf32> to vector<287x16xf32>
    %107 = arith.maximumf %105, %106 : vector<287x16xf32>
    %108 = vector.extract_strided_slice %107 {offsets = [0, 0], sizes = [269, 16], strides = [1, 1]} : vector<287x16xf32> to vector<269x16xf32>
    %109 = vector.extract_strided_slice %107 {offsets = [18, 0], sizes = [269, 16], strides = [1, 1]} : vector<287x16xf32> to vector<269x16xf32>
    %110 = arith.maximumf %108, %109 : vector<269x16xf32>
    %c0_126 = arith.constant 0 : index
    %c0_127 = arith.constant 0 : index
    %111 = vector.load %arg12[%c0_126, %c0_127] : memref<269x16xf32, #tpu.memory_space<vmem>>, vector<269x16xf32>
    tpu.vector_store %arg12[%c0_126, %c0_127], %110 {strides = array<i32>} : memref<269x16xf32, #tpu.memory_space<vmem>>, vector<269x16xf32>,
    %c0_128 = arith.constant 0 : index
    %c0_129 = arith.constant 0 : index
    %112 = tpu.strided_load %arg12[%c0_128, %c0_129] {strides = array<i32: 2, 1>} : memref<269x16xf32, #tpu.memory_space<vmem>>, vector<8x16xf32>
    %c11_130 = arith.constant 11 : index
    %c0_131 = arith.constant 0 : index
    %113 = vector.load %arg10[%c11_130, %c0_131] : memref<108x16xf32, #tpu.memory_space<vmem>>, vector<8x16xf32>
    tpu.vector_store %arg10[%c11_130, %c0_131], %112 {strides = array<i32>} : memref<108x16xf32, #tpu.memory_space<vmem>>, vector<8x16xf32>,
    %c36_132 = arith.constant 36 : index
    %c0_133 = arith.constant 0 : index
    %114 = tpu.strided_load %arg12[%c36_132, %c0_133] {strides = array<i32: 2, 1>} : memref<269x16xf32, #tpu.memory_space<vmem>>, vector<8x16xf32>
    %c21 = arith.constant 21 : index
    %c0_134 = arith.constant 0 : index
    %115 = vector.load %arg10[%c21, %c0_134] : memref<108x16xf32, #tpu.memory_space<vmem>>, vector<8x16xf32>
    tpu.vector_store %arg10[%c21, %c0_134], %114 {strides = array<i32>} : memref<108x16xf32, #tpu.memory_space<vmem>>, vector<8x16xf32>,
    %c72 = arith.constant 72 : index
    %c0_135 = arith.constant 0 : index
    %116 = tpu.strided_load %arg12[%c72, %c0_135] {strides = array<i32: 2, 1>} : memref<269x16xf32, #tpu.memory_space<vmem>>, vector<8x16xf32>
    %c31 = arith.constant 31 : index
    %c0_136 = arith.constant 0 : index
    %117 = vector.load %arg10[%c31, %c0_136] : memref<108x16xf32, #tpu.memory_space<vmem>>, vector<8x16xf32>
    tpu.vector_store %arg10[%c31, %c0_136], %116 {strides = array<i32>} : memref<108x16xf32, #tpu.memory_space<vmem>>, vector<8x16xf32>,
    %c108 = arith.constant 108 : index
    %c0_137 = arith.constant 0 : index
    %118 = tpu.strided_load %arg12[%c108, %c0_137] {strides = array<i32: 2, 1>} : memref<269x16xf32, #tpu.memory_space<vmem>>, vector<8x16xf32>
    %c41 = arith.constant 41 : index
    %c0_138 = arith.constant 0 : index
    %119 = vector.load %arg10[%c41, %c0_138] : memref<108x16xf32, #tpu.memory_space<vmem>>, vector<8x16xf32>
    tpu.vector_store %arg10[%c41, %c0_138], %118 {strides = array<i32>} : memref<108x16xf32, #tpu.memory_space<vmem>>, vector<8x16xf32>,
    %c144 = arith.constant 144 : index
    %c0_139 = arith.constant 0 : index
    %120 = tpu.strided_load %arg12[%c144, %c0_139] {strides = array<i32: 2, 1>} : memref<269x16xf32, #tpu.memory_space<vmem>>, vector<8x16xf32>
    %c51 = arith.constant 51 : index
    %c0_140 = arith.constant 0 : index
    %121 = vector.load %arg10[%c51, %c0_140] : memref<108x16xf32, #tpu.memory_space<vmem>>, vector<8x16xf32>
    tpu.vector_store %arg10[%c51, %c0_140], %120 {strides = array<i32>} : memref<108x16xf32, #tpu.memory_space<vmem>>, vector<8x16xf32>,
    %c180 = arith.constant 180 : index
    %c0_141 = arith.constant 0 : index
    %122 = tpu.strided_load %arg12[%c180, %c0_141] {strides = array<i32: 2, 1>} : memref<269x16xf32, #tpu.memory_space<vmem>>, vector<8x16xf32>
    %c61 = arith.constant 61 : index
    %c0_142 = arith.constant 0 : index
    %123 = vector.load %arg10[%c61, %c0_142] : memref<108x16xf32, #tpu.memory_space<vmem>>, vector<8x16xf32>
    tpu.vector_store %arg10[%c61, %c0_142], %122 {strides = array<i32>} : memref<108x16xf32, #tpu.memory_space<vmem>>, vector<8x16xf32>,
    %c216 = arith.constant 216 : index
    %c0_143 = arith.constant 0 : index
    %124 = tpu.strided_load %arg12[%c216, %c0_143] {strides = array<i32: 2, 1>} : memref<269x16xf32, #tpu.memory_space<vmem>>, vector<8x16xf32>
    %c71 = arith.constant 71 : index
    %c0_144 = arith.constant 0 : index
    %125 = vector.load %arg10[%c71, %c0_144] : memref<108x16xf32, #tpu.memory_space<vmem>>, vector<8x16xf32>
    tpu.vector_store %arg10[%c71, %c0_144], %124 {strides = array<i32>} : memref<108x16xf32, #tpu.memory_space<vmem>>, vector<8x16xf32>,
    %c252 = arith.constant 252 : index
    %c0_145 = arith.constant 0 : index
    %126 = tpu.strided_load %arg12[%c252, %c0_145] {strides = array<i32: 2, 1>} : memref<269x16xf32, #tpu.memory_space<vmem>>, vector<8x16xf32>
    %c81 = arith.constant 81 : index
    %c0_146 = arith.constant 0 : index
    %127 = vector.load %arg10[%c81, %c0_146] : memref<108x16xf32, #tpu.memory_space<vmem>>, vector<8x16xf32>
    tpu.vector_store %arg10[%c81, %c0_146], %126 {strides = array<i32>} : memref<108x16xf32, #tpu.memory_space<vmem>>, vector<8x16xf32>,
    %cst_147 = arith.constant 0.000000e+00 : f32
    %128 = vector.broadcast %cst_147 : f32 to vector<80x32xf32>
    %c0_148 = arith.constant 0 : index
    %c0_149 = arith.constant 0 : index
    %129 = vector.load %arg10[%c0_148, %c0_149] : memref<108x16xf32, #tpu.memory_space<vmem>>, vector<80x16xf32>
    %c0_150 = arith.constant 0 : index
    %c0_151 = arith.constant 0 : index
    %c0_152 = arith.constant 0 : index
    %130 = vector.load %arg4[%c0_150, %c0_151, %c0_152] : memref<9x16x32xf32, #tpu.memory_space<vmem>>, vector<1x16x32xf32>
    %131 = vector.shape_cast %130 : vector<1x16x32xf32> to vector<16x32xf32>
    %cst_153 = arith.constant dense<0.000000e+00> : vector<80x32xf32>
    %132 = tpu.matmul %129, %131, %cst_153 {dimension_numbers = #tpu.dot_dimension_numbers<[1], [0], [0], [1], [0, 0, 1, 1], [], []>} : vector<80x16xf32>, vector<16x32xf32>, vector<80x32xf32> -> vector<80x32xf32>
    %133 = arith.addf %128, %132 : vector<80x32xf32>
    %c1_154 = arith.constant 1 : index
    %c0_155 = arith.constant 0 : index
    %134 = vector.load %arg10[%c1_154, %c0_155] : memref<108x16xf32, #tpu.memory_space<vmem>>, vector<80x16xf32>
    %c1_156 = arith.constant 1 : index
    %c0_157 = arith.constant 0 : index
    %c0_158 = arith.constant 0 : index
    %135 = vector.load %arg4[%c1_156, %c0_157, %c0_158] : memref<9x16x32xf32, #tpu.memory_space<vmem>>, vector<1x16x32xf32>
    %136 = vector.shape_cast %135 : vector<1x16x32xf32> to vector<16x32xf32>
    %cst_159 = arith.constant dense<0.000000e+00> : vector<80x32xf32>
    %137 = tpu.matmul %134, %136, %cst_159 {dimension_numbers = #tpu.dot_dimension_numbers<[1], [0], [0], [1], [0, 0, 1, 1], [], []>} : vector<80x16xf32>, vector<16x32xf32>, vector<80x32xf32> -> vector<80x32xf32>
    %138 = arith.addf %133, %137 : vector<80x32xf32>
    %c2_160 = arith.constant 2 : index
    %c0_161 = arith.constant 0 : index
    %139 = vector.load %arg10[%c2_160, %c0_161] : memref<108x16xf32, #tpu.memory_space<vmem>>, vector<80x16xf32>
    %c2_162 = arith.constant 2 : index
    %c0_163 = arith.constant 0 : index
    %c0_164 = arith.constant 0 : index
    %140 = vector.load %arg4[%c2_162, %c0_163, %c0_164] : memref<9x16x32xf32, #tpu.memory_space<vmem>>, vector<1x16x32xf32>
    %141 = vector.shape_cast %140 : vector<1x16x32xf32> to vector<16x32xf32>
    %cst_165 = arith.constant dense<0.000000e+00> : vector<80x32xf32>
    %142 = tpu.matmul %139, %141, %cst_165 {dimension_numbers = #tpu.dot_dimension_numbers<[1], [0], [0], [1], [0, 0, 1, 1], [], []>} : vector<80x16xf32>, vector<16x32xf32>, vector<80x32xf32> -> vector<80x32xf32>
    %143 = arith.addf %138, %142 : vector<80x32xf32>
    %c10_166 = arith.constant 10 : index
    %c0_167 = arith.constant 0 : index
    %144 = vector.load %arg10[%c10_166, %c0_167] : memref<108x16xf32, #tpu.memory_space<vmem>>, vector<80x16xf32>
    %c3_168 = arith.constant 3 : index
    %c0_169 = arith.constant 0 : index
    %c0_170 = arith.constant 0 : index
    %145 = vector.load %arg4[%c3_168, %c0_169, %c0_170] : memref<9x16x32xf32, #tpu.memory_space<vmem>>, vector<1x16x32xf32>
    %146 = vector.shape_cast %145 : vector<1x16x32xf32> to vector<16x32xf32>
    %cst_171 = arith.constant dense<0.000000e+00> : vector<80x32xf32>
    %147 = tpu.matmul %144, %146, %cst_171 {dimension_numbers = #tpu.dot_dimension_numbers<[1], [0], [0], [1], [0, 0, 1, 1], [], []>} : vector<80x16xf32>, vector<16x32xf32>, vector<80x32xf32> -> vector<80x32xf32>
    %148 = arith.addf %143, %147 : vector<80x32xf32>
    %c11_172 = arith.constant 11 : index
    %c0_173 = arith.constant 0 : index
    %149 = vector.load %arg10[%c11_172, %c0_173] : memref<108x16xf32, #tpu.memory_space<vmem>>, vector<80x16xf32>
    %c4_174 = arith.constant 4 : index
    %c0_175 = arith.constant 0 : index
    %c0_176 = arith.constant 0 : index
    %150 = vector.load %arg4[%c4_174, %c0_175, %c0_176] : memref<9x16x32xf32, #tpu.memory_space<vmem>>, vector<1x16x32xf32>
    %151 = vector.shape_cast %150 : vector<1x16x32xf32> to vector<16x32xf32>
    %cst_177 = arith.constant dense<0.000000e+00> : vector<80x32xf32>
    %152 = tpu.matmul %149, %151, %cst_177 {dimension_numbers = #tpu.dot_dimension_numbers<[1], [0], [0], [1], [0, 0, 1, 1], [], []>} : vector<80x16xf32>, vector<16x32xf32>, vector<80x32xf32> -> vector<80x32xf32>
    %153 = arith.addf %148, %152 : vector<80x32xf32>
    %c12_178 = arith.constant 12 : index
    %c0_179 = arith.constant 0 : index
    %154 = vector.load %arg10[%c12_178, %c0_179] : memref<108x16xf32, #tpu.memory_space<vmem>>, vector<80x16xf32>
    %c5_180 = arith.constant 5 : index
    %c0_181 = arith.constant 0 : index
    %c0_182 = arith.constant 0 : index
    %155 = vector.load %arg4[%c5_180, %c0_181, %c0_182] : memref<9x16x32xf32, #tpu.memory_space<vmem>>, vector<1x16x32xf32>
    %156 = vector.shape_cast %155 : vector<1x16x32xf32> to vector<16x32xf32>
    %cst_183 = arith.constant dense<0.000000e+00> : vector<80x32xf32>
    %157 = tpu.matmul %154, %156, %cst_183 {dimension_numbers = #tpu.dot_dimension_numbers<[1], [0], [0], [1], [0, 0, 1, 1], [], []>} : vector<80x16xf32>, vector<16x32xf32>, vector<80x32xf32> -> vector<80x32xf32>
    %158 = arith.addf %153, %157 : vector<80x32xf32>
    %c20_184 = arith.constant 20 : index
    %c0_185 = arith.constant 0 : index
    %159 = vector.load %arg10[%c20_184, %c0_185] : memref<108x16xf32, #tpu.memory_space<vmem>>, vector<80x16xf32>
    %c6_186 = arith.constant 6 : index
    %c0_187 = arith.constant 0 : index
    %c0_188 = arith.constant 0 : index
    %160 = vector.load %arg4[%c6_186, %c0_187, %c0_188] : memref<9x16x32xf32, #tpu.memory_space<vmem>>, vector<1x16x32xf32>
    %161 = vector.shape_cast %160 : vector<1x16x32xf32> to vector<16x32xf32>
    %cst_189 = arith.constant dense<0.000000e+00> : vector<80x32xf32>
    %162 = tpu.matmul %159, %161, %cst_189 {dimension_numbers = #tpu.dot_dimension_numbers<[1], [0], [0], [1], [0, 0, 1, 1], [], []>} : vector<80x16xf32>, vector<16x32xf32>, vector<80x32xf32> -> vector<80x32xf32>
    %163 = arith.addf %158, %162 : vector<80x32xf32>
    %c21_190 = arith.constant 21 : index
    %c0_191 = arith.constant 0 : index
    %164 = vector.load %arg10[%c21_190, %c0_191] : memref<108x16xf32, #tpu.memory_space<vmem>>, vector<80x16xf32>
    %c7_192 = arith.constant 7 : index
    %c0_193 = arith.constant 0 : index
    %c0_194 = arith.constant 0 : index
    %165 = vector.load %arg4[%c7_192, %c0_193, %c0_194] : memref<9x16x32xf32, #tpu.memory_space<vmem>>, vector<1x16x32xf32>
    %166 = vector.shape_cast %165 : vector<1x16x32xf32> to vector<16x32xf32>
    %cst_195 = arith.constant dense<0.000000e+00> : vector<80x32xf32>
    %167 = tpu.matmul %164, %166, %cst_195 {dimension_numbers = #tpu.dot_dimension_numbers<[1], [0], [0], [1], [0, 0, 1, 1], [], []>} : vector<80x16xf32>, vector<16x32xf32>, vector<80x32xf32> -> vector<80x32xf32>
    %168 = arith.addf %163, %167 : vector<80x32xf32>
    %c22 = arith.constant 22 : index
    %c0_196 = arith.constant 0 : index
    %169 = vector.load %arg10[%c22, %c0_196] : memref<108x16xf32, #tpu.memory_space<vmem>>, vector<80x16xf32>
    %c8_197 = arith.constant 8 : index
    %c0_198 = arith.constant 0 : index
    %c0_199 = arith.constant 0 : index
    %170 = vector.load %arg4[%c8_197, %c0_198, %c0_199] : memref<9x16x32xf32, #tpu.memory_space<vmem>>, vector<1x16x32xf32>
    %171 = vector.shape_cast %170 : vector<1x16x32xf32> to vector<16x32xf32>
    %cst_200 = arith.constant dense<0.000000e+00> : vector<80x32xf32>
    %172 = tpu.matmul %169, %171, %cst_200 {dimension_numbers = #tpu.dot_dimension_numbers<[1], [0], [0], [1], [0, 0, 1, 1], [], []>} : vector<80x16xf32>, vector<16x32xf32>, vector<80x32xf32> -> vector<80x32xf32>
    %173 = arith.addf %168, %172 : vector<80x32xf32>
    %c0_201 = arith.constant 0 : index
    %c0_202 = arith.constant 0 : index
    %174 = vector.load %arg5[%c0_201, %c0_202] : memref<1x32xf32, #tpu.memory_space<vmem>>, vector<1x32xf32>
    %175 = vector.broadcast %174 : vector<1x32xf32> to vector<80x32xf32>
    %176 = arith.addf %173, %175 : vector<80x32xf32>
    %cst_203 = arith.constant 0.000000e+00 : f32
    %177 = vector.broadcast %cst_203 : f32 to vector<80x32xf32>
    %178 = arith.maximumf %176, %177 : vector<80x32xf32>
    %179 = vector.extract_strided_slice %178 {offsets = [0, 0], sizes = [79, 32], strides = [1, 1]} : vector<80x32xf32> to vector<79x32xf32>
    %180 = vector.extract_strided_slice %178 {offsets = [1, 0], sizes = [79, 32], strides = [1, 1]} : vector<80x32xf32> to vector<79x32xf32>
    %181 = arith.maximumf %179, %180 : vector<79x32xf32>
    %182 = vector.extract_strided_slice %181 {offsets = [0, 0], sizes = [69, 32], strides = [1, 1]} : vector<79x32xf32> to vector<69x32xf32>
    %183 = vector.extract_strided_slice %181 {offsets = [10, 0], sizes = [69, 32], strides = [1, 1]} : vector<79x32xf32> to vector<69x32xf32>
    %184 = arith.maximumf %182, %183 : vector<69x32xf32>
    %c0_204 = arith.constant 0 : index
    %c0_205 = arith.constant 0 : index
    %185 = vector.load %arg13[%c0_204, %c0_205] : memref<69x32xf32, #tpu.memory_space<vmem>>, vector<69x32xf32>
    tpu.vector_store %arg13[%c0_204, %c0_205], %184 {strides = array<i32>} : memref<69x32xf32, #tpu.memory_space<vmem>>, vector<69x32xf32>,
    %c0_206 = arith.constant 0 : index
    %c0_207 = arith.constant 0 : index
    %186 = tpu.strided_load %arg13[%c0_206, %c0_207] {strides = array<i32: 2, 1>} : memref<69x32xf32, #tpu.memory_space<vmem>>, vector<4x32xf32>
    %c7_208 = arith.constant 7 : index
    %c0_209 = arith.constant 0 : index
    %187 = vector.load %arg11[%c7_208, %c0_209] : memref<44x32xf32, #tpu.memory_space<vmem>>, vector<4x32xf32>
    tpu.vector_store %arg11[%c7_208, %c0_209], %186 {strides = array<i32>} : memref<44x32xf32, #tpu.memory_space<vmem>>, vector<4x32xf32>,
    %c20_210 = arith.constant 20 : index
    %c0_211 = arith.constant 0 : index
    %188 = tpu.strided_load %arg13[%c20_210, %c0_211] {strides = array<i32: 2, 1>} : memref<69x32xf32, #tpu.memory_space<vmem>>, vector<4x32xf32>
    %c13_212 = arith.constant 13 : index
    %c0_213 = arith.constant 0 : index
    %189 = vector.load %arg11[%c13_212, %c0_213] : memref<44x32xf32, #tpu.memory_space<vmem>>, vector<4x32xf32>
    tpu.vector_store %arg11[%c13_212, %c0_213], %188 {strides = array<i32>} : memref<44x32xf32, #tpu.memory_space<vmem>>, vector<4x32xf32>,
    %c40 = arith.constant 40 : index
    %c0_214 = arith.constant 0 : index
    %190 = tpu.strided_load %arg13[%c40, %c0_214] {strides = array<i32: 2, 1>} : memref<69x32xf32, #tpu.memory_space<vmem>>, vector<4x32xf32>
    %c19_215 = arith.constant 19 : index
    %c0_216 = arith.constant 0 : index
    %191 = vector.load %arg11[%c19_215, %c0_216] : memref<44x32xf32, #tpu.memory_space<vmem>>, vector<4x32xf32>
    tpu.vector_store %arg11[%c19_215, %c0_216], %190 {strides = array<i32>} : memref<44x32xf32, #tpu.memory_space<vmem>>, vector<4x32xf32>,
    %c60 = arith.constant 60 : index
    %c0_217 = arith.constant 0 : index
    %192 = tpu.strided_load %arg13[%c60, %c0_217] {strides = array<i32: 2, 1>} : memref<69x32xf32, #tpu.memory_space<vmem>>, vector<4x32xf32>
    %c25 = arith.constant 25 : index
    %c0_218 = arith.constant 0 : index
    %193 = vector.load %arg11[%c25, %c0_218] : memref<44x32xf32, #tpu.memory_space<vmem>>, vector<4x32xf32>
    tpu.vector_store %arg11[%c25, %c0_218], %192 {strides = array<i32>} : memref<44x32xf32, #tpu.memory_space<vmem>>, vector<4x32xf32>,
    %cst_219 = arith.constant 0.000000e+00 : f32
    %194 = vector.broadcast %cst_219 : f32 to vector<24x64xf32>
    %c0_220 = arith.constant 0 : index
    %c0_221 = arith.constant 0 : index
    %195 = vector.load %arg11[%c0_220, %c0_221] : memref<44x32xf32, #tpu.memory_space<vmem>>, vector<24x32xf32>
    %c0_222 = arith.constant 0 : index
    %c0_223 = arith.constant 0 : index
    %c0_224 = arith.constant 0 : index
    %196 = vector.load %arg6[%c0_222, %c0_223, %c0_224] : memref<9x32x64xf32, #tpu.memory_space<vmem>>, vector<1x32x64xf32>
    %197 = vector.shape_cast %196 : vector<1x32x64xf32> to vector<32x64xf32>
    %cst_225 = arith.constant dense<0.000000e+00> : vector<24x64xf32>
    %198 = tpu.matmul %195, %197, %cst_225 {dimension_numbers = #tpu.dot_dimension_numbers<[1], [0], [0], [1], [0, 0, 1, 1], [], []>} : vector<24x32xf32>, vector<32x64xf32>, vector<24x64xf32> -> vector<24x64xf32>
    %199 = arith.addf %194, %198 : vector<24x64xf32>
    %c1_226 = arith.constant 1 : index
    %c0_227 = arith.constant 0 : index
    %200 = vector.load %arg11[%c1_226, %c0_227] : memref<44x32xf32, #tpu.memory_space<vmem>>, vector<24x32xf32>
    %c1_228 = arith.constant 1 : index
    %c0_229 = arith.constant 0 : index
    %c0_230 = arith.constant 0 : index
    %201 = vector.load %arg6[%c1_228, %c0_229, %c0_230] : memref<9x32x64xf32, #tpu.memory_space<vmem>>, vector<1x32x64xf32>
    %202 = vector.shape_cast %201 : vector<1x32x64xf32> to vector<32x64xf32>
    %cst_231 = arith.constant dense<0.000000e+00> : vector<24x64xf32>
    %203 = tpu.matmul %200, %202, %cst_231 {dimension_numbers = #tpu.dot_dimension_numbers<[1], [0], [0], [1], [0, 0, 1, 1], [], []>} : vector<24x32xf32>, vector<32x64xf32>, vector<24x64xf32> -> vector<24x64xf32>
    %204 = arith.addf %199, %203 : vector<24x64xf32>
    %c2_232 = arith.constant 2 : index
    %c0_233 = arith.constant 0 : index
    %205 = vector.load %arg11[%c2_232, %c0_233] : memref<44x32xf32, #tpu.memory_space<vmem>>, vector<24x32xf32>
    %c2_234 = arith.constant 2 : index
    %c0_235 = arith.constant 0 : index
    %c0_236 = arith.constant 0 : index
    %206 = vector.load %arg6[%c2_234, %c0_235, %c0_236] : memref<9x32x64xf32, #tpu.memory_space<vmem>>, vector<1x32x64xf32>
    %207 = vector.shape_cast %206 : vector<1x32x64xf32> to vector<32x64xf32>
    %cst_237 = arith.constant dense<0.000000e+00> : vector<24x64xf32>
    %208 = tpu.matmul %205, %207, %cst_237 {dimension_numbers = #tpu.dot_dimension_numbers<[1], [0], [0], [1], [0, 0, 1, 1], [], []>} : vector<24x32xf32>, vector<32x64xf32>, vector<24x64xf32> -> vector<24x64xf32>
    %209 = arith.addf %204, %208 : vector<24x64xf32>
    %c6_238 = arith.constant 6 : index
    %c0_239 = arith.constant 0 : index
    %210 = vector.load %arg11[%c6_238, %c0_239] : memref<44x32xf32, #tpu.memory_space<vmem>>, vector<24x32xf32>
    %c3_240 = arith.constant 3 : index
    %c0_241 = arith.constant 0 : index
    %c0_242 = arith.constant 0 : index
    %211 = vector.load %arg6[%c3_240, %c0_241, %c0_242] : memref<9x32x64xf32, #tpu.memory_space<vmem>>, vector<1x32x64xf32>
    %212 = vector.shape_cast %211 : vector<1x32x64xf32> to vector<32x64xf32>
    %cst_243 = arith.constant dense<0.000000e+00> : vector<24x64xf32>
    %213 = tpu.matmul %210, %212, %cst_243 {dimension_numbers = #tpu.dot_dimension_numbers<[1], [0], [0], [1], [0, 0, 1, 1], [], []>} : vector<24x32xf32>, vector<32x64xf32>, vector<24x64xf32> -> vector<24x64xf32>
    %214 = arith.addf %209, %213 : vector<24x64xf32>
    %c7_244 = arith.constant 7 : index
    %c0_245 = arith.constant 0 : index
    %215 = vector.load %arg11[%c7_244, %c0_245] : memref<44x32xf32, #tpu.memory_space<vmem>>, vector<24x32xf32>
    %c4_246 = arith.constant 4 : index
    %c0_247 = arith.constant 0 : index
    %c0_248 = arith.constant 0 : index
    %216 = vector.load %arg6[%c4_246, %c0_247, %c0_248] : memref<9x32x64xf32, #tpu.memory_space<vmem>>, vector<1x32x64xf32>
    %217 = vector.shape_cast %216 : vector<1x32x64xf32> to vector<32x64xf32>
    %cst_249 = arith.constant dense<0.000000e+00> : vector<24x64xf32>
    %218 = tpu.matmul %215, %217, %cst_249 {dimension_numbers = #tpu.dot_dimension_numbers<[1], [0], [0], [1], [0, 0, 1, 1], [], []>} : vector<24x32xf32>, vector<32x64xf32>, vector<24x64xf32> -> vector<24x64xf32>
    %219 = arith.addf %214, %218 : vector<24x64xf32>
    %c8_250 = arith.constant 8 : index
    %c0_251 = arith.constant 0 : index
    %220 = vector.load %arg11[%c8_250, %c0_251] : memref<44x32xf32, #tpu.memory_space<vmem>>, vector<24x32xf32>
    %c5_252 = arith.constant 5 : index
    %c0_253 = arith.constant 0 : index
    %c0_254 = arith.constant 0 : index
    %221 = vector.load %arg6[%c5_252, %c0_253, %c0_254] : memref<9x32x64xf32, #tpu.memory_space<vmem>>, vector<1x32x64xf32>
    %222 = vector.shape_cast %221 : vector<1x32x64xf32> to vector<32x64xf32>
    %cst_255 = arith.constant dense<0.000000e+00> : vector<24x64xf32>
    %223 = tpu.matmul %220, %222, %cst_255 {dimension_numbers = #tpu.dot_dimension_numbers<[1], [0], [0], [1], [0, 0, 1, 1], [], []>} : vector<24x32xf32>, vector<32x64xf32>, vector<24x64xf32> -> vector<24x64xf32>
    %224 = arith.addf %219, %223 : vector<24x64xf32>
    %c12_256 = arith.constant 12 : index
    %c0_257 = arith.constant 0 : index
    %225 = vector.load %arg11[%c12_256, %c0_257] : memref<44x32xf32, #tpu.memory_space<vmem>>, vector<24x32xf32>
    %c6_258 = arith.constant 6 : index
    %c0_259 = arith.constant 0 : index
    %c0_260 = arith.constant 0 : index
    %226 = vector.load %arg6[%c6_258, %c0_259, %c0_260] : memref<9x32x64xf32, #tpu.memory_space<vmem>>, vector<1x32x64xf32>
    %227 = vector.shape_cast %226 : vector<1x32x64xf32> to vector<32x64xf32>
    %cst_261 = arith.constant dense<0.000000e+00> : vector<24x64xf32>
    %228 = tpu.matmul %225, %227, %cst_261 {dimension_numbers = #tpu.dot_dimension_numbers<[1], [0], [0], [1], [0, 0, 1, 1], [], []>} : vector<24x32xf32>, vector<32x64xf32>, vector<24x64xf32> -> vector<24x64xf32>
    %229 = arith.addf %224, %228 : vector<24x64xf32>
    %c13_262 = arith.constant 13 : index
    %c0_263 = arith.constant 0 : index
    %230 = vector.load %arg11[%c13_262, %c0_263] : memref<44x32xf32, #tpu.memory_space<vmem>>, vector<24x32xf32>
    %c7_264 = arith.constant 7 : index
    %c0_265 = arith.constant 0 : index
    %c0_266 = arith.constant 0 : index
    %231 = vector.load %arg6[%c7_264, %c0_265, %c0_266] : memref<9x32x64xf32, #tpu.memory_space<vmem>>, vector<1x32x64xf32>
    %232 = vector.shape_cast %231 : vector<1x32x64xf32> to vector<32x64xf32>
    %cst_267 = arith.constant dense<0.000000e+00> : vector<24x64xf32>
    %233 = tpu.matmul %230, %232, %cst_267 {dimension_numbers = #tpu.dot_dimension_numbers<[1], [0], [0], [1], [0, 0, 1, 1], [], []>} : vector<24x32xf32>, vector<32x64xf32>, vector<24x64xf32> -> vector<24x64xf32>
    %234 = arith.addf %229, %233 : vector<24x64xf32>
    %c14_268 = arith.constant 14 : index
    %c0_269 = arith.constant 0 : index
    %235 = vector.load %arg11[%c14_268, %c0_269] : memref<44x32xf32, #tpu.memory_space<vmem>>, vector<24x32xf32>
    %c8_270 = arith.constant 8 : index
    %c0_271 = arith.constant 0 : index
    %c0_272 = arith.constant 0 : index
    %236 = vector.load %arg6[%c8_270, %c0_271, %c0_272] : memref<9x32x64xf32, #tpu.memory_space<vmem>>, vector<1x32x64xf32>
    %237 = vector.shape_cast %236 : vector<1x32x64xf32> to vector<32x64xf32>
    %cst_273 = arith.constant dense<0.000000e+00> : vector<24x64xf32>
    %238 = tpu.matmul %235, %237, %cst_273 {dimension_numbers = #tpu.dot_dimension_numbers<[1], [0], [0], [1], [0, 0, 1, 1], [], []>} : vector<24x32xf32>, vector<32x64xf32>, vector<24x64xf32> -> vector<24x64xf32>
    %239 = arith.addf %234, %238 : vector<24x64xf32>
    %c0_274 = arith.constant 0 : index
    %c0_275 = arith.constant 0 : index
    %240 = vector.load %arg7[%c0_274, %c0_275] : memref<1x64xf32, #tpu.memory_space<vmem>>, vector<1x64xf32>
    %241 = vector.broadcast %240 : vector<1x64xf32> to vector<24x64xf32>
    %242 = arith.addf %239, %241 : vector<24x64xf32>
    %cst_276 = arith.constant 0.000000e+00 : f32
    %243 = vector.broadcast %cst_276 : f32 to vector<24x64xf32>
    %244 = arith.maximumf %242, %243 : vector<24x64xf32>
    %245 = vector.extract_strided_slice %244 {offsets = [0, 0], sizes = [23, 64], strides = [1, 1]} : vector<24x64xf32> to vector<23x64xf32>
    %246 = vector.extract_strided_slice %244 {offsets = [1, 0], sizes = [23, 64], strides = [1, 1]} : vector<24x64xf32> to vector<23x64xf32>
    %247 = arith.maximumf %245, %246 : vector<23x64xf32>
    %248 = vector.extract_strided_slice %247 {offsets = [0, 0], sizes = [17, 64], strides = [1, 1]} : vector<23x64xf32> to vector<17x64xf32>
    %249 = vector.extract_strided_slice %247 {offsets = [6, 0], sizes = [17, 64], strides = [1, 1]} : vector<23x64xf32> to vector<17x64xf32>
    %250 = arith.maximumf %248, %249 : vector<17x64xf32>
    %c0_277 = arith.constant 0 : index
    %c0_278 = arith.constant 0 : index
    %251 = vector.load %arg14[%c0_277, %c0_278] : memref<17x64xf32, #tpu.memory_space<vmem>>, vector<17x64xf32>
    tpu.vector_store %arg14[%c0_277, %c0_278], %250 {strides = array<i32>} : memref<17x64xf32, #tpu.memory_space<vmem>>, vector<17x64xf32>,
    %c0_279 = arith.constant 0 : index
    %c0_280 = arith.constant 0 : index
    %252 = tpu.strided_load %arg14[%c0_279, %c0_280] {strides = array<i32: 2, 1>} : memref<17x64xf32, #tpu.memory_space<vmem>>, vector<2x64xf32>
    %c0_281 = arith.constant 0 : index
    %c0_282 = arith.constant 0 : index
    %c0_283 = arith.constant 0 : index
    %253 = vector.load %arg8[%c0_281, %c0_282, %c0_283] : memref<1x4x64xf32, #tpu.memory_space<vmem>>, vector<1x2x64xf32>
    %254 = vector.shape_cast %253 : vector<1x2x64xf32> to vector<2x64xf32>
    %255 = vector.shape_cast %252 : vector<2x64xf32> to vector<1x2x64xf32>
    tpu.vector_store %arg8[%c0_281, %c0_282, %c0_283], %255 {strides = array<i32>} : memref<1x4x64xf32, #tpu.memory_space<vmem>>, vector<1x2x64xf32>,
    %c12_284 = arith.constant 12 : index
    %c0_285 = arith.constant 0 : index
    %256 = tpu.strided_load %arg14[%c12_284, %c0_285] {strides = array<i32: 2, 1>} : memref<17x64xf32, #tpu.memory_space<vmem>>, vector<2x64xf32>
    %c0_286 = arith.constant 0 : index
    %c2_287 = arith.constant 2 : index
    %c0_288 = arith.constant 0 : index
    %257 = vector.load %arg8[%c0_286, %c2_287, %c0_288] : memref<1x4x64xf32, #tpu.memory_space<vmem>>, vector<1x2x64xf32>
    %258 = vector.shape_cast %257 : vector<1x2x64xf32> to vector<2x64xf32>
    %259 = vector.shape_cast %256 : vector<2x64xf32> to vector<1x2x64xf32>
    tpu.vector_store %arg8[%c0_286, %c2_287, %c0_288], %259 {strides = array<i32>} : memref<1x4x64xf32, #tpu.memory_space<vmem>>, vector<1x2x64xf32>,
    return
  }
  func.func @transform_0(%arg0: i32) -> (i32, i32, i32, i32) {
    %c0_i32 = arith.constant 0 : i32
    %c0_i32_0 = arith.constant 0 : i32
    %c0_i32_1 = arith.constant 0 : i32
    %c0_i32_2 = arith.constant 0 : i32
    return %arg0, %c0_i32, %c0_i32_0, %c0_i32_1 : i32, i32, i32, i32
  }
  func.func @transform_1(%arg0: i32) -> (i32, i32, i32) {
    %c0_i32 = arith.constant 0 : i32
    %c0_i32_0 = arith.constant 0 : i32
    %c0_i32_1 = arith.constant 0 : i32
    %c0_i32_2 = arith.constant 0 : i32
    return %c0_i32, %c0_i32_0, %c0_i32_1 : i32, i32, i32
  }
  func.func @transform_2(%arg0: i32) -> (i32, i32) {
    %c0_i32 = arith.constant 0 : i32
    %c0_i32_0 = arith.constant 0 : i32
    %c0_i32_1 = arith.constant 0 : i32
    return %c0_i32, %c0_i32_0 : i32, i32
  }
  func.func @transform_3(%arg0: i32) -> (i32, i32, i32) {
    %c0_i32 = arith.constant 0 : i32
    %c0_i32_0 = arith.constant 0 : i32
    %c0_i32_1 = arith.constant 0 : i32
    %c0_i32_2 = arith.constant 0 : i32
    return %c0_i32, %c0_i32_0, %c0_i32_1 : i32, i32, i32
  }
  func.func @transform_4(%arg0: i32) -> (i32, i32) {
    %c0_i32 = arith.constant 0 : i32
    %c0_i32_0 = arith.constant 0 : i32
    %c0_i32_1 = arith.constant 0 : i32
    return %c0_i32, %c0_i32_0 : i32, i32
  }
  func.func @transform_5(%arg0: i32) -> (i32, i32, i32) {
    %c0_i32 = arith.constant 0 : i32
    %c0_i32_0 = arith.constant 0 : i32
    %c0_i32_1 = arith.constant 0 : i32
    %c0_i32_2 = arith.constant 0 : i32
    return %c0_i32, %c0_i32_0, %c0_i32_1 : i32, i32, i32
  }
  func.func @transform_6(%arg0: i32) -> (i32, i32) {
    %c0_i32 = arith.constant 0 : i32
    %c0_i32_0 = arith.constant 0 : i32
    %c0_i32_1 = arith.constant 0 : i32
    return %c0_i32, %c0_i32_0 : i32, i32
  }
  func.func @transform_7(%arg0: i32) -> (i32, i32, i32) {
    %c0_i32 = arith.constant 0 : i32
    %c0_i32_0 = arith.constant 0 : i32
    %c0_i32_1 = arith.constant 0 : i32
    return %arg0, %c0_i32, %c0_i32_0 : i32, i32, i32
  }
}

</mosaic_0001>

<bundles_post_ra>
// kernel: conv_encoder.1
= control target key start
LH: loop header
LB: loop body
LE: loop exit
PB: predicated region body
PF: predicated region fallthrough
CT: control target
= control target key end

     0   :  { %12 = vsyncpa [#allocation9], 0  ;;  %s11356_s0 = inlined_call_operand.vmem [shape: f32[2,16,16,3], index: 0, kind: input, shape index: {}]   ;;  %s11357_s1 = inlined_call_operand.vmem [shape: f32[9,3,16], index: 1, kind: input, shape index: {}]   ;;  %s11358_s2 = inlined_call_operand.vmem [shape: f32[1,16], index: 2, kind: input, shape index: {}]   ;;  %s11359_s3 = inlined_call_operand.vmem [shape: f32[9,16,32], index: 3, kind: input, shape index: {}]   ;;  %s11360_s4 = inlined_call_operand.vmem [shape: f32[1,32], index: 4, kind: input, shape index: {}]   ;;  %s11361_s5 = inlined_call_operand.vmem [shape: f32[9,32,64], index: 5, kind: input, shape index: {}]   ;;  %s11362_s6 = inlined_call_operand.vmem [shape: f32[1,64], index: 6, kind: input, shape index: {}]   ;;  %s11363_s7 = inlined_call_operand.hbm [shape: f32[2,4,64], index: 7, kind: output, shape index: {}]  }
   0x1   :  { %14 = vsyncpa [#allocation9 + $0x1], 0  ;;  %s9853_s24 = smov 0   ;;  %s9855_s25 = smov 0  }
   0x2   :  { %s9857_s26 = smov 0   ;;  %s9859_s27 = smov 0  }
   0x3 LB: > { %s9874_s28 = sadd.s32 4294967295, %s9807_s27   ;;  %s7360_s29 = sadd.s32 4294967294, %s9807_s27   ;;  %s9807_s27 = sphi %s9859_s27, %s11369_s27   ;;  %s9803_s26 = sphi %s9857_s26, %s11368_s26   ;;  %s9799_s25 = sphi %s9855_s25, %s11367_s25   ;;  %s9795_s24 = sphi %s9853_s24, %s11366_s24  }
   0x4   : > { %s9878_s30 = sadd.s32 1, %s9807_s27   ;;  %s179_s8 = sadd.s32 1, %s9803_s26 }
   0x5   : > { %s176_s9 = ssub.s32 %s9807_s27, %s9878_s30  ;;  %p189_p0 = scmp.ne.s32.totalorder %s9803_s26, %s9799_s25 }
   0x6   : > { %p177_p1 = scmp.eq.s32.totalorder %s176_s9, 0  ;;  %p190_p2 = scmp.eq.s32.totalorder %s9874_s28, 1 }
   0x7   : > { %p195_p3 = scmp.ne.s32.totalorder %s9799_s25, %s9795_s24  ;;  %p196_p4 = scmp.eq.s32.totalorder %s7360_s29, 1 }
   0x8   : > { %s9889_s10 = scalar_select %p177_p1, %s9803_s26, %s179_s8  }
   0x9   : > { %p9891_p5 = por %p190_p2, %p189_p0  ;;  %p9895_p6 = por %p196_p4, %p195_p3 }
   0xa   : > { %p7363_p7 = scmp.ge.s32.totalorder %s9807_s27, 1  ;;  %p240_p8 = scmp.lt.s32.totalorder %s9807_s27, 3 }
   0xc   : > { %p241_p9 = pnand %p7363_p7, %p240_p8 }
   0xd   : > { %vm607_vm0 = vcmask (!%p241_p9), 1042432   ;;  %v9904_v0 = vld [vmem:[%s11357_s1 + $0x8] sm:$0x7] (!%p241_p9)  ;;  %vm277_vm1 = vcmask (!%p241_p9), 23552   ;;  %p272_p10 = scmp.lt.s32.totalorder (!%p241_p9), %s9874_s28, 1  ;;  %v9809_v1 = vmov (!%p241_p9), 0.0  }
   0xe   : > { %244 = sbr.rel (%p241_p9) target bundleno = 1496 (0x5d8), region = 48  ;;  %8527 = vmatprep.subr.msk.mxu0 (!%p241_p9), %vm607_vm0, %v9904_v0  ;;  %278 = vst.msk [vmem:[#allocation2] sm:$0xff] (!%p241_p9), %vm277_vm1, %v9809_v1  ;;  %279 = vst.msk [vmem:[#allocation2 + $0x8] sm:$0xff] (!%p241_p9), %vm277_vm1, %v9809_v1  ;;  %v7510_v2 = vld [vmem:[%s11357_s1 + $0xc] sm:$0x7] (!%p241_p9)  ;;  %vm321_vm2 = vcmask (!%p241_p9), 130048  }
   0xf   : > { %280 = vst.msk [vmem:[#allocation2 + $0x10] sm:$0xff] (!%p241_p9), %vm277_vm1, %v9809_v1  ;;  %281 = vst.msk [vmem:[#allocation2 + $0x18] sm:$0xff] (!%p241_p9), %vm277_vm1, %v9809_v1  ;;  %8528 = vmatpush3.msk.msra.mxu0 (!%p241_p9), %vm607_vm0, %v9904_v0  ;;  %v10017_v9 = vld [vmem:[%s11357_s1 + $0x10] sm:$0x7] (!%p241_p9)  ;;  %v10099_v54 = vld [vmem:[%s11357_s1 + $0x14] sm:$0x7] (!%p241_p9) }
  0x10   : > { %282 = vst.msk [vmem:[#allocation2 + $0x20] sm:$0xff] (!%p241_p9), %vm277_vm1, %v9809_v1  ;;  %283 = vst.msk [vmem:[#allocation2 + $0x28] sm:$0xff] (!%p241_p9), %vm277_vm1, %v9809_v1  ;;  %8583 = vmatprep.subr.msk.mxu0 (!%p241_p9), %vm607_vm0, %v7510_v2  ;;  %v7397_v55 = vld [vmem:[%s11357_s1 + $0x4] sm:$0x7] (!%p241_p9)  ;;  %vm4337_vm3 = vcmask (!%p241_p9), 1046528   ;;  %vm4515_vm4 = vcmask (!%p241_p9), 1045504  }
  0x11   : > { %284 = vst.msk [vmem:[#allocation2 + $0x30] sm:$0xff] (!%p241_p9), %vm277_vm1, %v9809_v1  ;;  %285 = vst.msk [vmem:[#allocation2 + $0x38] sm:$0xff] (!%p241_p9), %vm277_vm1, %v9809_v1  ;;  %8415 = vmatprep.subr.msk.mxu1 (!%p241_p9), %vm607_vm0, %v7397_v55  ;;  %vm4684_vm5 = vcmask (!%p241_p9), 126976   ;;  %vm337_vm6 = vcmask (!%p241_p9), 261120   ;;  %vm9811_vm7 = vmmov (!%p241_p9), 0   ;;  %vm343_vm8 = vcmask (!%p241_p9), 257024  }
  0x12   : > { %286 = vst.msk [vmem:[#allocation2 + $0x40] sm:$0xff] (!%p241_p9), %vm277_vm1, %v9809_v1  ;;  %287 = vst.msk [vmem:[#allocation2 + $0x48] sm:$0xff] (!%p241_p9), %vm277_vm1, %v9809_v1  ;;  %8416 = vmatpush3.msk.msra.mxu1 (!%p241_p9), %vm607_vm0, %v7397_v55  ;;  %vm6328_vm9 = vcmask (!%p241_p9), 258048   ;;  %vm7264_vm10 = vcmask (!%p241_p9), 1041408   ;;  %s269_s29 = sand.u32 (!%p241_p9), 1, %s9799_s25   ;;  %vm7276_vm11 = vcmask (!%p241_p9), 523264  }
  0x13   : > { %288 = vst.msk [vmem:[#allocation2 + $0x50] sm:$0xff] (!%p241_p9), %vm277_vm1, %v9809_v1  ;;  %289 = vst.msk [vmem:[#allocation2 + $0x58] sm:$0xff] (!%p241_p9), %vm277_vm1, %v9809_v1  ;;  %s7364_s8 = sshll.u32 (!%p241_p9), %s269_s29, 2  ;;  %s7907_s9 = sshll.u32 (!%p241_p9), %s9874_s28, 6  ;;  %vm7282_vm12 = vcmask (!%p241_p9), 517120  }
  0x14   : > { %290 = vst.msk [vmem:[#allocation2 + $0x60] sm:$0xff] (!%p241_p9), %vm277_vm1, %v9809_v1  ;;  %291 = vst.msk [vmem:[#allocation2 + $0x68] sm:$0xff] (!%p241_p9), %vm277_vm1, %v9809_v1  ;;  %s271_s13 = scalar_lea.vmem (!%p241_p9), [#allocation8], %s7364_s8 }
  0x15   : > { %292 = vst.msk [vmem:[#allocation2 + $0x70] sm:$0xff] %vm277_vm1, %v9809_v1  ;;  %293 = vst.msk [vmem:[#allocation2 + $0x78] sm:$0xff] %vm277_vm1, %v9809_v1  ;;  %s273_s17 = scalar_select %p272_p10, %s9874_s28, 1  ;;  %v1212_v10 = vld [vmem:[#allocation2 + $0x2] sm:$0xff] }
  0x16   : > { %294 = vst.msk [vmem:[#allocation2 + $0x80] sm:$0xff] %vm277_vm1, %v9809_v1  ;;  %295 = vst.msk [vmem:[#allocation2 + $0x88] sm:$0xff] %vm277_vm1, %v9809_v1  ;;  %v1213_v11 = vld [vmem:[#allocation2 + $0xa] sm:$0xff]  ;;  %8529 = vmatprep.mubr.msk.f32.mxu0 %vm277_vm1, %v1212_v10  ;;  %v461_v56 = vld [vmem:[#allocation2 + $0x1] sm:$0xff]  ;;  %s7301_s14 = sshll.u32 %s271_s13, 4  ;;  %s9812_s28 = smov [#allocation8]   ;;  %s11316_s14 = int_to_ptr.vmem [resolvable:$true] %s7301_s14 }
  0x17   : > { %296 = vst.msk [vmem:[#allocation2 + $0x90] sm:$0xff] %vm277_vm1, %v9809_v1  ;;  %297 = vst.msk [vmem:[#allocation2 + $0x98] sm:$0xff] %vm277_vm1, %v9809_v1  ;;  %s7910_s18 = sshll.u32 %s273_s17, 8  ;;  %8530 = vmatmul.mubr.msk.f32.vlgmr.msra.gmra.mrb[0].mxu0 %vm277_vm1, %v1213_v11  ;;  %v462_v57 = vld [vmem:[#allocation2 + $0x9] sm:$0xff]  ;;  %8417 = vmatprep.mubr.msk.f32.mxu1 %vm277_vm1, %v461_v56  ;;  %s11314_s17 = scalar_lea.hbm %s11363_s7, %s7907_s9 }
  0x18   : > { %298 = vst.msk [vmem:[#allocation2 + $0xa0] sm:$0xff] %vm277_vm1, %v9809_v1  ;;  %299 = vst.msk [vmem:[#allocation2 + $0xa8] sm:$0xff] %vm277_vm1, %v9809_v1  ;;  %s10003_s21 = scalar_lea.vmem %s11356_s0, %s7910_s18  ;;  %8584 = vmatpush3.msk.msra.mxu0 %vm607_vm0, %v7510_v2  ;;  %8418 = vmatmul.mubr.msk.f32.vlgmr.msra.gmra.mrb[0].mxu1 %vm277_vm1, %v462_v57  ;;  %s7288_s18 = scalar_lea.sflag [#allocation9], %s269_s29 }
  0x19   : > { %300 = vst.msk [vmem:[#allocation2 + $0xb0] sm:$0xff] %vm277_vm1, %v9809_v1  ;;  %301 = vst.msk [vmem:[#allocation2 + $0xb8] sm:$0xff] %vm277_vm1, %v9809_v1  ;;  %v345_v3 = vld [vmem:[%s10003_s21] sm:$0xff]  ;;  %v346_v4 = vld [vmem:[%s10003_s21 + $0x8] sm:$0xff]  ;;  %8639 = vmatprep.subr.msk.mxu0 %vm607_vm0, %v10017_v9  ;;  %s9745_s19 = scalar_lea.vmem %s11316_s14, 64  ;;  %s9749_s20 = sshll.u32 %s9812_s28, 4  ;;  %s9750_s20 = int_to_ptr.vmem [resolvable:$false] %s9749_s20 }
  0x1a   : > { %302 = vst.msk [vmem:[#allocation2 + $0xc0] sm:$0xff] %vm277_vm1, %v9809_v1  ;;  %303 = vst.msk [vmem:[#allocation2 + $0xc8] sm:$0xff] %vm277_vm1, %v9809_v1  ;;  %v7367_v5 = vld [vmem:[%s10003_s21 + $0x10] sm:$0xff]  ;;  %v7368_v6 = vld [vmem:[%s10003_s21 + $0x18] sm:$0xff]  ;;  %p9746_p11 = scmp.ne.s32.totalorder %s11316_s14, %s9745_s19  ;;  %p9752_p0 = scmp.lt.s32.totalorder %s11316_s14, %s9750_s20 }
  0x1b   : > { %304 = vst.msk [vmem:[#allocation2 + $0xd0] sm:$0xff] %vm277_vm1, %v9809_v1  ;;  %305 = vst.msk [vmem:[#allocation2 + $0xd8] sm:$0xff] %vm277_vm1, %v9809_v1  ;;  %v7369_v7 = vld [vmem:[%s10003_s21 + $0x20] sm:$0xff]  ;;  %v7370_v8 = vld [vmem:[%s10003_s21 + $0x28] sm:$0xff] }
  0x1c   : > { %306 = vst.msk [vmem:[#allocation2 + $0xe0] sm:$0xff] %vm277_vm1, %v9809_v1  ;;  %307 = vst.msk [vmem:[#allocation2 + $0xe8] sm:$0xff] %vm277_vm1, %v9809_v1  ;;  %v7371_v12 = vld [vmem:[%s10003_s21 + $0x30] sm:$0xff]  ;;  %v7372_v13 = vld [vmem:[%s10003_s21 + $0x38] sm:$0xff]  ;;  %p9747_p12 = pnand %p9746_p11, %p9891_p5 }
  0x1d   : > { %308 = vst.msk [vmem:[#allocation2 + $0xf0] sm:$0xff] %vm277_vm1, %v9809_v1  ;;  %309 = vst.msk [vmem:[#allocation2 + $0xf8] sm:$0xff] %vm277_vm1, %v9809_v1  ;;  %v7373_v14 = vld [vmem:[%s10003_s21 + $0x40] sm:$0xff]  ;;  %v7374_v15 = vld [vmem:[%s10003_s21 + $0x48] sm:$0xff] }
  0x1e   : > { %310 = vst.msk [vmem:[#allocation2 + $0x100] sm:$0xff] %vm277_vm1, %v9809_v1  ;;  %311 = vst.msk [vmem:[#allocation2 + $0x108] sm:$0xff] %vm277_vm1, %v9809_v1  ;;  %v7375_v16 = vld [vmem:[%s10003_s21 + $0x50] sm:$0xff]  ;;  %v7376_v17 = vld [vmem:[%s10003_s21 + $0x58] sm:$0xff]  ;;  %p9748_p13 = pneg %p9747_p12 }
  0x1f   : > { %312 = vst.msk [vmem:[#allocation2 + $0x110] sm:$0xff] %vm277_vm1, %v9809_v1  ;;  %313 = vst.msk [vmem:[#allocation2 + $0x118] sm:$0xff] %vm277_vm1, %v9809_v1  ;;  %v7377_v18 = vld [vmem:[%s10003_s21 + $0x60] sm:$0xff]  ;;  %v7378_v19 = vld [vmem:[%s10003_s21 + $0x68] sm:$0xff] }
  0x20   : > { %314 = vst.msk [vmem:[#allocation2 + $0x120] sm:$0xff] %vm277_vm1, %v9809_v1  ;;  %315 = vst.msk [vmem:[#allocation2 + $0x128] sm:$0xff] %vm277_vm1, %v9809_v1  ;;  %v7379_v20 = vld [vmem:[%s10003_s21 + $0x70] sm:$0xff]  ;;  %v7380_v21 = vld [vmem:[%s10003_s21 + $0x78] sm:$0xff] }
  0x21   : > { %316 = vst.msk [vmem:[#allocation2 + $0x130] sm:$0xff] %vm277_vm1, %v9809_v1  ;;  %317 = vst.msk [vmem:[#allocation2 + $0x138] sm:$0xff] %vm277_vm1, %v9809_v1  ;;  %v7381_v22 = vld [vmem:[%s10003_s21 + $0x80] sm:$0xff]  ;;  %v7382_v23 = vld [vmem:[%s10003_s21 + $0x88] sm:$0xff] }
  0x22   : > { %318 = vst.msk [vmem:[#allocation2 + $0x140] sm:$0xff] %vm277_vm1, %v9809_v1  ;;  %347 = vst.msk [vmem:[#allocation2 + $0x13] sm:$0xff] %vm277_vm1, %v345_v3  ;;  %v7383_v24 = vld [vmem:[%s10003_s21 + $0x90] sm:$0xff]  ;;  %v7384_v25 = vld [vmem:[%s10003_s21 + $0x98] sm:$0xff] }
  0x23   : > { %348 = vst.msk [vmem:[#allocation2 + $0x1b] sm:$0xff] %vm277_vm1, %v346_v4  ;;  %352 = vst.msk [vmem:[#allocation2 + $0x25] sm:$0xff] %vm277_vm1, %v7367_v5  ;;  %v7385_v26 = vld [vmem:[%s10003_s21 + $0xa0] sm:$0xff]  ;;  %v7386_v27 = vld [vmem:[%s10003_s21 + $0xa8] sm:$0xff] }
  0x24   : > { %353 = vst.msk [vmem:[#allocation2 + $0x2d] sm:$0xff] %vm277_vm1, %v7368_v6  ;;  %357 = vst.msk [vmem:[#allocation2 + $0x37] sm:$0xff] %vm277_vm1, %v7369_v7  ;;  %v7387_v31 = vld [vmem:[%s10003_s21 + $0xb0] sm:$0xff]  ;;  %v7388_v32 = vld [vmem:[%s10003_s21 + $0xb8] sm:$0xff] }
  0x25   : > { %358 = vst.msk [vmem:[#allocation2 + $0x3f] sm:$0xff] %vm277_vm1, %v7370_v8  ;;  %362 = vst.msk [vmem:[#allocation2 + $0x49] sm:$0xff] %vm277_vm1, %v7371_v12  ;;  %v7389_v37 = vld [vmem:[%s10003_s21 + $0xc0] sm:$0xff]  ;;  %v7390_v38 = vld [vmem:[%s10003_s21 + $0xc8] sm:$0xff] }
  0x26   : > { %363 = vst.msk [vmem:[#allocation2 + $0x51] sm:$0xff] %vm277_vm1, %v7372_v13  ;;  %367 = vst.msk [vmem:[#allocation2 + $0x5b] sm:$0xff] %vm277_vm1, %v7373_v14  ;;  %v7391_v39 = vld [vmem:[%s10003_s21 + $0xd0] sm:$0xff]  ;;  %v7392_v40 = vld [vmem:[%s10003_s21 + $0xd8] sm:$0xff] }
  0x27   : > { %368 = vst.msk [vmem:[#allocation2 + $0x63] sm:$0xff] %vm277_vm1, %v7374_v15  ;;  %372 = vst.msk [vmem:[#allocation2 + $0x6d] sm:$0xff] %vm277_vm1, %v7375_v16  ;;  %v7393_v42 = vld [vmem:[%s10003_s21 + $0xe0] sm:$0xff]  ;;  %v7394_v43 = vld [vmem:[%s10003_s21 + $0xe8] sm:$0xff] }
  0x28   : > { %373 = vst.msk [vmem:[#allocation2 + $0x75] sm:$0xff] %vm277_vm1, %v7376_v17  ;;  %377 = vst.msk [vmem:[#allocation2 + $0x7f] sm:$0xff] %vm277_vm1, %v7377_v18  ;;  %v7395_v44 = vld [vmem:[%s10003_s21 + $0xf0] sm:$0xff]  ;;  %v7396_v46 = vld [vmem:[%s10003_s21 + $0xf8] sm:$0xff]  ;;  %s9751_s21 = scalar_lea.vmem %s9750_s20, 128 }
  0x29   : > { %378 = vst.msk [vmem:[#allocation2 + $0x87] sm:$0xff] %vm277_vm1, %v7378_v19  ;;  %382 = vst.msk [vmem:[#allocation2 + $0x91] sm:$0xff] %vm277_vm1, %v7379_v20  ;;  %v1214_v28 = vld [vmem:[#allocation2 + $0x12] sm:$0xff]  ;;  %p9753_p1 = scmp.lt.s32.totalorder %s9751_s21, %s9745_s19 }
  0x2a   : > { %383 = vst.msk [vmem:[#allocation2 + $0x99] sm:$0xff] %vm277_vm1, %v7380_v21  ;;  %387 = vst.msk [vmem:[#allocation2 + $0xa3] sm:$0xff] %vm277_vm1, %v7381_v22  ;;  %v1215_v29 = vld [vmem:[#allocation2 + $0x1a] sm:$0xff]  ;;  %v1216_v30 = vld [vmem:[#allocation2 + $0x22] sm:$0xff]  ;;  %8532 = vmatprep.mubr.msk.f32.mxu0 %vm277_vm1, %v1214_v28 }
  0x2b   : > { %388 = vst.msk [vmem:[#allocation2 + $0xab] sm:$0xff] %vm277_vm1, %v7382_v23  ;;  %392 = vst.msk [vmem:[#allocation2 + $0xb5] sm:$0xff] %vm277_vm1, %v7383_v24  ;;  %8533 = vmatmul.mubr.msk.f32.gmra.mrb[2].mxu0 %vm277_vm1, %v1215_v29  ;;  %v1217_v33 = vld [vmem:[#allocation2 + $0x2a] sm:$0xff]  ;;  %v1218_v34 = vld [vmem:[#allocation2 + $0x32] sm:$0xff]  ;;  %p9754_p2 = por %p9753_p1, %p9752_p0 }
  0x2c   : > { %393 = vst.msk [vmem:[#allocation2 + $0xbd] sm:$0xff] %vm277_vm1, %v7384_v25  ;;  %397 = vst.msk [vmem:[#allocation2 + $0xc7] sm:$0xff] %vm277_vm1, %v7385_v26  ;;  %8535 = vmatprep.mubr.msk.f32.mxu0 %vm277_vm1, %v1216_v30  ;;  %v1219_v35 = vld [vmem:[#allocation2 + $0x3a] sm:$0xff]  ;;  %v1220_v36 = vld [vmem:[#allocation2 + $0x42] sm:$0xff] }
  0x2d   : > { %398 = vst.msk [vmem:[#allocation2 + $0xcf] sm:$0xff] %vm277_vm1, %v7386_v27  ;;  %402 = vst.msk [vmem:[#allocation2 + $0xd9] sm:$0xff] %vm277_vm1, %v7387_v31  ;;  %v1221_v41 = vld [vmem:[#allocation2 + $0x4a] sm:$0xff]  ;;  %v1222_v45 = vld [vmem:[#allocation2 + $0x52] sm:$0xff]  ;;  %p9755_p3 = pnand %p9754_p2, %p9748_p13 }
  0x2e   : > { %403 = vst.msk [vmem:[#allocation2 + $0xe1] sm:$0xff] %vm277_vm1, %v7388_v32  ;;  %407 = vst.msk [vmem:[#allocation2 + $0xeb] sm:$0xff] %vm277_vm1, %v7389_v37  ;;  %v1223_v47 = vld [vmem:[#allocation2 + $0x5a] sm:$0xff]  ;;  %v1224_v48 = vld [vmem:[#allocation2 + $0x62] sm:$0xff] }
  0x2f   : > { %8536 = vmatmul.mubr.msk.f32.gmra.mrb[4].mxu0 %vm277_vm1, %v1217_v33  ;;  %408 = vst.msk [vmem:[#allocation2 + $0xf3] sm:$0xff] %vm277_vm1, %v7390_v38  ;;  %412 = vst.msk [vmem:[#allocation2 + $0xfd] sm:$0xff] %vm277_vm1, %v7391_v39  ;;  %v1225_v49 = vld [vmem:[#allocation2 + $0x6a] sm:$0xff]  ;;  %v1226_v50 = vld [vmem:[#allocation2 + $0x72] sm:$0xff] }
  0x30   : > { %8538 = vmatprep.mubr.msk.f32.mxu0 %vm277_vm1, %v1218_v34  ;;  %413 = vst.msk [vmem:[#allocation2 + $0x105] sm:$0xff] %vm277_vm1, %v7392_v40  ;;  %417 = vst.msk [vmem:[#allocation2 + $0x10f] sm:$0xff] %vm277_vm1, %v7393_v42  ;;  %v1227_v51 = vld [vmem:[#allocation2 + $0x7a] sm:$0xff]  ;;  %v1228_v52 = vld [vmem:[#allocation2 + $0x82] sm:$0xff] }
  0x31   : > { %418 = vst.msk [vmem:[#allocation2 + $0x117] sm:$0xff] %vm277_vm1, %v7394_v43  ;;  %422 = vst.msk [vmem:[#allocation2 + $0x121] sm:$0xff] %vm277_vm1, %v7395_v44  ;;  %v1229_v53 = vld [vmem:[#allocation2 + $0x8a] sm:$0xff]  ;;  %v464_v59 = vld [vmem:[#allocation2 + $0x19] sm:$0xff] }
  0x32   : > { %423 = vst.msk [vmem:[#allocation2 + $0x129] sm:$0xff] %vm277_vm1, %v7396_v46  ;;  %v463_v58 = vld [vmem:[#allocation2 + $0x11] sm:$0xff]  ;;  %v465_v60 = vld [vmem:[#allocation2 + $0x21] sm:$0xff]  ;;  %v466_v61 = vld [vmem:[#allocation2 + $0x29] sm:$0xff] }
  0x33   : > { %8539 = vmatmul.mubr.msk.f32.gmra.mrb[6].mxu0 %vm277_vm1, %v1219_v35  ;;  %8420 = vmatprep.mubr.msk.f32.mxu1 %vm277_vm1, %v463_v58  ;;  %v467_v62 = vld [vmem:[#allocation2 + $0x31] sm:$0xff]  ;;  %v468_v63 = vld [vmem:[#allocation2 + $0x39] sm:$0xff]  ;;  %v469_v3 = vld [vmem:[#allocation2 + $0x41] sm:$0xff]  ;;  %322 = vst.msk [vmem:[#allocation3] sm:$0xff] %vm321_vm2, %v9809_v1 }
  0x34   : > { %8541 = vmatprep.mubr.msk.f32.mxu0 %vm277_vm1, %v1220_v36  ;;  %8421 = vmatmul.mubr.msk.f32.gmra.mrb[2].mxu1 %vm277_vm1, %v464_v59  ;;  %v10131_v2 = vld [vmem:[#allocation2 + $0x92] sm:$0xff]  ;;  %v470_v4 = vld [vmem:[#allocation2 + $0x49] sm:$0xff]  ;;  %v10137_v5 = vld [vmem:[#allocation2 + $0x9a] sm:$0xff]  ;;  %323 = vst.msk [vmem:[#allocation3 + $0x8] sm:$0xff] %vm321_vm2, %v9809_v1 }
  0x35   : > { %8423 = vmatprep.mubr.msk.f32.mxu1 %vm277_vm1, %v465_v60  ;;  %v10140_v6 = vld [vmem:[#allocation2 + $0xa2] sm:$0xff]  ;;  %v471_v7 = vld [vmem:[#allocation2 + $0x51] sm:$0xff]  ;;  %v472_v8 = vld [vmem:[#allocation2 + $0x59] sm:$0xff]  ;;  %324 = vst.msk [vmem:[#allocation3 + $0x10] sm:$0xff] %vm321_vm2, %v9809_v1 }
  0x36   : > { %v10150_v10 = vld [vmem:[#allocation2 + $0xb2] sm:$0xff]  ;;  %v473_v11 = vld [vmem:[#allocation2 + $0x61] sm:$0xff]  ;;  %v474_v12 = vld [vmem:[#allocation2 + $0x69] sm:$0xff]  ;;  %325 = vst.msk [vmem:[#allocation3 + $0x18] sm:$0xff] %vm321_vm2, %v9809_v1 }
  0x37   : > { %8542 = vmatmul.mubr.msk.f32.gmra.mrb[8].mxu0 %vm277_vm1, %v1221_v41  ;;  %v10157_v13 = vld [vmem:[#allocation2 + $0xba] sm:$0xff]  ;;  %v10160_v14 = vld [vmem:[#allocation2 + $0xc2] sm:$0xff]  ;;  %v475_v15 = vld [vmem:[#allocation2 + $0x71] sm:$0xff]  ;;  %326 = vst.msk [vmem:[#allocation3 + $0x20] sm:$0xff] %vm321_vm2, %v9809_v1 }
  0x38   : > { %8544 = vmatprep.mubr.msk.f32.mxu0 %vm277_vm1, %v1222_v45  ;;  %8424 = vmatmul.mubr.msk.f32.gmra.mrb[4].mxu1 %vm277_vm1, %v466_v61  ;;  %v476_v16 = vld [vmem:[#allocation2 + $0x79] sm:$0xff]  ;;  %v10167_v17 = vld [vmem:[#allocation2 + $0xca] sm:$0xff]  ;;  %v477_v19 = vld [vmem:[#allocation2 + $0x81] sm:$0xff]  ;;  %327 = vst.msk [vmem:[#allocation3 + $0x28] sm:$0xff] %vm321_vm2, %v9809_v1 }
  0x39   : > { %8426 = vmatprep.mubr.msk.f32.mxu1 %vm277_vm1, %v467_v62  ;;  %v10170_v18 = vld [vmem:[#allocation2 + $0xd2] sm:$0xff]  ;;  %v478_v20 = vld [vmem:[#allocation2 + $0x89] sm:$0xff]  ;;  %v10177_v21 = vld [vmem:[#allocation2 + $0xda] sm:$0xff]  ;;  %328 = vst.msk [vmem:[#allocation3 + $0x30] sm:$0xff] %vm321_vm2, %v9809_v1 }
  0x3a   : > { %v10180_v22 = vld [vmem:[#allocation2 + $0xe2] sm:$0xff]  ;;  %v479_v23 = vld [vmem:[#allocation2 + $0x91] sm:$0xff]  ;;  %v480_v24 = vld [vmem:[#allocation2 + $0x99] sm:$0xff]  ;;  %329 = vst.msk [vmem:[#allocation3 + $0x38] sm:$0xff] %vm321_vm2, %v9809_v1 }
  0x3b   : > { %8545 = vmatmul.mubr.msk.f32.gmra.mrb[10].mxu0 %vm277_vm1, %v1223_v47  ;;  %v10187_v25 = vld [vmem:[#allocation2 + $0xea] sm:$0xff]  ;;  %v10190_v26 = vld [vmem:[#allocation2 + $0xf2] sm:$0xff]  ;;  %v481_v27 = vld [vmem:[#allocation2 + $0xa1] sm:$0xff]  ;;  %330 = vst.msk [vmem:[#allocation3 + $0x40] sm:$0xff] %vm321_vm2, %v9809_v1 }
  0x3c   : > { %8547 = vmatprep.mubr.msk.f32.mxu0 %vm277_vm1, %v1224_v48  ;;  %8427 = vmatmul.mubr.msk.f32.gmra.mrb[6].mxu1 %vm277_vm1, %v468_v63  ;;  %v483_v31 = vld [vmem:[#allocation2 + $0xb1] sm:$0xff]  ;;  %v484_v32 = vld [vmem:[#allocation2 + $0xb9] sm:$0xff]  ;;  %v1676_v38 = vld [vmem:[#allocation2 + $0x122] sm:$0xff]  ;;  %331 = vst.msk [vmem:[#allocation3 + $0x48] sm:$0xff] %vm321_vm2, %v9809_v1 }
  0x3d   : > { %8429 = vmatprep.mubr.msk.f32.mxu1 %vm277_vm1, %v469_v3  ;;  %v10217_v37 = vld [vmem:[#allocation2 + $0x11a] sm:$0xff]  ;;  %v487_v39 = vld [vmem:[#allocation2 + $0xd1] sm:$0xff]  ;;  %v490_v44 = vld [vmem:[#allocation2 + $0xe9] sm:$0xff]  ;;  %332 = vst.msk [vmem:[#allocation3 + $0x50] sm:$0xff] %vm321_vm2, %v9809_v1 }
  0x3e   : > { %v488_v40 = vld [vmem:[#allocation2 + $0xd9] sm:$0xff]  ;;  %v489_v43 = vld [vmem:[#allocation2 + $0xe1] sm:$0xff]  ;;  %v495_v56 = vld [vmem:[#allocation2 + $0x111] sm:$0xff]  ;;  %333 = vst.msk [vmem:[#allocation3 + $0x58] sm:$0xff] %vm321_vm2, %v9809_v1 }
  0x3f   : > { %8548 = vmatmul.mubr.msk.f32.gmra.mrb[12].mxu0 %vm277_vm1, %v1225_v49  ;;  %v2072_v42 = vld [vmem:[#allocation2 + $0x13] sm:$0xff]  ;;  %v2074_v46 = vld [vmem:[#allocation2 + $0x23] sm:$0xff]  ;;  %v2077_v55 = vld [vmem:[#allocation2 + $0x3b] sm:$0xff]  ;;  %334 = vst.msk [vmem:[#allocation3 + $0x60] sm:$0xff] %vm321_vm2, %v9809_v1 }
  0x40   : > { %8550 = vmatprep.mubr.msk.f32.mxu0 %vm277_vm1, %v1226_v50  ;;  %8430 = vmatmul.mubr.msk.f32.gmra.mrb[8].mxu1 %vm277_vm1, %v470_v4  ;;  %v496_v57 = vld [vmem:[#allocation2 + $0x119] sm:$0xff]  ;;  %v2079_v58 = vld [vmem:[#allocation2 + $0x4b] sm:$0xff]  ;;  %v2082_v3 = vld [vmem:[#allocation2 + $0x63] sm:$0xff]  ;;  %338 = vst.msk [vmem:[#allocation4] sm:$0xff] %vm337_vm6, %v9809_v1 }
  0x41   : > { %8432 = vmatprep.mubr.msk.f32.mxu1 %vm277_vm1, %v471_v7  ;;  %v2080_v59 = vld [vmem:[#allocation2 + $0x53] sm:$0xff]  ;;  %v460_v60 = vld [vmem:[%s11357_s1] sm:$0x7]  ;;  %v425_v62 = vld [vmem:[#allocation2 + $0x8] sm:$0xff]  ;;  %339 = vst.msk [vmem:[#allocation4 + $0x8] sm:$0xff] %vm337_vm6, %v9809_v1 }
  0x42   : > { %v424_v61 = vld [vmem:[#allocation2] sm:$0xff]  ;;  %8471 = vmatprep.subr.msk.mxu1 %vm607_vm0, %v460_v60  ;;  %v2083_v4 = vld [vmem:[#allocation2 + $0x6b] sm:$0xff]  ;;  %340 = vst.msk [vmem:[#allocation4 + $0x10] sm:$0xff] %vm337_vm6, %v9809_v1  ;;  %341 = vst.msk [vmem:[#allocation4 + $0x18] sm:$0xff] %vm337_vm6, %v9809_v1 }
  0x43   : > { %8551 = vmatmul.mubr.msk.f32.gmra.mrb[14].mxu0 %vm277_vm1, %v1227_v51  ;;  %v2081_v63 = vld [vmem:[#allocation2 + $0x5b] sm:$0xff]  ;;  %8472 = vmatpush3.msk.msra.mxu1 %vm607_vm0, %v460_v60  ;;  %v426_v7 = vld [vmem:[#allocation2 + $0x10] sm:$0xff]  ;;  %v2102_v60 = vld [vmem:[#allocation2 + $0x103] sm:$0xff]  ;;  %342 = vst.msk [vmem:[#allocation4 + $0x20] sm:$0xff] %vm337_vm6, %v9809_v1 }
  0x44   : > { %8553 = vmatprep.mubr.msk.f32.mxu0 %vm277_vm1, %v1228_v52  ;;  %8433 = vmatmul.mubr.msk.f32.gmra.mrb[10].mxu1 %vm277_vm1, %v472_v8  ;;  %v427_v8 = vld [vmem:[#allocation2 + $0x18] sm:$0xff] }
  0x45   : > { %8435 = vmatprep.mubr.msk.f32.mxu1 %vm277_vm1, %v473_v11  ;;  %9333 = vmatprep.subr.msk.mxu1 %vm607_vm0, %v9904_v0  ;;  %v2084_v11 = vld [vmem:[#allocation2 + $0x73] sm:$0xff] }
  0x47   : > { %8554 = vmatmul.mubr.msk.f32.gmra.mrb[16].mxu0 %vm277_vm1, %v1229_v53 }
  0x48   : > { %8585 = vmatprep.mubr.msk.f32.mxu0 %vm277_vm1, %v1214_v28  ;;  %8436 = vmatmul.mubr.msk.f32.gmra.mrb[12].mxu1 %vm277_vm1, %v474_v12  ;;  %v482_v28 = vld [vmem:[#allocation2 + $0xa9] sm:$0xff]  ;;  %v428_v12 = vld [vmem:[#allocation2 + $0x20] sm:$0xff] }
  0x49   : > { %8438 = vmatprep.mubr.msk.f32.mxu1 %vm277_vm1, %v475_v15  ;;  %v429_v15 = vld [vmem:[#allocation2 + $0x28] sm:$0xff] }
  0x4b   : > { %8586 = vmatmul.mubr.msk.f32.vlgmr.msra.gmra.mrb[0].mxu0 %vm277_vm1, %v1215_v29  ;;  %v10197_v29 = vld [vmem:[#allocation2 + $0xfa] sm:$0xff] }
  0x4c   : > { %8640 = vmatpush3.msk.msra.mxu0 %vm607_vm0, %v10017_v9  ;;  %8588 = vmatprep.mubr.msk.f32.mxu0 %vm277_vm1, %v1216_v30  ;;  %v10147_v9 = vld [vmem:[#allocation2 + $0xaa] sm:$0xff]  ;;  %v10200_v30 = vld [vmem:[#allocation2 + $0x102] sm:$0xff] }
  0x4d   : > { %8695 = vmatprep.subr.msk.mxu0 %vm607_vm0, %v10099_v54  ;;  %8439 = vmatmul.mubr.msk.f32.gmra.mrb[14].mxu1 %vm277_vm1, %v476_v16  ;;  %v2085_v16 = vld [vmem:[#allocation2 + $0x7b] sm:$0xff] }
  0x4e   : > { %8441 = vmatprep.mubr.msk.f32.mxu1 %vm277_vm1, %v477_v19  ;;  %v430_v19 = vld [vmem:[#allocation2 + $0x30] sm:$0xff] }
  0x4f   : > { %8589 = vmatmul.mubr.msk.f32.gmra.mrb[2].mxu0 %vm277_vm1, %v1217_v33  ;;  %v10207_v33 = vld [vmem:[#allocation2 + $0x10a] sm:$0xff] }
  0x50   : > { %8591 = vmatprep.mubr.msk.f32.mxu0 %vm277_vm1, %v1218_v34  ;;  %v10210_v34 = vld [vmem:[#allocation2 + $0x112] sm:$0xff] }
  0x51   : > { %8442 = vmatmul.mubr.msk.f32.gmra.mrb[16].mxu1 %vm277_vm1, %v478_v20  ;;  %v431_v20 = vld [vmem:[#allocation2 + $0x38] sm:$0xff] }
  0x52   : > { %8444 = vmatprep.mubr.msk.f32.mxu1 %vm277_vm1, %v479_v23  ;;  %v2087_v23 = vld [vmem:[#allocation2 + $0x8b] sm:$0xff] }
  0x53   : > { %8592 = vmatmul.mubr.msk.f32.gmra.mrb[4].mxu0 %vm277_vm1, %v1219_v35  ;;  %v485_v35 = vld [vmem:[#allocation2 + $0xc1] sm:$0xff] }
  0x54   : > { %8594 = vmatprep.mubr.msk.f32.mxu0 %vm277_vm1, %v1220_v36  ;;  %v486_v36 = vld [vmem:[#allocation2 + $0xc9] sm:$0xff] }
  0x55   : > { %8445 = vmatmul.mubr.msk.f32.gmra.mrb[18].mxu1 %vm277_vm1, %v480_v24  ;;  %v2088_v24 = vld [vmem:[#allocation2 + $0x93] sm:$0xff] }
  0x56   : > { %8447 = vmatprep.mubr.msk.f32.mxu1 %vm277_vm1, %v481_v27  ;;  %v432_v27 = vld [vmem:[#allocation2 + $0x40] sm:$0xff] }
  0x57   : > { %8595 = vmatmul.mubr.msk.f32.gmra.mrb[6].mxu0 %vm277_vm1, %v1221_v41  ;;  %v1677_v41 = vld [vmem:[#allocation2 + $0x12a] sm:$0xff] }
  0x58   : > { %8597 = vmatprep.mubr.msk.f32.mxu0 %vm277_vm1, %v1222_v45  ;;  %v2073_v45 = vld [vmem:[#allocation2 + $0x1b] sm:$0xff] }
  0x59   : > { %8448 = vmatmul.mubr.msk.f32.gmra.mrb[20].mxu1 %vm277_vm1, %v482_v28  ;;  %v433_v28 = vld [vmem:[#allocation2 + $0x48] sm:$0xff] }
  0x5a   : > { %8450 = vmatprep.mubr.msk.f32.mxu1 %vm277_vm1, %v483_v31  ;;  %v2089_v31 = vld [vmem:[#allocation2 + $0x9b] sm:$0xff] }
  0x5b   : > { %8598 = vmatmul.mubr.msk.f32.gmra.mrb[8].mxu0 %vm277_vm1, %v1223_v47  ;;  %v10232_v47 = vld [vmem:[%s11357_s1 + $0x18] sm:$0x7] }
  0x5c   : > { %8600 = vmatprep.mubr.msk.f32.mxu0 %vm277_vm1, %v1224_v48  ;;  %v491_v48 = vld [vmem:[#allocation2 + $0xf1] sm:$0xff] }
  0x5d   : > { %8451 = vmatmul.mubr.msk.f32.gmra.mrb[22].mxu1 %vm277_vm1, %v484_v32  ;;  %v2090_v32 = vld [vmem:[#allocation2 + $0xa3] sm:$0xff] }
  0x5e   : > { %8453 = vmatprep.mubr.msk.f32.mxu1 %vm277_vm1, %v485_v35  ;;  %v434_v35 = vld [vmem:[#allocation2 + $0x50] sm:$0xff] }
  0x5f   : > { %8601 = vmatmul.mubr.msk.f32.gmra.mrb[10].mxu0 %vm277_vm1, %v1225_v49  ;;  %v492_v49 = vld [vmem:[#allocation2 + $0xf9] sm:$0xff] }
  0x60   : > { %8603 = vmatprep.mubr.msk.f32.mxu0 %vm277_vm1, %v1226_v50  ;;  %v2075_v50 = vld [vmem:[#allocation2 + $0x2b] sm:$0xff] }
  0x61   : > { %8454 = vmatmul.mubr.msk.f32.gmra.mrb[24].mxu1 %vm277_vm1, %v486_v36  ;;  %v435_v36 = vld [vmem:[#allocation2 + $0x58] sm:$0xff] }
  0x62   : > { %8456 = vmatprep.mubr.msk.f32.mxu1 %vm277_vm1, %v487_v39  ;;  %v2092_v39 = vld [vmem:[#allocation2 + $0xb3] sm:$0xff] }
  0x63   : > { %8604 = vmatmul.mubr.msk.f32.gmra.mrb[12].mxu0 %vm277_vm1, %v1227_v51  ;;  %v2076_v51 = vld [vmem:[#allocation2 + $0x33] sm:$0xff] }
  0x64   : > { %8606 = vmatprep.mubr.msk.f32.mxu0 %vm277_vm1, %v1228_v52  ;;  %v493_v52 = vld [vmem:[#allocation2 + $0x101] sm:$0xff] }
  0x65   : > { %8457 = vmatmul.mubr.msk.f32.gmra.mrb[26].mxu1 %vm277_vm1, %v488_v40  ;;  %v436_v40 = vld [vmem:[#allocation2 + $0x60] sm:$0xff] }
  0x66   : > { %8459 = vmatprep.mubr.msk.f32.mxu1 %vm277_vm1, %v489_v43  ;;  %v2094_v43 = vld [vmem:[#allocation2 + $0xc3] sm:$0xff] }
  0x67   : > { %8607 = vmatmul.mubr.msk.f32.gmra.mrb[14].mxu0 %vm277_vm1, %v1229_v53  ;;  %v494_v53 = vld [vmem:[#allocation2 + $0x109] sm:$0xff] }
  0x68   : > { %8609 = vmatprep.mubr.msk.f32.mxu0 %vm277_vm1, %v10131_v2 }
  0x69   : > { %8460 = vmatmul.mubr.msk.f32.gmra.mrb[28].mxu1 %vm277_vm1, %v490_v44  ;;  %v438_v44 = vld [vmem:[#allocation2 + $0x70] sm:$0xff] }
  0x6a   : > { %8462 = vmatprep.mubr.msk.f32.mxu1 %vm277_vm1, %v491_v48  ;;  %v2096_v48 = vld [vmem:[#allocation2 + $0xd3] sm:$0xff] }
  0x6b   : > { %8610 = vmatmul.mubr.msk.f32.gmra.mrb[16].mxu0 %vm277_vm1, %v10137_v5 }
  0x6c   : > { %8612 = vmatprep.mubr.msk.f32.mxu0 %vm277_vm1, %v10140_v6 }
  0x6d   : > { %8463 = vmatmul.mubr.msk.f32.gmra.mrb[30].mxu1 %vm277_vm1, %v492_v49  ;;  %v440_v49 = vld [vmem:[#allocation2 + $0x80] sm:$0xff] }
  0x6e   : > { %8465 = vmatprep.mubr.msk.f32.mxu1 %vm277_vm1, %v493_v52  ;;  %v2098_v52 = vld [vmem:[#allocation2 + $0xe3] sm:$0xff] }
  0x6f   : > { %8613 = vmatmul.mubr.msk.f32.gmra.mrb[18].mxu0 %vm277_vm1, %v10147_v9 }
  0x70   : > { %8615 = vmatprep.mubr.msk.f32.mxu0 %vm277_vm1, %v10150_v10 }
  0x71   : > { %8466 = vmatmul.mubr.msk.f32.gmra.mrb[32].mxu1 %vm277_vm1, %v494_v53  ;;  %v442_v53 = vld [vmem:[#allocation2 + $0x90] sm:$0xff] }
  0x72   : > { %8468 = vmatprep.mubr.msk.f32.mxu1 %vm277_vm1, %v495_v56  ;;  %v2100_v56 = vld [vmem:[#allocation2 + $0xf3] sm:$0xff] }
  0x73   : > { %8616 = vmatmul.mubr.msk.f32.gmra.mrb[20].mxu0 %vm277_vm1, %v10157_v13 }
  0x74   : > { %8618 = vmatprep.mubr.msk.f32.mxu0 %vm277_vm1, %v10160_v14 }
  0x75   : > { %8469 = vmatmul.mubr.msk.f32.gmra.mrb[34].mxu1 %vm277_vm1, %v496_v57  ;;  %v444_v57 = vld [vmem:[#allocation2 + $0xa0] sm:$0xff] }
  0x76   : > { %8473 = vmatprep.mubr.msk.f32.mxu1 %vm277_vm1, %v424_v61  ;;  %v446_v61 = vld [vmem:[#allocation2 + $0xb0] sm:$0xff] }
  0x77   : > { %8619 = vmatmul.mubr.msk.f32.gmra.mrb[22].mxu0 %vm277_vm1, %v10167_v17 }
  0x78   : > { %8621 = vmatprep.mubr.msk.f32.mxu0 %vm277_vm1, %v10170_v18 }
  0x79   : > { %8474 = vmatmul.mubr.msk.f32.vlgmr.msra.gmra.mrb[0].mxu1 %vm277_vm1, %v425_v62  ;;  %v447_v62 = vld [vmem:[#allocation2 + $0xb8] sm:$0xff] }
  0x7a   : > { %9334 = vmatpush3.msk.msra.mxu1 %vm607_vm0, %v9904_v0  ;;  %8476 = vmatprep.mubr.msk.f32.mxu1 %vm277_vm1, %v426_v7  ;;  %v2086_v0 = vld [vmem:[#allocation2 + $0x83] sm:$0xff] }
  0x7b   : > { %8622 = vmatmul.mubr.msk.f32.gmra.mrb[24].mxu0 %vm277_vm1, %v10177_v21  ;;  %v449_v7 = vld [vmem:[#allocation2 + $0xc8] sm:$0xff] }
  0x7c   : > { %8624 = vmatprep.mubr.msk.f32.mxu0 %vm277_vm1, %v10180_v22 }
  0x7d   : > { %8477 = vmatmul.mubr.msk.f32.gmra.mrb[2].mxu1 %vm277_vm1, %v427_v8  ;;  %v2105_v8 = vld [vmem:[#allocation2 + $0x11b] sm:$0xff] }
  0x7e   : > { %8479 = vmatprep.mubr.msk.f32.mxu1 %vm277_vm1, %v428_v12  ;;  %v450_v12 = vld [vmem:[#allocation2 + $0xd0] sm:$0xff] }
  0x7f   : > { %8625 = vmatmul.mubr.msk.f32.gmra.mrb[26].mxu0 %vm277_vm1, %v10187_v25 }
  0x80   : > { %8627 = vmatprep.mubr.msk.f32.mxu0 %vm277_vm1, %v10190_v26 }
  0x81   : > { %8480 = vmatmul.mubr.msk.f32.gmra.mrb[4].mxu1 %vm277_vm1, %v429_v15  ;;  %v451_v15 = vld [vmem:[#allocation2 + $0xd8] sm:$0xff] }
  0x82   : > { %8482 = vmatprep.mubr.msk.f32.mxu1 %vm277_vm1, %v430_v19  ;;  %v452_v19 = vld [vmem:[#allocation2 + $0xe0] sm:$0xff] }
  0x83   : > { %8628 = vmatmul.mubr.msk.f32.gmra.mrb[28].mxu0 %vm277_vm1, %v10197_v29 }
  0x84   : > { %8630 = vmatprep.mubr.msk.f32.mxu0 %vm277_vm1, %v10200_v30 }
  0x85   : > { %8483 = vmatmul.mubr.msk.f32.gmra.mrb[6].mxu1 %vm277_vm1, %v431_v20  ;;  %v453_v20 = vld [vmem:[#allocation2 + $0xe8] sm:$0xff] }
  0x86   : > { %8485 = vmatprep.mubr.msk.f32.mxu1 %vm277_vm1, %v432_v27  ;;  %v10324_v27 = vld [vmem:[%s11357_s1 + $0x1c] sm:$0x7] }
  0x87   : > { %8631 = vmatmul.mubr.msk.f32.gmra.mrb[30].mxu0 %vm277_vm1, %v10207_v33 }
  0x88   : > { %8633 = vmatprep.mubr.msk.f32.mxu0 %vm277_vm1, %v10210_v34 }
  0x89   : > { %8486 = vmatmul.mubr.msk.f32.gmra.mrb[8].mxu1 %vm277_vm1, %v433_v28  ;;  %v454_v28 = vld [vmem:[#allocation2 + $0xf0] sm:$0xff] }
  0x8a   : > { %8488 = vmatprep.mubr.msk.f32.mxu1 %vm277_vm1, %v434_v35  ;;  %v10334_v35 = vld [vmem:[#allocation2 + $0x34] sm:$0xff] }
  0x8b   : > { %8634 = vmatmul.mubr.msk.f32.gmra.mrb[32].mxu0 %vm277_vm1, %v10217_v37 }
  0x8c   : > { %8636 = vmatprep.mubr.msk.f32.mxu0 %vm277_vm1, %v1676_v38  ;;  %v2091_v38 = vld [vmem:[#allocation2 + $0xab] sm:$0xff] }
  0x8d   : > { %8489 = vmatmul.mubr.msk.f32.gmra.mrb[10].mxu1 %vm277_vm1, %v435_v36  ;;  %v456_v36 = vld [vmem:[#allocation2 + $0x100] sm:$0xff] }
  0x8e   : > { %8491 = vmatprep.mubr.msk.f32.mxu1 %vm277_vm1, %v436_v40  ;;  %v458_v40 = vld [vmem:[#allocation2 + $0x110] sm:$0xff] }
  0x8f   : > { %8637 = vmatmul.mubr.msk.f32.gmra.mrb[34].mxu0 %vm277_vm1, %v1677_v41  ;;  %v437_v41 = vld [vmem:[#allocation2 + $0x68] sm:$0xff] }
  0x90   : > { %8641 = vmatprep.mubr.msk.f32.mxu0 %vm277_vm1, %v2072_v42  ;;  %v2093_v42 = vld [vmem:[#allocation2 + $0xbb] sm:$0xff] }
  0x91   : > { %8492 = vmatmul.mubr.msk.f32.gmra.mrb[12].mxu1 %vm277_vm1, %v437_v41  ;;  %v459_v41 = vld [vmem:[#allocation2 + $0x118] sm:$0xff] }
  0x92   : > { %8494 = vmatprep.mubr.msk.f32.mxu1 %vm277_vm1, %v438_v44  ;;  %v10366_v44 = vld [vmem:[#allocation2 + $0x5c] sm:$0xff] }
  0x93   : > { %8642 = vmatmul.mubr.msk.f32.vlgmr.msra.gmra.mrb[0].mxu0 %vm277_vm1, %v2073_v45  ;;  %v439_v45 = vld [vmem:[#allocation2 + $0x78] sm:$0xff] }
  0x94   : > { %8696 = vmatpush3.msk.msra.mxu0 %vm607_vm0, %v10099_v54  ;;  %8644 = vmatprep.mubr.msk.f32.mxu0 %vm277_vm1, %v2074_v46  ;;  %v2078_v54 = vld [vmem:[#allocation2 + $0x43] sm:$0xff]  ;;  %v2095_v46 = vld [vmem:[#allocation2 + $0xcb] sm:$0xff] }
  0x95   : > { %8751 = vmatprep.subr.msk.mxu0 %vm607_vm0, %v10232_v47  ;;  %8495 = vmatmul.mubr.msk.f32.gmra.mrb[14].mxu1 %vm277_vm1, %v439_v45  ;;  %v10368_v45 = vld [vmem:[#allocation2 + $0x64] sm:$0xff] }
  0x96   : > { %8497 = vmatprep.mubr.msk.f32.mxu1 %vm277_vm1, %v440_v49  ;;  %v2530_v49 = vld [vmem:[#allocation2 + $0xf4] sm:$0xff] }
  0x97   : > { %8645 = vmatmul.mubr.msk.f32.gmra.mrb[2].mxu0 %vm277_vm1, %v2075_v50  ;;  %v441_v50 = vld [vmem:[#allocation2 + $0x88] sm:$0xff] }
  0x98   : > { %8647 = vmatprep.mubr.msk.f32.mxu0 %vm277_vm1, %v2076_v51  ;;  %v2097_v51 = vld [vmem:[#allocation2 + $0xdb] sm:$0xff] }
  0x99   : > { %8498 = vmatmul.mubr.msk.f32.gmra.mrb[16].mxu1 %vm277_vm1, %v441_v50  ;;  %v2532_v50 = vld [vmem:[#allocation2 + $0x104] sm:$0xff] }
  0x9a   : > { %8500 = vmatprep.mubr.msk.f32.mxu1 %vm277_vm1, %v442_v53  ;;  %v2537_v53 = vld [vmem:[#allocation2 + $0x12c] sm:$0xff] }
  0x9b   : > { %8648 = vmatmul.mubr.msk.f32.gmra.mrb[4].mxu0 %vm277_vm1, %v2077_v55  ;;  %v443_v55 = vld [vmem:[#allocation2 + $0x98] sm:$0xff] }
  0x9c   : > { %8650 = vmatprep.mubr.msk.f32.mxu0 %vm277_vm1, %v2078_v54  ;;  %v2099_v54 = vld [vmem:[#allocation2 + $0xeb] sm:$0xff] }
  0x9d   : > { %8501 = vmatmul.mubr.msk.f32.gmra.mrb[18].mxu1 %vm277_vm1, %v443_v55  ;;  %v7700_v55 = vld [vmem:[%s11357_s1 + $0x20] sm:$0x7] }
  0x9e   : > { %8503 = vmatprep.mubr.msk.f32.mxu1 %vm277_vm1, %v444_v57  ;;  %v3362_v57 = vld [vmem:[#allocation2 + $0x25] sm:$0xff] }
  0x9f   : > { %8651 = vmatmul.mubr.msk.f32.gmra.mrb[6].mxu0 %vm277_vm1, %v2079_v58  ;;  %v445_v58 = vld [vmem:[#allocation2 + $0xa8] sm:$0xff] }
  0xa0   : > { %8653 = vmatprep.mubr.msk.f32.mxu0 %vm277_vm1, %v2080_v59  ;;  %v2101_v59 = vld [vmem:[#allocation2 + $0xfb] sm:$0xff] }
  0xa1   : > { %8504 = vmatmul.mubr.msk.f32.gmra.mrb[20].mxu1 %vm277_vm1, %v445_v58  ;;  %v3363_v58 = vld [vmem:[#allocation2 + $0x2d] sm:$0xff] }
  0xa2   : > { %8506 = vmatprep.mubr.msk.f32.mxu1 %vm277_vm1, %v446_v61  ;;  %v3366_v61 = vld [vmem:[#allocation2 + $0x45] sm:$0xff] }
  0xa3   : > { %8654 = vmatmul.mubr.msk.f32.gmra.mrb[8].mxu0 %vm277_vm1, %v2081_v63  ;;  %v2103_v63 = vld [vmem:[#allocation2 + $0x10b] sm:$0xff] }
  0xa4   : > { %8656 = vmatprep.mubr.msk.f32.mxu0 %vm277_vm1, %v2082_v3  ;;  %v2104_v3 = vld [vmem:[#allocation2 + $0x113] sm:$0xff] }
  0xa5   : > { %8507 = vmatmul.mubr.msk.f32.gmra.mrb[22].mxu1 %vm277_vm1, %v447_v62  ;;  %v3367_v62 = vld [vmem:[#allocation2 + $0x4d] sm:$0xff] }
  0xa7   : > { %8657 = vmatmul.mubr.msk.f32.gmra.mrb[10].mxu0 %vm277_vm1, %v2083_v4  ;;  %v448_v4 = vld [vmem:[#allocation2 + $0xc0] sm:$0xff] }
  0xa8   : > { %8659 = vmatprep.mubr.msk.f32.mxu0 %vm277_vm1, %v2084_v11  ;;  %8509 = vmatprep.mubr.msk.f32.mxu1 %vm277_vm1, %v448_v4  ;;  %v2106_v11 = vld [vmem:[#allocation2 + $0x123] sm:$0xff] }
  0xa9   : > { %8510 = vmatmul.mubr.msk.f32.gmra.mrb[24].mxu1 %vm277_vm1, %v449_v7  ;;  %v3370_v4 = vld [vmem:[#allocation2 + $0x65] sm:$0xff] }
  0xaa   : > { %8512 = vmatprep.mubr.msk.f32.mxu1 %vm277_vm1, %v450_v12  ;;  %v3372_v12 = vld [vmem:[#allocation2 + $0x75] sm:$0xff] }
  0xab   : > { %8660 = vmatmul.mubr.msk.f32.gmra.mrb[12].mxu0 %vm277_vm1, %v2085_v16  ;;  %v2107_v16 = vld [vmem:[#allocation2 + $0x12b] sm:$0xff] }
  0xac   : > { %8662 = vmatprep.mubr.msk.f32.mxu0 %vm277_vm1, %v2086_v0  ;;  %v2502_v0 = vld [vmem:[#allocation2 + $0x14] sm:$0xff] }
  0xad   : > { %8513 = vmatmul.mubr.msk.f32.gmra.mrb[26].mxu1 %vm277_vm1, %v451_v15 }
  0xae   : > { %8515 = vmatprep.mubr.msk.f32.mxu1 %vm277_vm1, %v452_v19  ;;  %v3374_v19 = vld [vmem:[#allocation2 + $0x85] sm:$0xff] }
  0xaf   : > { %8663 = vmatmul.mubr.msk.f32.gmra.mrb[14].mxu0 %vm277_vm1, %v2087_v23  ;;  %v2503_v23 = vld [vmem:[#allocation2 + $0x1c] sm:$0xff] }
  0xb0   : > { %8665 = vmatprep.mubr.msk.f32.mxu0 %vm277_vm1, %v2088_v24  ;;  %v10319_v24 = vld [vmem:[#allocation2 + $0x24] sm:$0xff] }
  0xb1   : > { %8516 = vmatmul.mubr.msk.f32.gmra.mrb[28].mxu1 %vm277_vm1, %v453_v20 }
  0xb2   : > { %8518 = vmatprep.mubr.msk.f32.mxu1 %vm277_vm1, %v454_v28 }
  0xb3   : > { %8666 = vmatmul.mubr.msk.f32.gmra.mrb[16].mxu0 %vm277_vm1, %v2089_v31  ;;  %v455_v31 = vld [vmem:[#allocation2 + $0xf8] sm:$0xff] }
  0xb4   : > { %8668 = vmatprep.mubr.msk.f32.mxu0 %vm277_vm1, %v2090_v32  ;;  %v10332_v32 = vld [vmem:[#allocation2 + $0x2c] sm:$0xff] }
  0xb5   : > { %8519 = vmatmul.mubr.msk.f32.gmra.mrb[30].mxu1 %vm277_vm1, %v455_v31 }
  0xb6   : > { %8521 = vmatprep.mubr.msk.f32.mxu1 %vm277_vm1, %v456_v36 }
  0xb7   : > { %8669 = vmatmul.mubr.msk.f32.gmra.mrb[18].mxu0 %vm277_vm1, %v2091_v38  ;;  %v457_v38 = vld [vmem:[#allocation2 + $0x108] sm:$0xff] }
  0xb8   : > { %8671 = vmatprep.mubr.msk.f32.mxu0 %vm277_vm1, %v2092_v39  ;;  %v10347_v39 = vld [vmem:[#allocation2 + $0x44] sm:$0xff] }
  0xb9   : > { %8522 = vmatmul.mubr.msk.f32.gmra.mrb[32].mxu1 %vm277_vm1, %v457_v38 }
  0xba   : > { %8524 = vmatprep.mubr.msk.f32.mxu1 %vm277_vm1, %v458_v40 }
  0xbb   : > { %8672 = vmatmul.mubr.msk.f32.gmra.mrb[20].mxu0 %vm277_vm1, %v2093_v42  ;;  %v10354_v42 = vld [vmem:[#allocation2 + $0x4c] sm:$0xff] }
  0xbc   : > { %8674 = vmatprep.mubr.msk.f32.mxu0 %vm277_vm1, %v2094_v43  ;;  %v10357_v43 = vld [vmem:[#allocation2 + $0x54] sm:$0xff] }
  0xbd   : > { %8525 = vmatmul.mubr.msk.f32.gmra.mrb[34].mxu1 %vm277_vm1, %v459_v41 }
  0xbe   : > { %8556 = vmatprep.mubr.msk.f32.mxu1 %vm277_vm1, %v10131_v2  ;;  %v10378_v2 = vld [vmem:[#allocation2 + $0x6c] sm:$0xff] }
  0xbf   : > { %8675 = vmatmul.mubr.msk.f32.gmra.mrb[22].mxu0 %vm277_vm1, %v2095_v46  ;;  %v10380_v46 = vld [vmem:[#allocation2 + $0x74] sm:$0xff] }
  0xc0   : > { %8677 = vmatprep.mubr.msk.f32.mxu0 %vm277_vm1, %v2096_v48  ;;  %v2524_v48 = vld [vmem:[#allocation2 + $0xc4] sm:$0xff] }
  0xc1   : > { %8557 = vmatmul.mubr.msk.f32.vlgmr.msra.gmra.mrb[18].mxu1 %vm277_vm1, %v10137_v5  ;;  %v10390_v5 = vld [vmem:[#allocation2 + $0x7c] sm:$0xff] }
  0xc2   : > { %8559 = vmatprep.mubr.msk.f32.mxu1 %vm277_vm1, %v10140_v6  ;;  %v10392_v6 = vld [vmem:[#allocation2 + $0x84] sm:$0xff] }
  0xc3   : > { %8678 = vmatmul.mubr.msk.f32.gmra.mrb[24].mxu0 %vm277_vm1, %v2097_v51  ;;  %v2534_v51 = vld [vmem:[#allocation2 + $0x114] sm:$0xff] }
  0xc4   : > { %8680 = vmatprep.mubr.msk.f32.mxu0 %vm277_vm1, %v2098_v52  ;;  %v2536_v52 = vld [vmem:[#allocation2 + $0x124] sm:$0xff] }
  0xc5   : > { %8560 = vmatmul.mubr.msk.f32.gmra.mrb[20].mxu1 %vm277_vm1, %v10147_v9  ;;  %v10402_v9 = vld [vmem:[#allocation2 + $0x8c] sm:$0xff] }
  0xc6   : > { %8562 = vmatprep.mubr.msk.f32.mxu1 %vm277_vm1, %v10150_v10  ;;  %v10404_v10 = vld [vmem:[#allocation2 + $0x94] sm:$0xff] }
  0xc7   : > { %8681 = vmatmul.mubr.msk.f32.gmra.mrb[26].mxu0 %vm277_vm1, %v2099_v54  ;;  %v2966_v54 = vld [vmem:[#allocation2 + $0x134] sm:$0xff] }
  0xc8   : > { %8683 = vmatprep.mubr.msk.f32.mxu0 %vm277_vm1, %v2100_v56  ;;  %v2967_v56 = vld [vmem:[#allocation2 + $0x13c] sm:$0xff] }
  0xc9   : > { %8563 = vmatmul.mubr.msk.f32.gmra.mrb[22].mxu1 %vm277_vm1, %v10157_v13  ;;  %v10414_v13 = vld [vmem:[#allocation2 + $0x9c] sm:$0xff] }
  0xca   : > { %8565 = vmatprep.mubr.msk.f32.mxu1 %vm277_vm1, %v10160_v14  ;;  %v10416_v14 = vld [vmem:[#allocation2 + $0xa4] sm:$0xff] }
  0xcb   : > { %8684 = vmatmul.mubr.msk.f32.gmra.mrb[28].mxu0 %vm277_vm1, %v2101_v59  ;;  %v3364_v59 = vld [vmem:[#allocation2 + $0x35] sm:$0xff] }
  0xcc   : > { %8686 = vmatprep.mubr.msk.f32.mxu0 %vm277_vm1, %v2102_v60  ;;  %v3365_v60 = vld [vmem:[#allocation2 + $0x3d] sm:$0xff] }
  0xcd   : > { %8566 = vmatmul.mubr.msk.f32.gmra.mrb[24].mxu1 %vm277_vm1, %v10167_v17  ;;  %v2521_v17 = vld [vmem:[#allocation2 + $0xac] sm:$0xff] }
  0xce   : > { %8568 = vmatprep.mubr.msk.f32.mxu1 %vm277_vm1, %v10170_v18  ;;  %v2522_v18 = vld [vmem:[#allocation2 + $0xb4] sm:$0xff] }
  0xcf   : > { %8687 = vmatmul.mubr.msk.f32.gmra.mrb[30].mxu0 %vm277_vm1, %v2103_v63  ;;  %v3368_v63 = vld [vmem:[#allocation2 + $0x55] sm:$0xff] }
  0xd0   : > { %8689 = vmatprep.mubr.msk.f32.mxu0 %vm277_vm1, %v2104_v3  ;;  %v3369_v3 = vld [vmem:[#allocation2 + $0x5d] sm:$0xff] }
  0xd1   : > { %8569 = vmatmul.mubr.msk.f32.gmra.mrb[26].mxu1 %vm277_vm1, %v10177_v21  ;;  %v2523_v21 = vld [vmem:[#allocation2 + $0xbc] sm:$0xff] }
  0xd2   : > { %8571 = vmatprep.mubr.msk.f32.mxu1 %vm277_vm1, %v10180_v22  ;;  %v2525_v22 = vld [vmem:[#allocation2 + $0xcc] sm:$0xff] }
  0xd3   : > { %8690 = vmatmul.mubr.msk.f32.gmra.mrb[32].mxu0 %vm277_vm1, %v2105_v8  ;;  %v3371_v8 = vld [vmem:[#allocation2 + $0x6d] sm:$0xff] }
  0xd4   : > { %8692 = vmatprep.mubr.msk.f32.mxu0 %vm277_vm1, %v2106_v11 }
  0xd5   : > { %8572 = vmatmul.mubr.msk.f32.gmra.mrb[28].mxu1 %vm277_vm1, %v10187_v25  ;;  %v2526_v25 = vld [vmem:[#allocation2 + $0xd4] sm:$0xff] }
  0xd6   : > { %8574 = vmatprep.mubr.msk.f32.mxu1 %vm277_vm1, %v10190_v26  ;;  %v2527_v26 = vld [vmem:[#allocation2 + $0xdc] sm:$0xff] }
  0xd7   : > { %8693 = vmatmul.mubr.msk.f32.gmra.mrb[34].mxu0 %vm277_vm1, %v2107_v16 }
  0xd8   : > { %8697 = vmatprep.mubr.msk.f32.mxu0 %vm277_vm1, %v2502_v0  ;;  %v3373_v0 = vld [vmem:[#allocation2 + $0x7d] sm:$0xff] }
  0xd9   : > { %8575 = vmatmul.mubr.msk.f32.gmra.mrb[30].mxu1 %vm277_vm1, %v10197_v29  ;;  %v2528_v29 = vld [vmem:[#allocation2 + $0xe4] sm:$0xff] }
  0xda   : > { %8577 = vmatprep.mubr.msk.f32.mxu1 %vm277_vm1, %v10200_v30  ;;  %v2529_v30 = vld [vmem:[#allocation2 + $0xec] sm:$0xff] }
  0xdb   : > { %8698 = vmatmul.mubr.msk.f32.vlgmr.msra.gmra.mrb[0].mxu0 %vm277_vm1, %v2503_v23 }
  0xdc   : > { %8752 = vmatpush3.msk.msra.mxu0 %vm607_vm0, %v10232_v47  ;;  %8700 = vmatprep.mubr.msk.f32.mxu0 %vm277_vm1, %v10319_v24  ;;  %v10344_v47 = vld [vmem:[#allocation2 + $0x3c] sm:$0xff] }
  0xdd   : > { %8807 = vmatprep.subr.msk.mxu0 %vm607_vm0, %v10324_v27  ;;  %8578 = vmatmul.mubr.msk.f32.gmra.mrb[32].mxu1 %vm277_vm1, %v10207_v33  ;;  %v2531_v33 = vld [vmem:[#allocation2 + $0xfc] sm:$0xff] }
  0xde   : > { %8580 = vmatprep.mubr.msk.f32.mxu1 %vm277_vm1, %v10210_v34  ;;  %v2533_v34 = vld [vmem:[#allocation2 + $0x10c] sm:$0xff] }
  0xdf   : > { %8701 = vmatmul.mubr.msk.f32.gmra.mrb[2].mxu0 %vm277_vm1, %v10332_v32 }
  0xe0   : > { %8703 = vmatprep.mubr.msk.f32.mxu0 %vm277_vm1, %v10334_v35 }
  0xe1   : > { %8581 = vmatmul.mubr.msk.f32.gmra.mrb[34].mxu1 %vm277_vm1, %v10217_v37  ;;  %v2535_v37 = vld [vmem:[#allocation2 + $0x11c] sm:$0xff] }
  0xe3   : > { %8704 = vmatmul.mubr.msk.f32.gmra.mrb[4].mxu0 %vm277_vm1, %v10344_v47 }
  0xe4   : > { %8706 = vmatprep.mubr.msk.f32.mxu0 %vm277_vm1, %v10347_v39 }
  0xe7   : > { %8707 = vmatmul.mubr.msk.f32.gmra.mrb[6].mxu0 %vm277_vm1, %v10354_v42 }
  0xe8   : > { %8709 = vmatprep.mubr.msk.f32.mxu0 %vm277_vm1, %v10357_v43 }
  0xeb   : > { %8710 = vmatmul.mubr.msk.f32.gmra.mrb[8].mxu0 %vm277_vm1, %v10366_v44 }
  0xec   : > { %8712 = vmatprep.mubr.msk.f32.mxu0 %vm277_vm1, %v10368_v45 }
  0xef   : > { %8713 = vmatmul.mubr.msk.f32.gmra.mrb[10].mxu0 %vm277_vm1, %v10378_v2 }
  0xf0   : > { %8715 = vmatprep.mubr.msk.f32.mxu0 %vm277_vm1, %v10380_v46 }
  0xf3   : > { %8716 = vmatmul.mubr.msk.f32.gmra.mrb[12].mxu0 %vm277_vm1, %v10390_v5 }
  0xf4   : > { %8718 = vmatprep.mubr.msk.f32.mxu0 %vm277_vm1, %v10392_v6 }
  0xf7   : > { %8719 = vmatmul.mubr.msk.f32.gmra.mrb[14].mxu0 %vm277_vm1, %v10402_v9 }
  0xf8   : > { %8721 = vmatprep.mubr.msk.f32.mxu0 %vm277_vm1, %v10404_v10 }
  0xfb   : > { %8722 = vmatmul.mubr.msk.f32.gmra.mrb[16].mxu0 %vm277_vm1, %v10414_v13 }
  0xfc   : > { %8724 = vmatprep.mubr.msk.f32.mxu0 %vm277_vm1, %v10416_v14 }
  0xff   : > { %8725 = vmatmul.mubr.msk.f32.gmra.mrb[18].mxu0 %vm277_vm1, %v2521_v17 }
 0x100   : > { %8727 = vmatprep.mubr.msk.f32.mxu0 %vm277_vm1, %v2522_v18 }
 0x103   : > { %8728 = vmatmul.mubr.msk.f32.gmra.mrb[20].mxu0 %vm277_vm1, %v2523_v21 }
 0x104   : > { %8730 = vmatprep.mubr.msk.f32.mxu0 %vm277_vm1, %v2524_v48 }
 0x107   : > { %8731 = vmatmul.mubr.msk.f32.gmra.mrb[22].mxu0 %vm277_vm1, %v2525_v22 }
 0x108   : > { %8733 = vmatprep.mubr.msk.f32.mxu0 %vm277_vm1, %v2526_v25 }
 0x10b   : > { %8734 = vmatmul.mubr.msk.f32.gmra.mrb[24].mxu0 %vm277_vm1, %v2527_v26 }
 0x10c   : > { %8736 = vmatprep.mubr.msk.f32.mxu0 %vm277_vm1, %v2528_v29 }
 0x10f   : > { %8737 = vmatmul.mubr.msk.f32.gmra.mrb[26].mxu0 %vm277_vm1, %v2529_v30 }
 0x110   : > { %8739 = vmatprep.mubr.msk.f32.mxu0 %vm277_vm1, %v2530_v49 }
 0x113   : > { %8740 = vmatmul.mubr.msk.f32.gmra.mrb[28].mxu0 %vm277_vm1, %v2531_v33 }
 0x114   : > { %8742 = vmatprep.mubr.msk.f32.mxu0 %vm277_vm1, %v2532_v50 }
 0x117   : > { %8743 = vmatmul.mubr.msk.f32.gmra.mrb[30].mxu0 %vm277_vm1, %v2533_v34 }
 0x118   : > { %8745 = vmatprep.mubr.msk.f32.mxu0 %vm277_vm1, %v2534_v51 }
 0x11b   : > { %8746 = vmatmul.mubr.msk.f32.gmra.mrb[32].mxu0 %vm277_vm1, %v2535_v37 }
 0x11c   : > { %8748 = vmatprep.mubr.msk.f32.mxu0 %vm277_vm1, %v2536_v52 }
 0x11f   : > { %8749 = vmatmul.mubr.msk.f32.gmra.mrb[34].mxu0 %vm277_vm1, %v2537_v53 }
 0x120   : > { %8753 = vmatprep.mubr.msk.f32.mxu0 %vm277_vm1, %v10319_v24  ;;  %v3375_v24 = vld [vmem:[#allocation2 + $0x8d] sm:$0xff] }
 0x123   : > { %8754 = vmatmul.mubr.msk.f32.vlgmr.msra.gmra.mrb[0].mxu0 %vm277_vm1, %v10332_v32  ;;  %v3377_v32 = vld [vmem:[#allocation2 + $0x9d] sm:$0xff] }
 0x124   : > { %8808 = vmatpush3.msk.msra.mxu0 %vm607_vm0, %v10324_v27  ;;  %8756 = vmatprep.mubr.msk.f32.mxu0 %vm277_vm1, %v10334_v35  ;;  %v3376_v27 = vld [vmem:[#allocation2 + $0x95] sm:$0xff]  ;;  %v3378_v35 = vld [vmem:[#allocation2 + $0xa5] sm:$0xff] }
 0x125   : > { %8863 = vmatprep.subr.msk.mxu0 %vm607_vm0, %v7700_v55 }
 0x127   : > { %8757 = vmatmul.mubr.msk.f32.gmra.mrb[2].mxu0 %vm277_vm1, %v10344_v47  ;;  %v3379_v47 = vld [vmem:[#allocation2 + $0xad] sm:$0xff] }
 0x128   : > { %8759 = vmatprep.mubr.msk.f32.mxu0 %vm277_vm1, %v10347_v39  ;;  %v3380_v39 = vld [vmem:[#allocation2 + $0xb5] sm:$0xff] }
 0x12b   : > { %8760 = vmatmul.mubr.msk.f32.gmra.mrb[4].mxu0 %vm277_vm1, %v10354_v42  ;;  %v3381_v42 = vld [vmem:[#allocation2 + $0xbd] sm:$0xff] }
 0x12c   : > { %8762 = vmatprep.mubr.msk.f32.mxu0 %vm277_vm1, %v10357_v43  ;;  %v3382_v43 = vld [vmem:[#allocation2 + $0xc5] sm:$0xff] }
 0x12f   : > { %8763 = vmatmul.mubr.msk.f32.gmra.mrb[6].mxu0 %vm277_vm1, %v10366_v44 }
 0x130   : > { %8765 = vmatprep.mubr.msk.f32.mxu0 %vm277_vm1, %v10368_v45 }
 0x133   : > { %8766 = vmatmul.mubr.msk.f32.gmra.mrb[8].mxu0 %vm277_vm1, %v10378_v2  ;;  %v3383_v2 = vld [vmem:[#allocation2 + $0xcd] sm:$0xff] }
 0x134   : > { %8768 = vmatprep.mubr.msk.f32.mxu0 %vm277_vm1, %v10380_v46  ;;  %v3384_v46 = vld [vmem:[#allocation2 + $0xd5] sm:$0xff] }
 0x137   : > { %8769 = vmatmul.mubr.msk.f32.gmra.mrb[10].mxu0 %vm277_vm1, %v10390_v5 }
 0x138   : > { %8771 = vmatprep.mubr.msk.f32.mxu0 %vm277_vm1, %v10392_v6 }
 0x13b   : > { %8772 = vmatmul.mubr.msk.f32.gmra.mrb[12].mxu0 %vm277_vm1, %v10402_v9  ;;  %v3385_v9 = vld [vmem:[#allocation2 + $0xdd] sm:$0xff] }
 0x13c   : > { %8774 = vmatprep.mubr.msk.f32.mxu0 %vm277_vm1, %v10404_v10  ;;  %v3386_v10 = vld [vmem:[#allocation2 + $0xe5] sm:$0xff] }
 0x13f   : > { %8775 = vmatmul.mubr.msk.f32.gmra.mrb[14].mxu0 %vm277_vm1, %v10414_v13 }
 0x140   : > { %8777 = vmatprep.mubr.msk.f32.mxu0 %vm277_vm1, %v10416_v14 }
 0x143   : > { %8778 = vmatmul.mubr.msk.f32.gmra.mrb[16].mxu0 %vm277_vm1, %v2521_v17  ;;  %v3387_v17 = vld [vmem:[#allocation2 + $0xed] sm:$0xff] }
 0x144   : > { %8780 = vmatprep.mubr.msk.f32.mxu0 %vm277_vm1, %v2522_v18  ;;  %v3388_v18 = vld [vmem:[#allocation2 + $0xf5] sm:$0xff] }
 0x147   : > { %8781 = vmatmul.mubr.msk.f32.gmra.mrb[18].mxu0 %vm277_vm1, %v2523_v21  ;;  %v3389_v21 = vld [vmem:[#allocation2 + $0xfd] sm:$0xff] }
 0x148   : > { %8783 = vmatprep.mubr.msk.f32.mxu0 %vm277_vm1, %v2524_v48  ;;  %v3390_v48 = vld [vmem:[#allocation2 + $0x105] sm:$0xff] }
 0x14b   : > { %8784 = vmatmul.mubr.msk.f32.gmra.mrb[20].mxu0 %vm277_vm1, %v2525_v22  ;;  %v3391_v22 = vld [vmem:[#allocation2 + $0x10d] sm:$0xff] }
 0x14c   : > { %8786 = vmatprep.mubr.msk.f32.mxu0 %vm277_vm1, %v2526_v25  ;;  %v10525_v7 = vpop.f32.mrb[0].mxu1  ;;  %v3392_v25 = vld [vmem:[#allocation2 + $0x115] sm:$0xff] }
 0x14d   : > { %v10528_v11 = vpop.f32.mrb[1].mxu1 }
 0x14f   : > { %8787 = vmatmul.mubr.msk.f32.gmra.mrb[22].mxu0 %vm277_vm1, %v2527_v26  ;;  %v3393_v26 = vld [vmem:[#allocation2 + $0x11d] sm:$0xff] }
 0x150   : > { %8789 = vmatprep.mubr.msk.f32.mxu0 %vm277_vm1, %v2528_v29  ;;  %v10530_v15 = vpop.f32.mrb[2].mxu1  ;;  %v3394_v29 = vld [vmem:[#allocation2 + $0x125] sm:$0xff] }
 0x151   : > { %v10532_v16 = vpop.f32.mrb[3].mxu1 }
 0x153   : > { %8790 = vmatmul.mubr.msk.f32.gmra.mrb[24].mxu0 %vm277_vm1, %v2529_v30  ;;  %v3395_v30 = vld [vmem:[#allocation2 + $0x12d] sm:$0xff] }
 0x154   : > { %8792 = vmatprep.mubr.msk.f32.mxu0 %vm277_vm1, %v2530_v49  ;;  %v10536_v20 = vpop.f32.mrb[4].mxu1  ;;  %v3396_v49 = vld [vmem:[#allocation2 + $0x135] sm:$0xff] }
 0x155   : > { %v10538_v23 = vpop.f32.mrb[5].mxu1 }
 0x157   : > { %8793 = vmatmul.mubr.msk.f32.gmra.mrb[26].mxu0 %vm277_vm1, %v2531_v33  ;;  %v3397_v33 = vld [vmem:[#allocation2 + $0x13d] sm:$0xff] }
 0x158   : > { %8795 = vmatprep.mubr.msk.f32.mxu0 %vm277_vm1, %v2532_v50  ;;  %v10542_v28 = vpop.f32.mrb[6].mxu1  ;;  %v3792_v50 = vld [vmem:[#allocation2 + $0x26] sm:$0xff] }
 0x159   : > { %v10544_v31 = vpop.f32.mrb[7].mxu1 }
 0x15b   : > { %8796 = vmatmul.mubr.msk.f32.gmra.mrb[28].mxu0 %vm277_vm1, %v2533_v34  ;;  %v3793_v34 = vld [vmem:[#allocation2 + $0x2e] sm:$0xff] }
 0x15c   : > { %8798 = vmatprep.mubr.msk.f32.mxu0 %vm277_vm1, %v2534_v51  ;;  %v10548_v36 = vpop.f32.mrb[8].mxu1  ;;  %v3794_v51 = vld [vmem:[#allocation2 + $0x36] sm:$0xff] }
 0x15d   : > { %v10550_v38 = vpop.f32.mrb[9].mxu1 }
 0x15f   : > { %8799 = vmatmul.mubr.msk.f32.gmra.mrb[30].mxu0 %vm277_vm1, %v2535_v37  ;;  %v3795_v37 = vld [vmem:[#allocation2 + $0x3e] sm:$0xff] }
 0x160   : > { %8801 = vmatprep.mubr.msk.f32.mxu0 %vm277_vm1, %v2536_v52  ;;  %v10554_v40 = vpop.f32.mrb[10].mxu1  ;;  %v3796_v52 = vld [vmem:[#allocation2 + $0x46] sm:$0xff] }
 0x161   : > { %v10556_v41 = vpop.f32.mrb[11].mxu1 }
 0x163   : > { %8802 = vmatmul.mubr.msk.f32.gmra.mrb[32].mxu0 %vm277_vm1, %v2537_v53  ;;  %v3797_v53 = vld [vmem:[#allocation2 + $0x4e] sm:$0xff] }
 0x164   : > { %8804 = vmatprep.mubr.msk.f32.mxu0 %vm277_vm1, %v2966_v54  ;;  %v10560_v44 = vpop.f32.mrb[12].mxu1  ;;  %v3799_v54 = vld [vmem:[#allocation2 + $0x5e] sm:$0xff] }
 0x165   : > { %v10562_v45 = vpop.f32.mrb[13].mxu1 }
 0x167   : > { %8805 = vmatmul.mubr.msk.f32.gmra.mrb[34].mxu0 %vm277_vm1, %v2967_v56  ;;  %v3800_v56 = vld [vmem:[#allocation2 + $0x66] sm:$0xff] }
 0x168   : > { %8809 = vmatprep.mubr.msk.f32.mxu0 %vm277_vm1, %v3362_v57  ;;  %v10566_v5 = vpop.f32.mrb[14].mxu1 }
 0x169   : > { %v10568_v6 = vpop.f32.mrb[15].mxu1 }
 0x16b   : > { %8810 = vmatmul.mubr.msk.f32.vlgmr.msra.gmra.mrb[0].mxu0 %vm277_vm1, %v3363_v58 }
 0x16c   : > { %8864 = vmatpush3.msk.msra.mxu0 %vm607_vm0, %v7700_v55  ;;  %8812 = vmatprep.mubr.msk.f32.mxu0 %vm277_vm1, %v3364_v59  ;;  %v10572_v13 = vpop.f32.mrb[16].mxu1  ;;  %v3798_v55 = vld [vmem:[#allocation2 + $0x56] sm:$0xff]  ;;  %v3801_v59 = vld [vmem:[#allocation2 + $0x6e] sm:$0xff] }
 0x16d   : > { %v10574_v14 = vpop.f32.mrb[17].mxu1 }
 0x16f   : > { %8813 = vmatmul.mubr.msk.f32.gmra.mrb[2].mxu0 %vm277_vm1, %v3365_v60  ;;  %v3802_v60 = vld [vmem:[#allocation2 + $0x76] sm:$0xff] }
 0x170   : > { %8815 = vmatprep.mubr.msk.f32.mxu0 %vm277_vm1, %v3366_v61 }
 0x173   : > { %8816 = vmatmul.mubr.msk.f32.gmra.mrb[4].mxu0 %vm277_vm1, %v3367_v62 }
 0x174   : > { %8818 = vmatprep.mubr.msk.f32.mxu0 %vm277_vm1, %v3368_v63  ;;  %v3803_v63 = vld [vmem:[#allocation2 + $0x7e] sm:$0xff] }
 0x177   : > { %8819 = vmatmul.mubr.msk.f32.gmra.mrb[6].mxu0 %vm277_vm1, %v3369_v3  ;;  %v3804_v3 = vld [vmem:[#allocation2 + $0x86] sm:$0xff] }
 0x178   : > { %8821 = vmatprep.mubr.msk.f32.mxu0 %vm277_vm1, %v3370_v4 }
 0x17b   : > { %8822 = vmatmul.mubr.msk.f32.gmra.mrb[8].mxu0 %vm277_vm1, %v3371_v8 }
 0x17c   : > { %8824 = vmatprep.mubr.msk.f32.mxu0 %vm277_vm1, %v3372_v12  ;;  %v3805_v12 = vld [vmem:[#allocation2 + $0x8e] sm:$0xff] }
 0x17f   : > { %8825 = vmatmul.mubr.msk.f32.gmra.mrb[10].mxu0 %vm277_vm1, %v3373_v0  ;;  %v3806_v0 = vld [vmem:[#allocation2 + $0x96] sm:$0xff] }
 0x180   : > { %8827 = vmatprep.mubr.msk.f32.mxu0 %vm277_vm1, %v3374_v19 }
 0x183   : > { %8828 = vmatmul.mubr.msk.f32.gmra.mrb[12].mxu0 %vm277_vm1, %v3375_v24 }
 0x184   : > { %8830 = vmatprep.mubr.msk.f32.mxu0 %vm277_vm1, %v3376_v27  ;;  %v3807_v27 = vld [vmem:[#allocation2 + $0x9e] sm:$0xff] }
 0x187   : > { %8831 = vmatmul.mubr.msk.f32.gmra.mrb[14].mxu0 %vm277_vm1, %v3377_v32  ;;  %v3808_v32 = vld [vmem:[#allocation2 + $0xa6] sm:$0xff] }
 0x188   : > { %8833 = vmatprep.mubr.msk.f32.mxu0 %vm277_vm1, %v3378_v35 }
 0x18b   : > { %8834 = vmatmul.mubr.msk.f32.gmra.mrb[16].mxu0 %vm277_vm1, %v3379_v47 }
 0x18c   : > { %8836 = vmatprep.mubr.msk.f32.mxu0 %vm277_vm1, %v3380_v39  ;;  %v3809_v39 = vld [vmem:[#allocation2 + $0xae] sm:$0xff] }
 0x18f   : > { %8837 = vmatmul.mubr.msk.f32.gmra.mrb[18].mxu0 %vm277_vm1, %v3381_v42  ;;  %v3810_v42 = vld [vmem:[#allocation2 + $0xb6] sm:$0xff] }
 0x190   : > { %8839 = vmatprep.mubr.msk.f32.mxu0 %vm277_vm1, %v3382_v43 }
 0x193   : > { %8840 = vmatmul.mubr.msk.f32.gmra.mrb[20].mxu0 %vm277_vm1, %v3383_v2 }
 0x194   : > { %8842 = vmatprep.mubr.msk.f32.mxu0 %vm277_vm1, %v3384_v46  ;;  %v10596_v57 = vpop.f32.mrb[18].mxu1  ;;  %v3811_v46 = vld [vmem:[#allocation2 + $0xbe] sm:$0xff] }
 0x195   : > { %v10598_v58 = vpop.f32.mrb[19].mxu1 }
 0x197   : > { %8843 = vmatmul.mubr.msk.f32.gmra.mrb[22].mxu0 %vm277_vm1, %v3385_v9  ;;  %v3812_v9 = vld [vmem:[#allocation2 + $0xc6] sm:$0xff] }
 0x198   : > { %8845 = vmatprep.mubr.msk.f32.mxu0 %vm277_vm1, %v3386_v10  ;;  %v10602_v61 = vpop.f32.mrb[20].mxu1 }
 0x199   : > { %v10604_v62 = vpop.f32.mrb[21].mxu1 }
 0x19b   : > { %8846 = vmatmul.mubr.msk.f32.gmra.mrb[24].mxu0 %vm277_vm1, %v3387_v17 }
 0x19c   : > { %8848 = vmatprep.mubr.msk.f32.mxu0 %vm277_vm1, %v3388_v18  ;;  %v10608_v4 = vpop.f32.mrb[22].mxu1  ;;  %v3813_v18 = vld [vmem:[#allocation2 + $0xce] sm:$0xff] }
 0x19d   : > { %v10610_v8 = vpop.f32.mrb[23].mxu1 }
 0x19f   : > { %8849 = vmatmul.mubr.msk.f32.gmra.mrb[26].mxu0 %vm277_vm1, %v3389_v21  ;;  %v3814_v21 = vld [vmem:[#allocation2 + $0xd6] sm:$0xff] }
 0x1a0   : > { %8851 = vmatprep.mubr.msk.f32.mxu0 %vm277_vm1, %v3390_v48  ;;  %v10614_v19 = vpop.f32.mrb[24].mxu1 }
 0x1a1   : > { %v10616_v24 = vpop.f32.mrb[25].mxu1 }
 0x1a3   : > { %8852 = vmatmul.mubr.msk.f32.gmra.mrb[28].mxu0 %vm277_vm1, %v3391_v22 }
 0x1a4   : > { %8854 = vmatprep.mubr.msk.f32.mxu0 %vm277_vm1, %v3392_v25  ;;  %v10620_v35 = vpop.f32.mrb[26].mxu1  ;;  %v3815_v25 = vld [vmem:[#allocation2 + $0xde] sm:$0xff] }
 0x1a5   : > { %v10622_v47 = vpop.f32.mrb[27].mxu1 }
 0x1a7   : > { %8855 = vmatmul.mubr.msk.f32.gmra.mrb[30].mxu0 %vm277_vm1, %v3393_v26  ;;  %v3816_v26 = vld [vmem:[#allocation2 + $0xe6] sm:$0xff] }
 0x1a8   : > { %8857 = vmatprep.mubr.msk.f32.mxu0 %vm277_vm1, %v3394_v29  ;;  %v10626_v43 = vpop.f32.mrb[28].mxu1 }
 0x1a9   : > { %v10628_v2 = vpop.f32.mrb[29].mxu1 }
 0x1ab   : > { %8858 = vmatmul.mubr.msk.f32.gmra.mrb[32].mxu0 %vm277_vm1, %v3395_v30 }
 0x1ac   : > { %8860 = vmatprep.mubr.msk.f32.mxu0 %vm277_vm1, %v3396_v49  ;;  %v10632_v10 = vpop.f32.mrb[30].mxu1  ;;  %v3817_v49 = vld [vmem:[#allocation2 + $0xee] sm:$0xff] }
 0x1ad   : > { %v10634_v17 = vpop.f32.mrb[31].mxu1 }
 0x1af   : > { %8861 = vmatmul.mubr.msk.f32.gmra.mrb[34].mxu0 %vm277_vm1, %v3397_v33  ;;  %v3818_v33 = vld [vmem:[#allocation2 + $0xf6] sm:$0xff] }
 0x1b0   : > { %8865 = vmatprep.mubr.msk.f32.mxu0 %vm277_vm1, %v3792_v50  ;;  %v10638_v48 = vpop.f32.mrb[32].mxu1  ;;  %v3819_v50 = vld [vmem:[#allocation2 + $0xfe] sm:$0xff] }
 0x1b1   : > { %v10640_v22 = vpop.f32.mrb[33].mxu1 }
 0x1b3   : > { %8866 = vmatmul.mubr.msk.f32.vlgmr.msra.gmra.mrb[0].mxu0 %vm277_vm1, %v3793_v34  ;;  %v3820_v34 = vld [vmem:[#allocation2 + $0x106] sm:$0xff] }
 0x1b4   : > { %8868 = vmatprep.mubr.msk.f32.mxu0 %vm277_vm1, %v3794_v51  ;;  %v10644_v29 = vpop.f32.mrb[34].mxu1  ;;  %v3821_v51 = vld [vmem:[#allocation2 + $0x10e] sm:$0xff] }
 0x1b5   : > { %v10646_v30 = vpop.f32.mrb[35].mxu1 }
 0x1b7   : > { %8869 = vmatmul.mubr.msk.f32.gmra.mrb[2].mxu0 %vm277_vm1, %v3795_v37  ;;  %v3822_v37 = vld [vmem:[#allocation2 + $0x116] sm:$0xff] }
 0x1b8   : > { %8871 = vmatprep.mubr.msk.f32.mxu0 %vm277_vm1, %v3796_v52  ;;  %v3823_v52 = vld [vmem:[#allocation2 + $0x11e] sm:$0xff] }
 0x1bb   : > { %8872 = vmatmul.mubr.msk.f32.gmra.mrb[4].mxu0 %vm277_vm1, %v3797_v53  ;;  %v3824_v53 = vld [vmem:[#allocation2 + $0x126] sm:$0xff] }
 0x1bc   : > { %8874 = vmatprep.mubr.msk.f32.mxu0 %vm277_vm1, %v3798_v55  ;;  %v3825_v55 = vld [vmem:[#allocation2 + $0x12e] sm:$0xff] }
 0x1bf   : > { %8875 = vmatmul.mubr.msk.f32.gmra.mrb[6].mxu0 %vm277_vm1, %v3799_v54  ;;  %v3826_v54 = vld [vmem:[#allocation2 + $0x136] sm:$0xff] }
 0x1c0   : > { %8877 = vmatprep.mubr.msk.f32.mxu0 %vm277_vm1, %v3800_v56  ;;  %v3827_v56 = vld [vmem:[#allocation2 + $0x13e] sm:$0xff] }
 0x1c3   : > { %8878 = vmatmul.mubr.msk.f32.gmra.mrb[8].mxu0 %vm277_vm1, %v3801_v59  ;;  %v7739_v59 = vld [vmem:[%s11359_s3 + $0x10] sm:$0xff] }
 0x1c4   : > { %8880 = vmatprep.mubr.msk.f32.mxu0 %vm277_vm1, %v3802_v60  ;;  %v7740_v60 = vld [vmem:[%s11359_s3 + $0x18] sm:$0xff] }
 0x1c7   : > { %8881 = vmatmul.mubr.msk.f32.gmra.mrb[10].mxu0 %vm277_vm1, %v3803_v63  ;;  %v9243_v63 = vpack.c.bf16 %v7740_v60, %v7739_v59 }
 0x1c8   : > { %8883 = vmatprep.mubr.msk.f32.mxu0 %vm277_vm1, %v3804_v3  ;;  %v4721_v3 = vld [vmem:[#allocation3 + $0x1] sm:$0xff] }
 0x1c9   : > { %9244 = vmatprep.subr.bf16.mxu1 %v9243_v63  ;;  %8923 = vmatprep.mubr.msk.f32.mxu1 %vm321_vm2, %v4721_v3 }
 0x1ca   : > { %9246 = vmatpush3.bf16.msra.mxu1 %v9243_v63 }
 0x1cb   : > { %8884 = vmatmul.mubr.msk.f32.gmra.mrb[12].mxu0 %vm277_vm1, %v3805_v12  ;;  %v4719_v12 = vld [vmem:[%s11359_s3] sm:$0xff] }
 0x1cc   : > { %8886 = vmatprep.mubr.msk.f32.mxu0 %vm277_vm1, %v3806_v0  ;;  %v4720_v0 = vld [vmem:[%s11359_s3 + $0x8] sm:$0xff] }
 0x1cf   : > { %8887 = vmatmul.mubr.msk.f32.gmra.mrb[14].mxu0 %vm277_vm1, %v3807_v27  ;;  %v10700_v27 = vpack.c.bf16 %v4720_v0, %v4719_v12 }
 0x1d0   : > { %8889 = vmatprep.mubr.msk.f32.mxu0 %vm277_vm1, %v3808_v32 }
 0x1d1   : > { %9248 = vmatprep.subr.bf16.mxu1 %v10700_v27 }
 0x1d3   : > { %8890 = vmatmul.mubr.msk.f32.gmra.mrb[16].mxu0 %vm277_vm1, %v3809_v39  ;;  %v10706_v39 = vld [vmem:[%s11358_s2] ss:$0 sm:$0xff] }
 0x1d4   : > { %8892 = vmatprep.mubr.msk.f32.mxu0 %vm277_vm1, %v3810_v42 }
 0x1d7   : > { %8893 = vmatmul.mubr.msk.f32.gmra.mrb[18].mxu0 %vm277_vm1, %v3811_v46 }
 0x1d8   : > { %8895 = vmatprep.mubr.msk.f32.mxu0 %vm277_vm1, %v3812_v9 }
 0x1db   : > { %8896 = vmatmul.mubr.msk.f32.gmra.mrb[20].mxu0 %vm277_vm1, %v3813_v18 }
 0x1dc   : > { %8898 = vmatprep.mubr.msk.f32.mxu0 %vm277_vm1, %v3814_v21 }
 0x1df   : > { %8899 = vmatmul.mubr.msk.f32.gmra.mrb[22].mxu0 %vm277_vm1, %v3815_v25 }
 0x1e0   : > { %8901 = vmatprep.mubr.msk.f32.mxu0 %vm277_vm1, %v3816_v26 }
 0x1e3   : > { %8902 = vmatmul.mubr.msk.f32.gmra.mrb[24].mxu0 %vm277_vm1, %v3817_v49 }
 0x1e4   : > { %8904 = vmatprep.mubr.msk.f32.mxu0 %vm277_vm1, %v3818_v33 }
 0x1e7   : > { %8905 = vmatmul.mubr.msk.f32.gmra.mrb[26].mxu0 %vm277_vm1, %v3819_v50 }
 0x1e8   : > { %8907 = vmatprep.mubr.msk.f32.mxu0 %vm277_vm1, %v3820_v34 }
 0x1eb   : > { %8908 = vmatmul.mubr.msk.f32.gmra.mrb[28].mxu0 %vm277_vm1, %v3821_v51 }
 0x1ec   : > { %8910 = vmatprep.mubr.msk.f32.mxu0 %vm277_vm1, %v3822_v37 }
 0x1ef   : > { %8911 = vmatmul.mubr.msk.f32.gmra.mrb[30].mxu0 %vm277_vm1, %v3823_v52 }
 0x1f0   : > { %8913 = vmatprep.mubr.msk.f32.mxu0 %vm277_vm1, %v3824_v53 }
 0x1f3   : > { %8914 = vmatmul.mubr.msk.f32.gmra.mrb[32].mxu0 %vm277_vm1, %v3825_v55 }
 0x1f4   : > { %8916 = vmatprep.mubr.msk.f32.mxu0 %vm277_vm1, %v3826_v54 }
 0x1f7   : > { %8917 = vmatmul.mubr.msk.f32.gmra.mrb[34].mxu0 %vm277_vm1, %v3827_v56 }
 0x286   : > { %v8867_v32 = vpop.f32.mrb[0].mxu0 }
 0x287   : > { %v9335_v42 = vadd.f32 %v8867_v32, %v10525_v7  ;;  %v4007_v46 = vpop.f32.mrb[1].mxu0 }
 0x288   : > { %v9336_v9 = vadd.f32 %v4007_v46, %v10528_v11 }
 0x289   : > { %v4230_v18 = vadd.f32 %v9335_v42, %v10706_v39 }
 0x28a   : > { %v4229_v21 = vadd.f32 %v9336_v9, %v10706_v39  ;;  %v8870_v25 = vpop.f32.mrb[2].mxu0 }
 0x28b   : > { %v4266_v26 = vmax.f32 %v4230_v18, 0.0  ;;  %v9337_v49 = vadd.f32 %v8870_v25, %v10530_v15  ;;  %v4017_v33 = vpop.f32.mrb[3].mxu0 }
 0x28c   : > { %v4265_v50 = vmax.f32 %v4229_v21, 0.0  ;;  %v9338_v34 = vadd.f32 %v4017_v33, %v10532_v16 }
 0x28d   : > { %v4339_v51 = vrot.slane %v4266_v26, 1  ;;  %v4232_v37 = vadd.f32 %v9337_v49, %v10706_v39 }
 0x28e   : > { %v4338_v7 = vrot.slane %v4265_v50, 1  ;;  %v4231_v52 = vadd.f32 %v9338_v34, %v10706_v39  ;;  %v8873_v11 = vpop.f32.mrb[4].mxu0 }
 0x28f   : > { %v4268_v53 = vmax.f32 %v4232_v37, 0.0  ;;  %v9339_v55 = vadd.f32 %v8873_v11, %v10536_v20  ;;  %v4027_v54 = vpop.f32.mrb[5].mxu0 }
 0x290   : > { %v4340_v56 = vsel %vm4337_vm3, %v4338_v7, %v4339_v51  ;;  %v4267_v59 = vmax.f32 %v4231_v52, 0.0  ;;  %v9340_v15 = vadd.f32 %v4027_v54, %v10538_v23 }
 0x291   : > { %v4445_v60 = vmax.f32 %v4265_v50, %v4340_v56  ;;  %v4343_v63 = vrot.slane %v4268_v53, 1  ;;  %v4234_v16 = vadd.f32 %v9339_v55, %v10706_v39 }
 0x292   : > { %v4341_v3 = vrot.slane %v4267_v59, 1  ;;  %v4233_v12 = vadd.f32 %v9340_v15, %v10706_v39  ;;  %v8876_v0 = vpop.f32.mrb[6].mxu0 }
 0x293   : > { %v4270_v32 = vmax.f32 %v4234_v16, 0.0  ;;  %v9341_v42 = vadd.f32 %v8876_v0, %v10542_v28  ;;  %v4037_v46 = vpop.f32.mrb[7].mxu0 }
 0x294   : > { %v4342_v20 = vsel %vm4337_vm3, %v4339_v51, %v4341_v3  ;;  %v4344_v9 = vsel %vm4337_vm3, %v4341_v3, %v4343_v63  ;;  %v4269_v18 = vmax.f32 %v4233_v12, 0.0  ;;  %v9342_v21 = vadd.f32 %v4037_v46, %v10544_v31  ;;  %v7761_v51 = vld [vmem:[%s11359_s3 + $0x20] sm:$0xff]  ;;  %v7762_v31 = vld [vmem:[%s11359_s3 + $0x28] sm:$0xff] }
 0x295   : > { %v4446_v23 = vmax.f32 %v4266_v26, %v4342_v20  ;;  %v4447_v25 = vmax.f32 %v4267_v59, %v4344_v9  ;;  %v4347_v49 = vrot.slane %v4270_v32, 1  ;;  %v4236_v33 = vadd.f32 %v9341_v42, %v10706_v39 }
 0x296   : > { %v4345_v50 = vrot.slane %v4269_v18, 1  ;;  %v4235_v34 = vadd.f32 %v9342_v21, %v10706_v39  ;;  %v8879_v37 = vpop.f32.mrb[8].mxu0  ;;  %v10741_v42 = vpack.c.bf16 %v7762_v31, %v7761_v51 }
 0x297   : > { %v4272_v7 = vmax.f32 %v4236_v33, 0.0  ;;  %v9343_v28 = vadd.f32 %v8879_v37, %v10548_v36  ;;  %v4047_v52 = vpop.f32.mrb[9].mxu0  ;;  %v4516_v16 = vrot.slane %v4447_v25, 2 }
 0x298   : > { %v4346_v26 = vsel %vm4337_vm3, %v4343_v63, %v4345_v50  ;;  %v4348_v11 = vsel %vm4337_vm3, %v4345_v50, %v4347_v49  ;;  %v4271_v55 = vmax.f32 %v4235_v34, 0.0  ;;  %v9344_v54 = vadd.f32 %v4047_v52, %v10550_v38 }
 0x299   : > { %v4448_v56 = vmax.f32 %v4268_v53, %v4346_v26  ;;  %v10737_v59 = vmax.f32 %v4269_v18, %v4348_v11  ;;  %v4351_v36 = vrot.slane %v4272_v7, 1  ;;  %v4238_v15 = vadd.f32 %v9343_v28, %v10706_v39 }
 0x29a   : > { %v4349_v3 = vrot.slane %v4271_v55, 1  ;;  %v4237_v12 = vadd.f32 %v9344_v54, %v10706_v39  ;;  %v8882_v0 = vpop.f32.mrb[10].mxu0 }
 0x29b   : > { %v4517_v46 = vrot.slane %v4448_v56, 2  ;;  %v4519_v63 = vrot.slane %v10737_v59, 2  ;;  %v4274_v20 = vmax.f32 %v4238_v15, 0.0  ;;  %v9345_v9 = vadd.f32 %v8882_v0, %v10554_v40  ;;  %v4057_v38 = vpop.f32.mrb[11].mxu0 }
 0x29c   : > { %v4350_v53 = vsel %vm4337_vm3, %v4347_v49, %v4349_v3  ;;  %v4352_v18 = vsel %vm4337_vm3, %v4349_v3, %v4351_v36  ;;  %v4273_v21 = vmax.f32 %v4237_v12, 0.0  ;;  %v9346_v25 = vadd.f32 %v4057_v38, %v10556_v41 }
 0x29d   : > { %v4518_v33 = vsel %vm4515_vm4, %v4516_v16, %v4517_v46  ;;  %v4520_v50 = vsel %vm4515_vm4, %v4517_v46, %v4519_v63  ;;  %v4450_v34 = vmax.f32 %v4270_v32, %v4350_v53  ;;  %v10750_v37 = vmax.f32 %v4271_v55, %v4352_v18 }
 0x29e   : > { %v4617_v28 = vmax.f32 %v4445_v60, %v4518_v33  ;;  %v4618_v52 = vmax.f32 %v4446_v23, %v4520_v50  ;;  %v4355_v51 = vrot.slane %v4274_v20, 1  ;;  %v4353_v31 = vrot.slane %v4273_v21, 1  ;;  %v8885_v40 = vpop.f32.mrb[12].mxu0 }
 0x29f   : > { %v4523_v26 = vrot.slane %v10750_v37, 2  ;;  %v4240_v49 = vadd.f32 %v9345_v9, %v10706_v39  ;;  %v4239_v11 = vadd.f32 %v9346_v25, %v10706_v39  ;;  %v4067_v54 = vpop.f32.mrb[13].mxu0  ;;  %v9347_v60 = vadd.f32 %v8885_v40, %v10560_v44 }
 0x2a0   : > { %4651 = vst.msk [vmem:[#allocation5] sm:$0xff] %vm321_vm2, %v4617_v28  ;;  %4652 = vst.msk [vmem:[#allocation5 + $0x8] sm:$0xff] %vm321_vm2, %v4618_v52  ;;  %v4354_v41 = vsel %vm4337_vm3, %v4351_v36, %v4353_v31  ;;  %v4356_v32 = vsel %vm4337_vm3, %v4353_v31, %v4355_v51  ;;  %v9348_v23 = vadd.f32 %v4067_v54, %v10562_v45 }
 0x2a1   : > { %v4452_v55 = vmax.f32 %v4272_v7, %v4354_v41  ;;  %v4453_v56 = vmax.f32 %v4273_v21, %v4356_v32  ;;  %v4276_v15 = vmax.f32 %v4240_v49, 0.0  ;;  %v4275_v16 = vmax.f32 %v4239_v11, 0.0 }
 0x2a2   : > { %v8888_v3 = vpop.f32.mrb[14].mxu0  ;;  %v4242_v46 = vadd.f32 %v9347_v60, %v10706_v39  ;;  %v4241_v63 = vadd.f32 %v9348_v23, %v10706_v39 }
 0x2a3   : > { %v4525_v12 = vrot.slane %v4452_v55, 2  ;;  %v4527_v0 = vrot.slane %v4453_v56, 2  ;;  %v4077_v9 = vpop.f32.mrb[15].mxu0  ;;  %v4359_v38 = vrot.slane %v4276_v15, 1  ;;  %v4357_v36 = vrot.slane %v4275_v16, 1 }
 0x2a4   : > { %v9349_v53 = vadd.f32 %v8888_v3, %v10566_v5  ;;  %v9350_v44 = vadd.f32 %v4077_v9, %v10568_v6  ;;  %v4278_v18 = vmax.f32 %v4242_v46, 0.0  ;;  %v4277_v21 = vmax.f32 %v4241_v63, 0.0 }
 0x2a5   : > { %v4526_v45 = vsel %vm4515_vm4, %v4523_v26, %v4525_v12  ;;  %v4528_v7 = vsel %vm4515_vm4, %v4525_v12, %v4527_v0  ;;  %v4358_v50 = vsel %vm4337_vm3, %v4355_v51, %v4357_v36  ;;  %v4360_v28 = vsel %vm4337_vm3, %v4357_v36, %v4359_v38 }
 0x2a6   : > { %v4621_v25 = vmax.f32 %v10737_v59, %v4526_v45  ;;  %v4622_v33 = vmax.f32 %v4450_v34, %v4528_v7  ;;  %v8891_v52 = vpop.f32.mrb[16].mxu0  ;;  %v4454_v31 = vmax.f32 %v4274_v20, %v4358_v50  ;;  %v10770_v40 = vmax.f32 %v4275_v16, %v4360_v28 }
 0x2a7   : > { %v4363_v5 = vrot.slane %v4278_v18, 1  ;;  %v4361_v49 = vrot.slane %v4277_v21, 1  ;;  %v4087_v6 = vpop.f32.mrb[17].mxu0  ;;  %v4686_v11 = vld [vmem:[#allocation5] ss:$2 sm:$0xff]  ;;  %v4244_v26 = vadd.f32 %v9349_v53, %v10706_v39  ;;  %v4243_v59 = vadd.f32 %v9350_v44, %v10706_v39 }
 0x2a8   : > { %4655 = vst.msk [vmem:[#allocation5 + $0x20] sm:$0xff] %vm321_vm2, %v4621_v25  ;;  %4656 = vst.msk [vmem:[#allocation5 + $0x28] sm:$0xff] %vm321_vm2, %v4622_v33  ;;  %v9351_v34 = vadd.f32 %v8891_v52, %v10572_v13  ;;  %v9352_v51 = vadd.f32 %v4087_v6, %v10574_v14  ;;  %v4529_v20 = vrot.slane %v4454_v31, 2 }
 0x2a9   : > { %4687 = vst.msk [vmem:[#allocation3 + $0xb] sm:$0xff] %vm321_vm2, %v4686_v11  ;;  %v4362_v54 = vsel %vm4337_vm3, %v4359_v38, %v4361_v49  ;;  %v4364_v41 = vsel %vm4337_vm3, %v4361_v49, %v4363_v5  ;;  %v4280_v23 = vmax.f32 %v4244_v26, 0.0  ;;  %v4279_v55 = vmax.f32 %v4243_v59, 0.0 }
 0x2aa   : > { %v4456_v32 = vmax.f32 %v4276_v15, %v4362_v54  ;;  %v4457_v60 = vmax.f32 %v4277_v21, %v4364_v41  ;;  %v8894_v56 = vpop.f32.mrb[18].mxu0  ;;  %v4530_v16 = vsel %vm4515_vm4, %v4527_v0, %v4529_v20  ;;  %v10783_v3 = vadd.f32 %v9351_v34, %v10706_v39 }
 0x2ab   : > { %v4245_v13 = vadd.f32 %v9352_v51, %v10706_v39  ;;  %v4097_v14 = vpop.f32.mrb[19].mxu0  ;;  %v4623_v12 = vmax.f32 %v10750_v37, %v4530_v16  ;;  %v4367_v9 = vrot.slane %v4280_v23, 1  ;;  %v4365_v38 = vrot.slane %v4279_v55, 1 }
 0x2ac   : > { %v4533_v46 = vrot.slane %v4456_v32, 2  ;;  %v4535_v63 = vrot.slane %v4457_v60, 2  ;;  %v4282_v15 = vmax.f32 %v10783_v3, 0.0  ;;  %v9353_v0 = vadd.f32 %v8894_v56, %v10596_v57 }
 0x2ad   : > { %v4281_v36 = vmax.f32 %v4245_v13, 0.0  ;;  %4657 = vst.msk [vmem:[#allocation5 + $0x30] sm:$0xff] %vm321_vm2, %v4623_v12  ;;  %v9354_v44 = vadd.f32 %v4097_v14, %v10598_v58  ;;  %v4366_v21 = vsel %vm4337_vm3, %v4363_v5, %v4365_v38  ;;  %v4368_v37 = vsel %vm4337_vm3, %v4365_v38, %v4367_v9 }
 0x2ae   : > { %v4536_v53 = vsel %vm4515_vm4, %v4533_v46, %v4535_v63  ;;  %v8897_v45 = vpop.f32.mrb[20].mxu0  ;;  %v4458_v50 = vmax.f32 %v4278_v18, %v4366_v21  ;;  %v10794_v28 = vmax.f32 %v4279_v55, %v4368_v37  ;;  %v4371_v52 = vrot.slane %v4282_v15, 1 }
 0x2af   : > { %v4626_v7 = vmax.f32 %v4454_v31, %v4536_v53  ;;  %v4107_v25 = vpop.f32.mrb[21].mxu0  ;;  %v4369_v49 = vrot.slane %v4281_v36, 1  ;;  %v4248_v57 = vadd.f32 %v9353_v0, %v10706_v39  ;;  %v4247_v58 = vadd.f32 %v9354_v44, %v10706_v39 }
 0x2b0   : > { %v4722_v33 = vld [vmem:[#allocation3 + $0x9] sm:$0xff]  ;;  %v9355_v31 = vadd.f32 %v8897_v45, %v10602_v61  ;;  %v9356_v5 = vadd.f32 %v4107_v25, %v10604_v62  ;;  %v4537_v6 = vrot.slane %v4458_v50, 2 }
 0x2b1   : > { %8924 = vmatmul.mubr.msk.f32.vlgmr.msra.gmra.mrb[36].mxu1 %vm321_vm2, %v4722_v33  ;;  %4660 = vst.msk [vmem:[#allocation5 + $0x48] sm:$0xff] %vm321_vm2, %v4626_v7  ;;  %v4370_v18 = vsel %vm4337_vm3, %v4367_v9, %v4369_v49  ;;  %v4372_v11 = vsel %vm4337_vm3, %v4369_v49, %v4371_v52  ;;  %v4284_v51 = vmax.f32 %v4248_v57, 0.0  ;;  %v4283_v20 = vmax.f32 %v4247_v58, 0.0 }
 0x2b2   : > { %9250 = vmatpush3.bf16.msra.mxu1 %v10700_v27  ;;  %v8900_v26 = vpop.f32.mrb[22].mxu0  ;;  %v10806_v59 = vmax.f32 %v4280_v23, %v4370_v18  ;;  %v4461_v34 = vmax.f32 %v4281_v36, %v4372_v11  ;;  %v4538_v61 = vsel %vm4515_vm4, %v4535_v63, %v4537_v6  ;;  %v10810_v62 = vadd.f32 %v9355_v31, %v10706_v39 }
 0x2b3   : > { %9252 = vmatprep.subr.bf16.mxu1 %v10741_v42  ;;  %v4117_v54 = vpop.f32.mrb[23].mxu0  ;;  %v4249_v27 = vadd.f32 %v9356_v5, %v10706_v39  ;;  %v4627_v41 = vmax.f32 %v10770_v40, %v4538_v61  ;;  %v4375_v56 = vrot.slane %v4284_v51, 1  ;;  %v4373_v23 = vrot.slane %v4283_v20, 1 }
 0x2b4   : > { %v4541_v32 = vrot.slane %v10806_v59, 2  ;;  %v4543_v60 = vrot.slane %v4461_v34, 2  ;;  %v4689_v55 = vld [vmem:[#allocation5 + $0x24] ss:$2 sm:$0xff]  ;;  %v4286_v16 = vmax.f32 %v10810_v62, 0.0  ;;  %v9357_v12 = vadd.f32 %v8900_v26, %v10608_v4 }
 0x2b5   : > { %v4285_v3 = vmax.f32 %v4249_v27, 0.0  ;;  %4690 = vst.msk [vmem:[#allocation3 + $0x15] sm:$0xff] %vm321_vm2, %v4689_v55  ;;  %4661 = vst.msk [vmem:[#allocation5 + $0x50] sm:$0xff] %vm321_vm2, %v4627_v41  ;;  %v9358_v40 = vadd.f32 %v4117_v54, %v10610_v8  ;;  %v4374_v9 = vsel %vm4337_vm3, %v4371_v52, %v4373_v23  ;;  %v4376_v38 = vsel %vm4337_vm3, %v4373_v23, %v4375_v56 }
 0x2b6   : > { %v8903_v13 = vpop.f32.mrb[24].mxu0  ;;  %v4544_v14 = vsel %vm4515_vm4, %v4541_v32, %v4543_v60  ;;  %v4462_v36 = vmax.f32 %v4282_v15, %v4374_v9  ;;  %v10823_v53 = vmax.f32 %v4283_v20, %v4376_v38  ;;  %v4379_v0 = vrot.slane %v4286_v16, 1 }
 0x2b7   : > { %v4127_v46 = vpop.f32.mrb[25].mxu0  ;;  %v4630_v63 = vmax.f32 %v4458_v50, %v4544_v14  ;;  %v4377_v44 = vrot.slane %v4285_v3, 1  ;;  %v4252_v45 = vadd.f32 %v9357_v12, %v10706_v39  ;;  %v4251_v7 = vadd.f32 %v9358_v40, %v10706_v39 }
 0x2b8   : > { %v9359_v4 = vadd.f32 %v8903_v13, %v10614_v19  ;;  %v9360_v8 = vadd.f32 %v4127_v46, %v10616_v24  ;;  %v4545_v37 = vrot.slane %v4462_v36, 2  ;;  %v4547_v25 = vrot.slane %v10823_v53, 2 }
 0x2b9   : > { %4664 = vst.msk [vmem:[#allocation5 + $0x68] sm:$0xff] %vm321_vm2, %v4630_v63  ;;  %v4378_v15 = vsel %vm4337_vm3, %v4375_v56, %v4377_v44  ;;  %v4380_v33 = vsel %vm4337_vm3, %v4377_v44, %v4379_v0  ;;  %v4288_v57 = vmax.f32 %v4252_v45, 0.0  ;;  %v4287_v58 = vmax.f32 %v4251_v7, 0.0 }
 0x2ba   : > { %v8906_v21 = vpop.f32.mrb[26].mxu0  ;;  %v10833_v52 = vmax.f32 %v4284_v51, %v4378_v15  ;;  %v4465_v49 = vmax.f32 %v4285_v3, %v4380_v33  ;;  %v4546_v31 = vsel %vm4515_vm4, %v4543_v60, %v4545_v37  ;;  %v4548_v19 = vsel %vm4515_vm4, %v4545_v37, %v4547_v25 }
 0x2bb   : > { %v4137_v50 = vpop.f32.mrb[27].mxu0  ;;  %v10838_v24 = vadd.f32 %v9359_v4, %v10706_v39  ;;  %v4253_v5 = vadd.f32 %v9360_v8, %v10706_v39  ;;  %v4631_v18 = vmax.f32 %v10794_v28, %v4546_v31  ;;  %v4632_v11 = vmax.f32 %v10806_v59, %v4548_v19 }
 0x2bc   : > { %v4723_v6 = vld [vmem:[#allocation3 + $0x11] sm:$0xff]  ;;  %v4551_v26 = vrot.slane %v4465_v49, 2  ;;  %v4383_v20 = vrot.slane %v4288_v57, 1  ;;  %v4381_v54 = vrot.slane %v4287_v58, 1  ;;  %v9361_v28 = vadd.f32 %v8906_v21, %v10620_v35 }
 0x2bd   : > { %8926 = vmatprep.mubr.msk.f32.mxu1 %vm321_vm2, %v4723_v6  ;;  %v4692_v51 = vld [vmem:[#allocation5 + $0x48] ss:$2 sm:$0xff]  ;;  %v4290_v61 = vmax.f32 %v10838_v24, 0.0  ;;  %v4289_v62 = vmax.f32 %v4253_v5, 0.0  ;;  %4665 = vst.msk [vmem:[#allocation5 + $0x70] sm:$0xff] %vm321_vm2, %v4631_v18  ;;  %4666 = vst.msk [vmem:[#allocation5 + $0x78] sm:$0xff] %vm321_vm2, %v4632_v11  ;;  %v9362_v59 = vadd.f32 %v4137_v50, %v10622_v47 }
 0x2be   : > { %v8909_v34 = vpop.f32.mrb[28].mxu0  ;;  %4693 = vst.msk [vmem:[#allocation3 + $0x1f] sm:$0xff] %vm321_vm2, %v4692_v51  ;;  %v4382_v41 = vsel %vm4337_vm3, %v4379_v0, %v4381_v54  ;;  %v4384_v32 = vsel %vm4337_vm3, %v4381_v54, %v4383_v20  ;;  %v4256_v13 = vadd.f32 %v9361_v28, %v10706_v39 }
 0x2bf   : > { %v4147_v27 = vpop.f32.mrb[29].mxu0  ;;  %v4466_v60 = vmax.f32 %v4286_v16, %v4382_v41  ;;  %v10852_v55 = vmax.f32 %v4287_v58, %v4384_v32  ;;  %v4387_v56 = vrot.slane %v4290_v61, 1  ;;  %v4385_v23 = vrot.slane %v4289_v62, 1 }
 0x2c0   : > { %v4255_v14 = vadd.f32 %v9362_v59, %v10706_v39  ;;  %v9363_v12 = vadd.f32 %v8909_v34, %v10626_v43  ;;  %v9364_v35 = vadd.f32 %v4147_v27, %v10628_v2  ;;  %v4292_v36 = vmax.f32 %v4256_v13, 0.0 }
 0x2c1   : > { %v4553_v47 = vrot.slane %v4466_v60, 2  ;;  %v4555_v46 = vrot.slane %v10852_v55, 2  ;;  %v4386_v63 = vsel %vm4337_vm3, %v4383_v20, %v4385_v23  ;;  %v4388_v16 = vsel %vm4337_vm3, %v4385_v23, %v4387_v56 }
 0x2c2   : > { %v8912_v3 = vpop.f32.mrb[30].mxu0  ;;  %v10861_v9 = vmax.f32 %v4288_v57, %v4386_v63  ;;  %v10863_v38 = vmax.f32 %v4289_v62, %v4388_v16  ;;  %v4291_v0 = vmax.f32 %v4255_v14, 0.0  ;;  %v10868_v2 = vadd.f32 %v9363_v12, %v10706_v39 }
 0x2c3   : > { %v4157_v40 = vpop.f32.mrb[31].mxu0  ;;  %v4554_v44 = vsel %vm4515_vm4, %v4551_v26, %v4553_v47  ;;  %v4556_v43 = vsel %vm4515_vm4, %v4553_v47, %v4555_v46  ;;  %v4257_v45 = vadd.f32 %v9364_v35, %v10706_v39  ;;  %v4391_v50 = vrot.slane %v4292_v36, 1 }
 0x2c4   : > { %v4635_v21 = vmax.f32 %v10823_v53, %v4554_v44  ;;  %v4636_v37 = vmax.f32 %v10833_v52, %v4556_v43  ;;  %v4559_v25 = vrot.slane %v10863_v38, 2  ;;  %v4695_v33 = vld [vmem:[#allocation5 + $0x6c] ss:$2 sm:$0xff]  ;;  %v4389_v49 = vrot.slane %v4291_v0, 1 }
 0x2c5   : > { %v4724_v7 = vld [vmem:[#allocation3 + $0x19] sm:$0xff]  ;;  %v4725_v4 = vld [vmem:[#allocation3 + $0x21] sm:$0xff]  ;;  %v4294_v57 = vmax.f32 %v10868_v2, 0.0  ;;  %v4293_v58 = vmax.f32 %v4257_v45, 0.0  ;;  %4696 = vst.msk [vmem:[#allocation3 + $0x29] sm:$0xff] %vm321_vm2, %v4695_v33  ;;  %v9365_v53 = vadd.f32 %v8912_v3, %v10632_v10  ;;  %v9366_v52 = vadd.f32 %v4157_v40, %v10634_v17 }
 0x2c6   : > { %v8915_v8 = vpop.f32.mrb[32].mxu0  ;;  %8927 = vmatmul.mubr.msk.f32.gmra.mrb[38].mxu1 %vm321_vm2, %v4724_v7  ;;  %4669 = vst.msk [vmem:[#allocation5 + $0x90] sm:$0xff] %vm321_vm2, %v4635_v21  ;;  %4670 = vst.msk [vmem:[#allocation5 + $0x98] sm:$0xff] %vm321_vm2, %v4636_v37  ;;  %v4390_v31 = vsel %vm4337_vm3, %v4387_v56, %v4389_v49  ;;  %v4392_v19 = vsel %vm4337_vm3, %v4389_v49, %v4391_v50 }
 0x2c7   : > { %v4167_v15 = vpop.f32.mrb[33].mxu0  ;;  %8929 = vmatprep.mubr.msk.f32.mxu1 %vm321_vm2, %v4725_v4  ;;  %v4470_v5 = vmax.f32 %v4290_v61, %v4390_v31  ;;  %v4471_v6 = vmax.f32 %v4291_v0, %v4392_v19  ;;  %v4395_v18 = vrot.slane %v4294_v57, 1  ;;  %v4393_v11 = vrot.slane %v4293_v58, 1 }
 0x2c8   : > { %v4260_v34 = vadd.f32 %v9365_v53, %v10706_v39  ;;  %v4259_v51 = vadd.f32 %v9366_v52, %v10706_v39  ;;  %v9367_v20 = vadd.f32 %v8915_v8, %v10638_v48  ;;  %v9368_v10 = vadd.f32 %v4167_v15, %v10640_v22 }
 0x2c9   : > { %v4561_v54 = vrot.slane %v4470_v5, 2  ;;  %v4563_v17 = vrot.slane %v4471_v6, 2  ;;  %v4394_v62 = vsel %vm4337_vm3, %v4391_v50, %v4393_v11  ;;  %v4396_v27 = vsel %vm4337_vm3, %v4393_v11, %v4395_v18 }
 0x2ca   : > { %v8918_v24 = vpop.f32.mrb[34].mxu0  ;;  %v4472_v28 = vmax.f32 %v4292_v36, %v4394_v62  ;;  %v4473_v61 = vmax.f32 %v4293_v58, %v4396_v27  ;;  %v4296_v59 = vmax.f32 %v4260_v34, 0.0  ;;  %v4295_v41 = vmax.f32 %v4259_v51, 0.0 }
 0x2cb   : > { %v4177_v26 = vpop.f32.mrb[35].mxu0  ;;  %v4562_v32 = vsel %vm4515_vm4, %v4559_v25, %v4561_v54  ;;  %v4564_v60 = vsel %vm4515_vm4, %v4561_v54, %v4563_v17  ;;  %v4262_v56 = vadd.f32 %v9367_v20, %v10706_v39  ;;  %v4261_v48 = vadd.f32 %v9368_v10, %v10706_v39 }
 0x2cc   : > { %v4726_v23 = vld [vmem:[#allocation3 + $0x29] sm:$0xff]  ;;  %v4639_v22 = vmax.f32 %v10852_v55, %v4562_v32  ;;  %v4640_v3 = vmax.f32 %v10861_v9, %v4564_v60  ;;  %v4565_v13 = vrot.slane %v4472_v28, 2  ;;  %v4399_v12 = vrot.slane %v4296_v59, 1 }
 0x2cd   : > { %8930 = vmatmul.mubr.msk.f32.gmra.mrb[40].mxu1 %vm321_vm2, %v4726_v23  ;;  %v4698_v14 = vld [vmem:[#allocation5 + $0x90] ss:$2 sm:$0xff]  ;;  %v4397_v35 = vrot.slane %v4295_v41, 1  ;;  %v4298_v40 = vmax.f32 %v4262_v56, 0.0  ;;  %v4297_v47 = vmax.f32 %v4261_v48, 0.0  ;;  %v9369_v55 = vadd.f32 %v8918_v24, %v10644_v29  ;;  %v7774_v32 = vld [vmem:[%s11359_s3 + $0x38] sm:$0xff] }
 0x2ce   : > { %4699 = vst.msk [vmem:[#allocation3 + $0x33] sm:$0xff] %vm321_vm2, %v4698_v14  ;;  %4673 = vst.msk [vmem:[#allocation5 + $0xb0] sm:$0xff] %vm321_vm2, %v4639_v22  ;;  %v4566_v46 = vsel %vm4515_vm4, %v4563_v17, %v4565_v13  ;;  %v9370_v63 = vadd.f32 %v4177_v26, %v10646_v30  ;;  %v4710_v56 = vld [vmem:[#allocation3 + $0x8] sm:$0xff]  ;;  %v4711_v48 = vld [vmem:[#allocation3 + $0x10] sm:$0xff] }
 0x2cf   : > { %4674 = vst.msk [vmem:[#allocation5 + $0xb8] sm:$0xff] %vm321_vm2, %v4640_v3  ;;  %v4641_v16 = vmax.f32 %v10863_v38, %v4566_v46  ;;  %v4398_v9 = vsel %vm4337_vm3, %v4395_v18, %v4397_v35  ;;  %v4400_v36 = vsel %vm4337_vm3, %v4397_v35, %v4399_v12  ;;  %v4403_v43 = vrot.slane %v4298_v40, 1  ;;  %v4712_v23 = vld [vmem:[#allocation3 + $0x18] sm:$0xff]  ;;  %v4713_v22 = vld [vmem:[#allocation3 + $0x20] sm:$0xff]  ;;  %v4714_v3 = vld [vmem:[#allocation3 + $0x28] sm:$0xff] }
 0x2d0   : > { %v4474_v0 = vmax.f32 %v4294_v57, %v4398_v9  ;;  %v4475_v44 = vmax.f32 %v4295_v41, %v4400_v36  ;;  %v4401_v2 = vrot.slane %v4297_v47, 1  ;;  %v4264_v45 = vadd.f32 %v9369_v55, %v10706_v39  ;;  %v7773_v41 = vld [vmem:[%s11359_s3 + $0x30] sm:$0xff]  ;;  %v5025_v55 = vld [vmem:[#allocation3 + $0xa] sm:$0xff] }
 0x2d1   : > { %4675 = vst.msk [vmem:[#allocation5 + $0xc0] sm:$0xff] %vm321_vm2, %v4641_v16  ;;  %v4263_v7 = vadd.f32 %v9370_v63, %v10706_v39  ;;  %v9255_v60 = vpack.c.bf16 %v7774_v32, %v7773_v41  ;;  %v5026_v63 = vld [vmem:[#allocation3 + $0x12] sm:$0xff]  ;;  %v5027_v16 = vld [vmem:[#allocation3 + $0x1a] sm:$0xff]  ;;  %v5028_v9 = vld [vmem:[#allocation3 + $0x22] sm:$0xff] }
 0x2d2   : > { %v4569_v4 = vrot.slane %v4474_v0, 2  ;;  %v4571_v29 = vrot.slane %v4475_v44, 2  ;;  %v4402_v30 = vsel %vm4337_vm3, %v4399_v12, %v4401_v2  ;;  %v4404_v38 = vsel %vm4337_vm3, %v4401_v2, %v4403_v43  ;;  %v5029_v36 = vld [vmem:[#allocation3 + $0x2a] sm:$0xff] }
 0x2d3   : > { %v4476_v8 = vmax.f32 %v4296_v59, %v4402_v30  ;;  %v4477_v21 = vmax.f32 %v4297_v47, %v4404_v38  ;;  %v4300_v37 = vmax.f32 %v4264_v45, 0.0  ;;  %v4299_v25 = vmax.f32 %v4263_v7, 0.0  ;;  %v4709_v59 = vld [vmem:[#allocation3] sm:$0xff]  ;;  %v7786_v47 = vld [vmem:[%s11359_s3 + $0x48] sm:$0xff]  ;;  %v7798_v7 = vld [vmem:[%s11359_s3 + $0x58] sm:$0xff] }
 0x2d4   : > { %v4572_v15 = vsel %vm4515_vm4, %v4569_v4, %v4571_v29  ;;  %v7797_v45 = vld [vmem:[%s11359_s3 + $0x50] sm:$0xff]  ;;  %v7809_v30 = vld [vmem:[%s11359_s3 + $0x60] sm:$0xff]  ;;  %v7810_v38 = vld [vmem:[%s11359_s3 + $0x68] sm:$0xff] }
 0x2d5   : > { %v4727_v33 = vld [vmem:[#allocation3 + $0x31] sm:$0xff]  ;;  %v4644_v50 = vmax.f32 %v4472_v28, %v4572_v15  ;;  %v4573_v49 = vrot.slane %v4476_v8, 2  ;;  %v4407_v57 = vrot.slane %v4300_v37, 1  ;;  %v4405_v58 = vrot.slane %v4299_v25, 1  ;;  %v5363_v15 = vld [vmem:[#allocation3 + $0x23] sm:$0xff] }
 0x2d6   : > { %8932 = vmatprep.mubr.msk.f32.mxu1 %vm321_vm2, %v4727_v33  ;;  %v4715_v13 = vld [vmem:[#allocation3 + $0x30] sm:$0xff]  ;;  %v9263_v4 = vpack.c.bf16 %v7798_v7, %v7797_v45 }
 0x2d7   : > { %4678 = vst.msk [vmem:[#allocation5 + $0xd8] sm:$0xff] %vm321_vm2, %v4644_v50  ;;  %v4574_v39 = vsel %vm4515_vm4, %v4571_v29, %v4573_v49  ;;  %v4480_v52 = vmax.f32 %v4300_v37, %v4407_v57  ;;  %v4406_v31 = vsel %vm4337_vm3, %v4403_v43, %v4405_v58  ;;  %v4408_v24 = vsel %vm4337_vm3, %v4405_v58, %v4407_v57  ;;  %v5030_v0 = vld [vmem:[#allocation3 + $0x32] sm:$0xff] }
 0x2d8   : > { %v4645_v53 = vmax.f32 %v4473_v61, %v4574_v39  ;;  %v4701_v19 = vld [vmem:[#allocation5 + $0xb4] ss:$2 sm:$0xff]  ;;  %v4478_v5 = vmax.f32 %v4298_v40, %v4406_v31  ;;  %v4479_v18 = vmax.f32 %v4299_v25, %v4408_v24  ;;  %v5364_v33 = vld [vmem:[#allocation3 + $0x2b] sm:$0xff] }
 0x2d9   : > { %4702 = vst.msk [vmem:[#allocation3 + $0x3d] sm:$0xff] %vm321_vm2, %v4701_v19  ;;  %v4581_v6 = vrot.slane %v4480_v52, 2  ;;  %v7785_v40 = vld [vmem:[%s11359_s3 + $0x40] sm:$0xff]  ;;  %v5362_v25 = vld [vmem:[#allocation3 + $0x1b] sm:$0xff]  ;;  %v7822_v52 = vld [vmem:[%s11359_s3 + $0x78] sm:$0xff] }
 0x2da   : > { %4679 = vst.msk [vmem:[#allocation5 + $0xe0] sm:$0xff] %vm321_vm2, %v4645_v53  ;;  %v4577_v11 = vrot.slane %v4478_v5, 2  ;;  %v4579_v26 = vrot.slane %v4479_v18, 2  ;;  %v9259_v46 = vpack.c.bf16 %v7786_v47, %v7785_v40  ;;  %v5361_v37 = vld [vmem:[#allocation3 + $0x13] sm:$0xff]  ;;  %v7821_v53 = vld [vmem:[%s11359_s3 + $0x70] sm:$0xff] }
 0x2db   : > { %v4650_v34 = vmax.f32 %v4478_v5, %v4581_v6  ;;  %v5365_v50 = vld [vmem:[#allocation3 + $0x33] sm:$0xff]  ;;  %v9271_v19 = vpack.c.bf16 %v7822_v52, %v7821_v53  ;;  %v5530_v5 = vld [vmem:[#allocation3 + $0x1c] sm:$0xff] }
 0x2dc   : > { %v4580_v51 = vsel %vm4515_vm4, %v4577_v11, %v4579_v26  ;;  %v4582_v20 = vsel %vm4515_vm4, %v4579_v26, %v4581_v6  ;;  %v5528_v31 = vld [vmem:[#allocation3 + $0xc] sm:$0xff]  ;;  %v5529_v24 = vld [vmem:[#allocation3 + $0x14] sm:$0xff]  ;;  %v5531_v6 = vld [vmem:[#allocation3 + $0x24] sm:$0xff] }
 0x2dd   : > { %4685 = vst.msk [vmem:[#allocation5 + $0x108] sm:$0x1f] %vm4684_vm5, %v4650_v34  ;;  %v4648_v10 = vmax.f32 %v4476_v8, %v4580_v51  ;;  %v4649_v54 = vmax.f32 %v4477_v21, %v4582_v20  ;;  %v5360_v8 = vld [vmem:[#allocation3 + $0xb] sm:$0xff]  ;;  %v9267_v21 = vpack.c.bf16 %v7810_v38, %v7809_v30  ;;  %v5533_v11 = vld [vmem:[#allocation3 + $0x34] sm:$0xff] }
 0x2de   : > { %v5532_v18 = vld [vmem:[#allocation3 + $0x2c] sm:$0xff]  ;;  %v5868_v41 = vld [vmem:[#allocation3 + $0x35] sm:$0xff] }
 0x2df   : > { %4682 = vst.msk [vmem:[#allocation5 + $0xf8] sm:$0xff] %vm321_vm2, %v4648_v10  ;;  %4683 = vst.msk [vmem:[#allocation5 + $0x100] sm:$0xff] %vm321_vm2, %v4649_v54  ;;  %v7833_v10 = vld [vmem:[%s11359_s3 + $0x80] sm:$0xff]  ;;  %v7834_v54 = vld [vmem:[%s11359_s3 + $0x88] sm:$0xff] }
 0x2e0   : > { %v4728_v17 = vld [vmem:[#allocation3 + $0x39] sm:$0xff] }
 0x2e1   : > { %8933 = vmatmul.mubr.msk.f32.gmra.mrb[42].mxu1 %vm321_vm2, %v4728_v17  ;;  %v4704_v62 = vld [vmem:[#allocation5 + $0xd8] ss:$2 sm:$0xff]  ;;  %v9275_v17 = vpack.c.bf16 %v7834_v54, %v7833_v10 }
 0x2e2   : > { %4705 = vst.msk [vmem:[#allocation3 + $0x47] sm:$0xff] %vm321_vm2, %v4704_v62  ;;  %v4716_v14 = vld [vmem:[#allocation3 + $0x38] sm:$0xff] }
 0x2e3   : > { %v5031_v44 = vld [vmem:[#allocation3 + $0x3a] sm:$0xff] }
 0x2e4   : > { %v5366_v49 = vld [vmem:[#allocation3 + $0x3b] sm:$0xff] }
 0x2e5   : > { %v5534_v26 = vld [vmem:[#allocation3 + $0x3c] sm:$0xff] }
 0x2e6   : > { %v4707_v27 = vld [vmem:[#allocation5 + $0xfc] ss:$2 sm:$0xff] }
 0x2e7   : > { %4708 = vst.msk [vmem:[#allocation3 + $0x51] sm:$0xff] %vm321_vm2, %v4707_v27  ;;  %v5705_v62 = vld [vmem:[#allocation3 + $0x5c] sm:$0xff] }
 0x2e8   : > { %v5864_v27 = vld [vmem:[#allocation3 + $0x15] sm:$0xff]  ;;  %v5869_v32 = vld [vmem:[#allocation3 + $0x3d] sm:$0xff] }
 0x2e9   : > { %v4729_v28 = vld [vmem:[#allocation3 + $0x41] sm:$0xff]  ;;  %v4730_v61 = vld [vmem:[#allocation3 + $0x49] sm:$0xff] }
 0x2ea   : > { %8935 = vmatprep.mubr.msk.f32.mxu1 %vm321_vm2, %v4729_v28  ;;  %v4717_v12 = vld [vmem:[#allocation3 + $0x40] sm:$0xff]  ;;  %v4718_v35 = vld [vmem:[#allocation3 + $0x48] sm:$0xff] }
 0x2eb   : > { %8936 = vmatmul.mubr.msk.f32.gmra.mrb[44].mxu1 %vm321_vm2, %v4730_v61  ;;  %v5032_v43 = vld [vmem:[#allocation3 + $0x42] sm:$0xff] }
 0x2ec   : > { %8942 = vmatprep.mubr.msk.f32.mxu1 %vm321_vm2, %v4709_v59  ;;  %v5367_v57 = vld [vmem:[#allocation3 + $0x43] sm:$0xff]  ;;  %v5867_v59 = vld [vmem:[#allocation3 + $0x2d] sm:$0xff] }
 0x2ed   : > { %v5535_v34 = vld [vmem:[#allocation3 + $0x44] sm:$0xff] }
 0x2ee   : > { %v5033_v2 = vld [vmem:[#allocation3 + $0x4a] sm:$0xff]  ;;  %v5201_v29 = vld [vmem:[#allocation3 + $0x52] sm:$0xff]  ;;  %v5865_v28 = vld [vmem:[#allocation3 + $0x1d] sm:$0xff] }
 0x2ef   : > { %8943 = vmatmul.mubr.msk.f32.vlgmr.msra.gmra.mrb[36].mxu1 %vm321_vm2, %v4710_v56  ;;  %v5368_v58 = vld [vmem:[#allocation3 + $0x4b] sm:$0xff]  ;;  %v5369_v39 = vld [vmem:[#allocation3 + $0x53] sm:$0xff] }
 0x2f0   : > { %9254 = vmatpush3.bf16.msra.mxu1 %v10741_v42  ;;  %8945 = vmatprep.mubr.msk.f32.mxu1 %vm321_vm2, %v4711_v48  ;;  %v5024_v42 = vld [vmem:[#allocation3 + $0x2] sm:$0xff]  ;;  %v5536_v51 = vld [vmem:[#allocation3 + $0x4c] sm:$0xff]  ;;  %v5537_v20 = vld [vmem:[#allocation3 + $0x54] sm:$0xff] }
 0x2f1   : > { %9256 = vmatprep.subr.bf16.mxu1 %v9255_v60  ;;  %v5866_v61 = vld [vmem:[#allocation3 + $0x25] sm:$0xff]  ;;  %v5871_v56 = vld [vmem:[#allocation3 + $0x4d] sm:$0xff]  ;;  %v5872_v48 = vld [vmem:[#allocation3 + $0x55] sm:$0xff] }
 0x2f2   : > { %v6039_v40 = vld [vmem:[#allocation3 + $0x4e] sm:$0xff]  ;;  %v6040_v47 = vld [vmem:[#allocation3 + $0x56] sm:$0xff] }
 0x2f3   : > { %8946 = vmatmul.mubr.msk.f32.gmra.mrb[38].mxu1 %vm321_vm2, %v4712_v23  ;;  %v5873_v23 = vld [vmem:[#allocation3 + $0x5d] sm:$0xff] }
 0x2f4   : > { %8948 = vmatprep.mubr.msk.f32.mxu1 %vm321_vm2, %v4713_v22  ;;  %v6032_v22 = vld [vmem:[#allocation3 + $0x16] sm:$0xff] }
 0x2f7   : > { %8949 = vmatmul.mubr.msk.f32.gmra.mrb[40].mxu1 %vm321_vm2, %v4714_v3  ;;  %v6033_v3 = vld [vmem:[#allocation3 + $0x1e] sm:$0xff] }
 0x2f8   : > { %8951 = vmatprep.mubr.msk.f32.mxu1 %vm321_vm2, %v4715_v13  ;;  %v6034_v13 = vld [vmem:[#allocation3 + $0x26] sm:$0xff] }
 0x2fb   : > { %8952 = vmatmul.mubr.msk.f32.gmra.mrb[42].mxu1 %vm321_vm2, %v4716_v14  ;;  %v6035_v14 = vld [vmem:[#allocation3 + $0x2e] sm:$0xff] }
 0x2fc   : > { %8954 = vmatprep.mubr.msk.f32.mxu1 %vm321_vm2, %v4717_v12  ;;  %v6036_v12 = vld [vmem:[#allocation3 + $0x36] sm:$0xff] }
 0x2ff   : > { %8955 = vmatmul.mubr.msk.f32.gmra.mrb[44].mxu1 %vm321_vm2, %v4718_v35  ;;  %v6038_v35 = vld [vmem:[#allocation3 + $0x46] sm:$0xff] }
 0x300   : > { %8961 = vmatprep.mubr.msk.f32.mxu1 %vm321_vm2, %v5024_v42  ;;  %v6037_v42 = vld [vmem:[#allocation3 + $0x3e] sm:$0xff] }
 0x303   : > { %8962 = vmatmul.mubr.msk.f32.vlgmr.msra.gmra.mrb[36].mxu1 %vm321_vm2, %v5025_v55 }
 0x304   : > { %9258 = vmatpush3.bf16.msra.mxu1 %v9255_v60  ;;  %8964 = vmatprep.mubr.msk.f32.mxu1 %vm321_vm2, %v5026_v63  ;;  %v5870_v60 = vld [vmem:[#allocation3 + $0x45] sm:$0xff] }
 0x305   : > { %9260 = vmatprep.subr.bf16.mxu1 %v9259_v46 }
 0x307   : > { %8965 = vmatmul.mubr.msk.f32.gmra.mrb[38].mxu1 %vm321_vm2, %v5027_v16 }
 0x308   : > { %8967 = vmatprep.mubr.msk.f32.mxu1 %vm321_vm2, %v5028_v9 }
 0x30b   : > { %8968 = vmatmul.mubr.msk.f32.gmra.mrb[40].mxu1 %vm321_vm2, %v5029_v36 }
 0x30c   : > { %8970 = vmatprep.mubr.msk.f32.mxu1 %vm321_vm2, %v5030_v0 }
 0x30f   : > { %8971 = vmatmul.mubr.msk.f32.gmra.mrb[42].mxu1 %vm321_vm2, %v5031_v44 }
 0x310   : > { %8973 = vmatprep.mubr.msk.f32.mxu1 %vm321_vm2, %v5032_v43 }
 0x313   : > { %8974 = vmatmul.mubr.msk.f32.gmra.mrb[44].mxu1 %vm321_vm2, %v5033_v2 }
 0x314   : > { %8980 = vmatprep.mubr.msk.f32.mxu1 %vm321_vm2, %v5025_v55  ;;  %v7846_v55 = vld [vmem:[%s11361_s5 + $0x20] sm:$0xff] }
 0x317   : > { %8981 = vmatmul.mubr.msk.f32.vlgmr.msra.gmra.mrb[36].mxu1 %vm321_vm2, %v5026_v63  ;;  %v7847_v63 = vld [vmem:[%s11361_s5 + $0x28] sm:$0xff] }
 0x318   : > { %9262 = vmatpush3.bf16.msra.mxu1 %v9259_v46  ;;  %8983 = vmatprep.mubr.msk.f32.mxu1 %vm321_vm2, %v5027_v16  ;;  %v6041_v46 = vld [vmem:[#allocation3 + $0x5e] sm:$0xff] }
 0x319   : > { %9264 = vmatprep.subr.bf16.mxu1 %v9263_v4  ;;  %v7848_v16 = vld [vmem:[%s11361_s5 + $0x30] sm:$0xff] }
 0x31b   : > { %8984 = vmatmul.mubr.msk.f32.gmra.mrb[38].mxu1 %vm321_vm2, %v5028_v9  ;;  %v9810_v9 = vmov 0.0|0.0  }
 0x31c   : > { %8986 = vmatprep.mubr.msk.f32.mxu1 %vm321_vm2, %v5029_v36  ;;  %v9280_v36 = vpack.c.bf16 %v7847_v63, %v7846_v55 }
 0x31f   : > { %8987 = vmatmul.mubr.msk.f32.gmra.mrb[40].mxu1 %vm321_vm2, %v5030_v0  ;;  %v7849_v0 = vld [vmem:[%s11361_s5 + $0x38] sm:$0xff] }
 0x320   : > { %8989 = vmatprep.mubr.msk.f32.mxu1 %vm321_vm2, %v5031_v44  ;;  %v9283_v44 = vpack.c.bf16 %v7849_v0, %v7848_v16 }
 0x323   : > { %8990 = vmatmul.mubr.msk.f32.gmra.mrb[42].mxu1 %vm321_vm2, %v5032_v43  ;;  %v7845_v43 = vld [vmem:[%s11360_s4] ss:$0 sm:$0xff] }
 0x324   : > { %8992 = vmatprep.mubr.msk.f32.mxu1 %vm321_vm2, %v5033_v2 }
 0x327   : > { %8993 = vmatmul.mubr.msk.f32.gmra.mrb[44].mxu1 %vm321_vm2, %v5201_v29 }
 0x328   : > { %8999 = vmatprep.mubr.msk.f32.mxu1 %vm321_vm2, %v5360_v8 }
 0x32b   : > { %9000 = vmatmul.mubr.msk.f32.vlgmr.msra.gmra.mrb[36].mxu1 %vm321_vm2, %v5361_v37 }
 0x32c   : > { %9266 = vmatpush3.bf16.msra.mxu1 %v9263_v4  ;;  %9002 = vmatprep.mubr.msk.f32.mxu1 %vm321_vm2, %v5362_v25 }
 0x32d   : > { %9268 = vmatprep.subr.bf16.mxu1 %v9267_v21 }
 0x32f   : > { %9003 = vmatmul.mubr.msk.f32.gmra.mrb[38].mxu1 %vm321_vm2, %v5363_v15 }
 0x330   : > { %9005 = vmatprep.mubr.msk.f32.mxu1 %vm321_vm2, %v5364_v33 }
 0x333   : > { %9006 = vmatmul.mubr.msk.f32.gmra.mrb[40].mxu1 %vm321_vm2, %v5365_v50 }
 0x334   : > { %9008 = vmatprep.mubr.msk.f32.mxu1 %vm321_vm2, %v5366_v49 }
 0x337   : > { %9009 = vmatmul.mubr.msk.f32.gmra.mrb[42].mxu1 %vm321_vm2, %v5367_v57 }
 0x338   : > { %9011 = vmatprep.mubr.msk.f32.mxu1 %vm321_vm2, %v5368_v58 }
 0x33b   : > { %9012 = vmatmul.mubr.msk.f32.gmra.mrb[44].mxu1 %vm321_vm2, %v5369_v39 }
 0x33c   : > { %9018 = vmatprep.mubr.msk.f32.mxu1 %vm321_vm2, %v5528_v31 }
 0x33f   : > { %9019 = vmatmul.mubr.msk.f32.vlgmr.msra.gmra.mrb[36].mxu1 %vm321_vm2, %v5529_v24 }
 0x340   : > { %9270 = vmatpush3.bf16.msra.mxu1 %v9267_v21  ;;  %9021 = vmatprep.mubr.msk.f32.mxu1 %vm321_vm2, %v5530_v5 }
 0x341   : > { %9272 = vmatprep.subr.bf16.mxu1 %v9271_v19 }
 0x343   : > { %9022 = vmatmul.mubr.msk.f32.gmra.mrb[38].mxu1 %vm321_vm2, %v5531_v6 }
 0x344   : > { %9024 = vmatprep.mubr.msk.f32.mxu1 %vm321_vm2, %v5532_v18 }
 0x347   : > { %9025 = vmatmul.mubr.msk.f32.gmra.mrb[40].mxu1 %vm321_vm2, %v5533_v11 }
 0x348   : > { %9027 = vmatprep.mubr.msk.f32.mxu1 %vm321_vm2, %v5534_v26 }
 0x34b   : > { %9028 = vmatmul.mubr.msk.f32.gmra.mrb[42].mxu1 %vm321_vm2, %v5535_v34 }
 0x34c   : > { %9030 = vmatprep.mubr.msk.f32.mxu1 %vm321_vm2, %v5536_v51 }
 0x34f   : > { %9031 = vmatmul.mubr.msk.f32.gmra.mrb[44].mxu1 %vm321_vm2, %v5537_v20 }
 0x350   : > { %9037 = vmatprep.mubr.msk.f32.mxu1 %vm321_vm2, %v5529_v24 }
 0x353   : > { %9038 = vmatmul.mubr.msk.f32.vlgmr.msra.gmra.mrb[36].mxu1 %vm321_vm2, %v5530_v5 }
 0x354   : > { %9274 = vmatpush3.bf16.msra.mxu1 %v9271_v19  ;;  %9040 = vmatprep.mubr.msk.f32.mxu1 %vm321_vm2, %v5531_v6 }
 0x355   : > { %9276 = vmatprep.subr.bf16.mxu1 %v9275_v17 }
 0x357   : > { %9041 = vmatmul.mubr.msk.f32.gmra.mrb[38].mxu1 %vm321_vm2, %v5532_v18 }
 0x358   : > { %9043 = vmatprep.mubr.msk.f32.mxu1 %vm321_vm2, %v5533_v11 }
 0x35b   : > { %9044 = vmatmul.mubr.msk.f32.gmra.mrb[40].mxu1 %vm321_vm2, %v5534_v26 }
 0x35c   : > { %9046 = vmatprep.mubr.msk.f32.mxu1 %vm321_vm2, %v5535_v34 }
 0x35f   : > { %9047 = vmatmul.mubr.msk.f32.gmra.mrb[42].mxu1 %vm321_vm2, %v5536_v51 }
 0x360   : > { %9049 = vmatprep.mubr.msk.f32.mxu1 %vm321_vm2, %v5537_v20 }
 0x363   : > { %9050 = vmatmul.mubr.msk.f32.gmra.mrb[44].mxu1 %vm321_vm2, %v5705_v62 }
 0x364   : > { %9056 = vmatprep.mubr.msk.f32.mxu1 %vm321_vm2, %v5864_v27 }
 0x367   : > { %9057 = vmatmul.mubr.msk.f32.vlgmr.msra.gmra.mrb[36].mxu1 %vm321_vm2, %v5865_v28 }
 0x368   : > { %9278 = vmatpush3.bf16.msra.mxu1 %v9275_v17  ;;  %9059 = vmatprep.mubr.msk.f32.mxu1 %vm321_vm2, %v5866_v61 }
 0x369   : > { %9279 = vmatprep.subr.bf16.mxu1 %v9810_v9 }
 0x36b   : > { %9060 = vmatmul.mubr.msk.f32.gmra.mrb[38].mxu1 %vm321_vm2, %v5867_v59 }
 0x36c   : > { %9062 = vmatprep.mubr.msk.f32.mxu1 %vm321_vm2, %v5868_v41 }
 0x36f   : > { %9063 = vmatmul.mubr.msk.f32.gmra.mrb[40].mxu1 %vm321_vm2, %v5869_v32 }
 0x370   : > { %9065 = vmatprep.mubr.msk.f32.mxu1 %vm321_vm2, %v5870_v60 }
 0x373   : > { %9066 = vmatmul.mubr.msk.f32.gmra.mrb[42].mxu1 %vm321_vm2, %v5871_v56 }
 0x374   : > { %9068 = vmatprep.mubr.msk.f32.mxu1 %vm321_vm2, %v5872_v48 }
 0x377   : > { %9069 = vmatmul.mubr.msk.f32.gmra.mrb[44].mxu1 %vm321_vm2, %v5873_v23 }
 0x378   : > { %9075 = vmatprep.mubr.msk.f32.mxu1 %vm321_vm2, %v6032_v22 }
 0x37b   : > { %9076 = vmatmul.mubr.msk.f32.vlgmr.msra.gmra.mrb[36].mxu1 %vm321_vm2, %v6033_v3 }
 0x37c   : > { %9078 = vmatprep.mubr.msk.f32.mxu1 %vm321_vm2, %v6034_v13  ;;  %9281 = vmatpush3.bf16.msra.mxu1 %v9280_v36 }
 0x37d   : > { %9282 = vmatprep.subr.bf16.mxu1 %v9810_v9 }
 0x37f   : > { %9079 = vmatmul.mubr.msk.f32.gmra.mrb[38].mxu1 %vm321_vm2, %v6035_v14 }
 0x380   : > { %9081 = vmatprep.mubr.msk.f32.mxu1 %vm321_vm2, %v6036_v12  ;;  %9284 = vmatpush3.bf16.msra.mxu1 %v9283_v44 }
 0x381   : > { %9285 = vmatprep.subr.bf16.mxu1 %v9810_v9 }
 0x383   : > { %9082 = vmatmul.mubr.msk.f32.gmra.mrb[40].mxu1 %vm321_vm2, %v6037_v42 }
 0x384   : > { %9084 = vmatprep.mubr.msk.f32.mxu1 %vm321_vm2, %v6038_v35 }
 0x387   : > { %9085 = vmatmul.mubr.msk.f32.gmra.mrb[42].mxu1 %vm321_vm2, %v6039_v40 }
 0x388   : > { %9087 = vmatprep.mubr.msk.f32.mxu1 %vm321_vm2, %v6040_v47 }
 0x38b   : > { %9088 = vmatmul.mubr.msk.f32.gmra.mrb[44].mxu1 %vm321_vm2, %v6041_v46 }
 0x38c   : > { %9098 = vmatprep.mubr.msk.f32.mxu1 %vm9811_vm7, %v9809_v1 }
 0x44e   : > { %v9077_v2 = vpop.f32.mrb[36].mxu1 }
 0x44f   : > { %v6208_v45 = vadd.f32 %v9077_v2, %v7845_v43  ;;  %v6141_v7 = vpop.f32.mrb[37].mxu1 }
 0x450   : > { %v6207_v4 = vadd.f32 %v7845_v43, %v6141_v7 }
 0x451   : > { %v6218_v29 = vmax.f32 %v6208_v45, 0.0 }
 0x452   : > { %v6217_v30 = vmax.f32 %v6207_v4, 0.0  ;;  %v9080_v38 = vpop.f32.mrb[38].mxu1 }
 0x453   : > { %v6238_v8 = vrot.slane %v6218_v29, 1  ;;  %v6210_v21 = vadd.f32 %v9080_v38, %v7845_v43  ;;  %v6151_v37 = vpop.f32.mrb[39].mxu1 }
 0x454   : > { %v6237_v25 = vrot.slane %v6217_v30, 1  ;;  %v6209_v15 = vadd.f32 %v7845_v43, %v6151_v37 }
 0x455   : > { %v6220_v33 = vmax.f32 %v6210_v21, 0.0 }
 0x456   : > { %v6239_v50 = vsel %vm4337_vm3, %v6237_v25, %v6238_v8  ;;  %v6219_v49 = vmax.f32 %v6209_v15, 0.0  ;;  %v9083_v57 = vpop.f32.mrb[40].mxu1 }
 0x457   : > { %v6266_v58 = vmax.f32 %v6217_v30, %v6239_v50  ;;  %v6242_v39 = vrot.slane %v6220_v33, 1  ;;  %v6212_v53 = vadd.f32 %v9083_v57, %v7845_v43  ;;  %v6161_v52 = vpop.f32.mrb[41].mxu1 }
 0x458   : > { %v6240_v31 = vrot.slane %v6219_v49, 1  ;;  %v6211_v19 = vadd.f32 %v7845_v43, %v6161_v52  ;;  %v6345_v52 = vld [vmem:[%s11361_s5 + $0x8] sm:$0xff] }
 0x459   : > { %v6222_v24 = vmax.f32 %v6212_v53, 0.0  ;;  %v6344_v53 = vld [vmem:[%s11361_s5] sm:$0xff] }
 0x45a   : > { %v6241_v5 = vsel %vm4337_vm3, %v6238_v8, %v6240_v31  ;;  %v6243_v6 = vsel %vm4337_vm3, %v6240_v31, %v6242_v39  ;;  %v6221_v18 = vmax.f32 %v6211_v19, 0.0  ;;  %v9086_v11 = vpop.f32.mrb[42].mxu1  ;;  %v9286_v31 = vpack.c.bf16 %v6345_v52, %v6344_v53  ;;  %v6346_v19 = vld [vmem:[%s11361_s5 + $0x10] sm:$0xff]  ;;  %v7898_v52 = vld [vmem:[%s11361_s5 + $0x100] sm:$0xff] }
 0x45b   : > { %v6267_v26 = vmax.f32 %v6218_v29, %v6241_v5  ;;  %v6268_v34 = vmax.f32 %v6219_v49, %v6243_v6  ;;  %v6246_v51 = vrot.slane %v6222_v24, 1  ;;  %v6214_v20 = vadd.f32 %v9086_v11, %v7845_v43  ;;  %v6171_v10 = vpop.f32.mrb[43].mxu1 }
 0x45c   : > { %v6244_v54 = vrot.slane %v6221_v18, 1  ;;  %v6213_v17 = vadd.f32 %v7845_v43, %v6171_v10 }
 0x45d   : > { %v6285_v62 = vrot.slane %v6267_v26, 2  ;;  %v6286_v27 = vrot.slane %v6268_v34, 2  ;;  %v6224_v28 = vmax.f32 %v6214_v20, 0.0  ;;  %v7857_v20 = vld [vmem:[%s11361_s5 + $0x48] sm:$0xff] }
 0x45e   : > { %v6245_v61 = vsel %vm4337_vm3, %v6242_v39, %v6244_v54  ;;  %v6247_v59 = vsel %vm4337_vm3, %v6244_v54, %v6246_v51  ;;  %v6223_v41 = vmax.f32 %v6213_v17, 0.0  ;;  %v9089_v32 = vpop.f32.mrb[44].mxu1  ;;  %v7858_v17 = vld [vmem:[%s11361_s5 + $0x50] sm:$0xff] }
 0x45f   : > { %v6287_v60 = vsel %vm4515_vm4, %v6285_v62, %v6286_v27  ;;  %v6269_v56 = vmax.f32 %v6220_v33, %v6245_v61  ;;  %v6270_v48 = vmax.f32 %v6221_v18, %v6247_v59  ;;  %v6250_v23 = vrot.slane %v6224_v28, 1  ;;  %v6181_v22 = vpop.f32.mrb[45].mxu1  ;;  %v7859_v62 = vld [vmem:[%s11361_s5 + $0x58] sm:$0xff]  ;;  %v7863_v59 = vld [vmem:[%s11361_s5 + $0x60] sm:$0xff] }
 0x460   : > { %v6311_v3 = vmax.f32 %v6266_v58, %v6287_v60  ;;  %v6248_v13 = vrot.slane %v6223_v41, 1  ;;  %v6216_v14 = vadd.f32 %v9089_v32, %v7845_v43  ;;  %v6215_v12 = vadd.f32 %v7845_v43, %v6181_v22 }
 0x461   : > { %v6288_v42 = vrot.slane %v6269_v56, 2  ;;  %v6290_v35 = vrot.slane %v6270_v48, 2  ;;  %v7866_v48 = vld [vmem:[%s11361_s5 + $0x78] sm:$0xff] }
 0x462   : > { %6320 = vst.msk [vmem:[#allocation6] sm:$0xff] %vm337_vm6, %v6311_v3  ;;  %v6249_v40 = vsel %vm4337_vm3, %v6246_v51, %v6248_v13  ;;  %v6251_v47 = vsel %vm4337_vm3, %v6248_v13, %v6250_v23  ;;  %v6226_v46 = vmax.f32 %v6216_v14, 0.0  ;;  %v6225_v55 = vmax.f32 %v6215_v12, 0.0  ;;  %v7856_v51 = vld [vmem:[%s11361_s5 + $0x40] sm:$0xff]  ;;  %v7871_v14 = vld [vmem:[%s11361_s5 + $0x88] sm:$0xff] }
 0x463   : > { %v6291_v63 = vsel %vm4515_vm4, %v6288_v42, %v6290_v35  ;;  %v6271_v16 = vmax.f32 %v6222_v24, %v6249_v40  ;;  %v6272_v36 = vmax.f32 %v6223_v41, %v6251_v47  ;;  %v6347_v24 = vld [vmem:[%s11361_s5 + $0x18] sm:$0xff]  ;;  %v9292_v54 = vpack.c.bf16 %v7857_v20, %v7856_v51  ;;  %v7864_v41 = vld [vmem:[%s11361_s5 + $0x68] sm:$0xff]  ;;  %v7870_v13 = vld [vmem:[%s11361_s5 + $0x80] sm:$0xff] }
 0x464   : > { %v6313_v0 = vmax.f32 %v6268_v34, %v6291_v63  ;;  %v6254_v44 = vrot.slane %v6226_v46, 1  ;;  %v6252_v2 = vrot.slane %v6225_v55, 1  ;;  %v9289_v18 = vpack.c.bf16 %v6347_v24, %v6346_v19  ;;  %v7873_v40 = vld [vmem:[%s11361_s5 + $0x98] sm:$0xff]  ;;  %v7877_v63 = vld [vmem:[%s11361_s5 + $0xa0] sm:$0xff] }
 0x465   : > { %v6292_v45 = vrot.slane %v6271_v16, 2  ;;  %v6294_v7 = vrot.slane %v6272_v36, 2  ;;  %v9298_v60 = vpack.c.bf16 %v7864_v41, %v7863_v59  ;;  %v9304_v42 = vpack.c.bf16 %v7871_v14, %v7870_v13 }
 0x466   : > { %6322 = vst.msk [vmem:[#allocation6 + $0x10] sm:$0xff] %vm337_vm6, %v6313_v0  ;;  %v6275_v43 = vmax.f32 %v6226_v46, %v6254_v44  ;;  %v6253_v4 = vsel %vm4337_vm3, %v6250_v23, %v6252_v2  ;;  %v6255_v29 = vsel %vm4337_vm3, %v6252_v2, %v6254_v44  ;;  %v7879_v44 = vld [vmem:[%s11361_s5 + $0xb0] sm:$0xff]  ;;  %v7880_v2 = vld [vmem:[%s11361_s5 + $0xb8] sm:$0xff] }
 0x467   : > { %v6293_v30 = vsel %vm4515_vm4, %v6290_v35, %v6292_v45  ;;  %v6273_v38 = vmax.f32 %v6224_v28, %v6253_v4  ;;  %v6274_v8 = vmax.f32 %v6225_v55, %v6255_v29  ;;  %v9295_v28 = vpack.c.bf16 %v7859_v62, %v7858_v17  ;;  %v7872_v35 = vld [vmem:[%s11361_s5 + $0x90] sm:$0xff]  ;;  %v7884_v4 = vld [vmem:[%s11361_s5 + $0xc0] sm:$0xff]  ;;  %v7885_v29 = vld [vmem:[%s11361_s5 + $0xc8] sm:$0xff] }
 0x468   : > { %v6314_v21 = vmax.f32 %v6269_v56, %v6293_v30  ;;  %v6300_v37 = vrot.slane %v6275_v43, 2  ;;  %v7865_v56 = vld [vmem:[%s11361_s5 + $0x70] sm:$0xff]  ;;  %v9307_v46 = vpack.c.bf16 %v7873_v40, %v7872_v35 }
 0x469   : > { %v6296_v25 = vrot.slane %v6273_v38, 2  ;;  %v6298_v15 = vrot.slane %v6274_v8, 2  ;;  %v6330_v33 = vld [vmem:[#allocation6] ss:$2 sm:$0xf]  ;;  %v9301_v22 = vpack.c.bf16 %v7866_v48, %v7865_v56 }
 0x46a   : > { %6323 = vst.msk [vmem:[#allocation6 + $0x18] sm:$0xff] %vm337_vm6, %v6314_v21  ;;  %v6319_v50 = vmax.f32 %v6274_v8, %v6300_v37  ;;  %v7886_v8 = vld [vmem:[%s11361_s5 + $0xd0] sm:$0xff]  ;;  %v7887_v21 = vld [vmem:[%s11361_s5 + $0xd8] sm:$0xff] }
 0x46b   : > { %6331 = vst.msk [vmem:[#allocation4 + $0x7] sm:$0xf] %vm343_vm8, %v6330_v33  ;;  %v6297_v49 = vsel %vm4515_vm4, %v6294_v7, %v6296_v25  ;;  %v6301_v57 = vsel %vm4515_vm4, %v6298_v15, %v6300_v37  ;;  %v9313_v7 = vpack.c.bf16 %v7880_v2, %v7879_v44  ;;  %v9319_v37 = vpack.c.bf16 %v7887_v21, %v7886_v8  ;;  %v7891_v25 = vld [vmem:[%s11361_s5 + $0xe0] sm:$0xff]  ;;  %v7892_v15 = vld [vmem:[%s11361_s5 + $0xe8] sm:$0xff] }
 0x46c   : > { %v6316_v58 = vmax.f32 %v6271_v16, %v6297_v49  ;;  %v6318_v39 = vmax.f32 %v6273_v38, %v6301_v57  ;;  %6329 = vst.msk [vmem:[#allocation6 + $0x40] sm:$0x1f] %vm6328_vm9, %v6319_v50  ;;  %v7878_v16 = vld [vmem:[%s11361_s5 + $0xa8] sm:$0xff]  ;;  %v9316_v38 = vpack.c.bf16 %v7885_v29, %v7884_v4  ;;  %v9322_v50 = vpack.c.bf16 %v7892_v15, %v7891_v25  ;;  %v7893_v49 = vld [vmem:[%s11361_s5 + $0xf0] sm:$0xff]  ;;  %v7894_v57 = vld [vmem:[%s11361_s5 + $0xf8] sm:$0xff] }
 0x46d   : > { %v9310_v0 = vpack.c.bf16 %v7878_v16, %v7877_v63 }
 0x46e   : > { %6325 = vst.msk [vmem:[#allocation6 + $0x28] sm:$0xff] %vm337_vm6, %v6316_v58  ;;  %6327 = vst.msk [vmem:[#allocation6 + $0x38] sm:$0xff] %vm337_vm6, %v6318_v39  ;;  %v9325_v39 = vpack.c.bf16 %v7894_v57, %v7893_v49 }
 0x471   : > { %v6333_v6 = vld [vmem:[#allocation6 + $0x14] ss:$2 sm:$0xf] }
 0x472   : > { %v6348_v5 = vld [vmem:[#allocation4 + $0x1] sm:$0xff]  ;;  %6334 = vst.msk [vmem:[#allocation4 + $0xd] sm:$0xf] %vm343_vm8, %v6333_v6  ;;  %v7901_v6 = vld [vmem:[%s11361_s5 + $0x118] sm:$0xff] }
 0x473   : > { %9099 = vmatmul.mubr.msk.f32.vlgmr.msra.gmra.mrb[46].mxu1 %vm337_vm6, %v6348_v5  ;;  %v6341_v27 = vld [vmem:[#allocation4] sm:$0xff]  ;;  %v7900_v5 = vld [vmem:[%s11361_s5 + $0x110] sm:$0xff] }
 0x474   : > { %9287 = vmatpush3.bf16.msra.mxu1 %v9286_v31  ;;  %9101 = vmatprep.mubr.msk.f32.mxu1 %vm9811_vm7, %v9809_v1  ;;  %v6534_v23 = vld [vmem:[#allocation4 + $0x2] sm:$0xff] }
 0x475   : > { %9288 = vmatprep.subr.bf16.mxu1 %v9810_v9  ;;  %v6336_v11 = vld [vmem:[#allocation6 + $0x28] ss:$2 sm:$0xf]  ;;  %v6339_v26 = vld [vmem:[#allocation6 + $0x3c] ss:$2 sm:$0xf] }
 0x476   : > { %6337 = vst.msk [vmem:[#allocation4 + $0x13] sm:$0xf] %vm343_vm8, %v6336_v11  ;;  %6340 = vst.msk [vmem:[#allocation4 + $0x19] sm:$0xf] %vm343_vm8, %v6339_v26  ;;  %v7899_v31 = vld [vmem:[%s11361_s5 + $0x108] sm:$0xff]  ;;  %v9331_v11 = vpack.c.bf16 %v7901_v6, %v7900_v5 }
 0x477   : > { %v9328_v24 = vpack.c.bf16 %v7899_v31, %v7898_v52 }
 0x478   : > { %9290 = vmatpush3.bf16.msra.mxu1 %v9289_v18 }
 0x479   : > { %9291 = vmatprep.subr.bf16.mxu1 %v9810_v9  ;;  %v6349_v34 = vld [vmem:[#allocation4 + $0x9] sm:$0xff] }
 0x47a   : > { %9102 = vmatmul.mubr.msk.f32.gmra.mrb[48].mxu1 %vm337_vm6, %v6349_v34  ;;  %v11137_v61 = vld [vmem:[#allocation4 + $0x8] sm:$0xff]  ;;  %v7036_v34 = vld [vmem:[#allocation4 + $0x1d] sm:$0xff] }
 0x47b   : > { %9104 = vmatprep.mubr.msk.f32.mxu1 %vm9811_vm7, %v9809_v1  ;;  %v6535_v3 = vld [vmem:[#allocation4 + $0xa] sm:$0xff] }
 0x47c   : > { %v6634_v47 = vld [vmem:[#allocation4 + $0x6] sm:$0xff] }
 0x47d   : > { %v6350_v10 = vld [vmem:[#allocation4 + $0x11] sm:$0xff]  ;;  %v6734_v45 = vld [vmem:[#allocation4 + $0x7] sm:$0xff]  ;;  %v6936_v19 = vld [vmem:[#allocation4 + $0x1c] sm:$0xff] }
 0x47e   : > { %9105 = vmatmul.mubr.msk.f32.gmra.mrb[50].mxu1 %vm337_vm6, %v6350_v10  ;;  %v11150_v32 = vld [vmem:[#allocation4 + $0x10] sm:$0xff]  ;;  %v6836_v33 = vld [vmem:[#allocation4 + $0x18] sm:$0xff] }
 0x47f   : > { %9115 = vmatprep.mubr.msk.f32.mxu1 %vm9811_vm7, %v9809_v1  ;;  %v6536_v12 = vld [vmem:[#allocation4 + $0x12] sm:$0xff] }
 0x480   : > { %v11189_v55 = vld [vmem:[#allocation4 + $0xe] sm:$0xff]  ;;  %v11202_v36 = vld [vmem:[#allocation4 + $0x16] sm:$0xff] }
 0x481   : > { %v6735_v43 = vld [vmem:[#allocation4 + $0xf] sm:$0xff]  ;;  %v6736_v30 = vld [vmem:[#allocation4 + $0x17] sm:$0xff] }
 0x482   : > { %9116 = vmatmul.mubr.msk.f32.vlgmr.msra.gmra.mrb[52].mxu1 %vm337_vm6, %v6341_v27  ;;  %v6934_v58 = vld [vmem:[#allocation4 + $0xc] sm:$0xff]  ;;  %v6935_v53 = vld [vmem:[#allocation4 + $0x14] sm:$0xff] }
 0x483   : > { %9293 = vmatpush3.bf16.msra.mxu1 %v9292_v54  ;;  %9118 = vmatprep.mubr.msk.f32.mxu1 %vm9811_vm7, %v9809_v1  ;;  %v7034_v18 = vld [vmem:[#allocation4 + $0xd] sm:$0xff]  ;;  %v7035_v26 = vld [vmem:[#allocation4 + $0x15] sm:$0xff] }
 0x484   : > { %9294 = vmatprep.subr.bf16.mxu1 %v9810_v9 }
 0x486   : > { %9119 = vmatmul.mubr.msk.f32.gmra.mrb[54].mxu1 %vm337_vm6, %v11137_v61 }
 0x487   : > { %9296 = vmatpush3.bf16.msra.mxu1 %v9295_v28  ;;  %9121 = vmatprep.mubr.msk.f32.mxu1 %vm9811_vm7, %v9809_v1 }
 0x488   : > { %9297 = vmatprep.subr.bf16.mxu1 %v9810_v9 }
 0x48a   : > { %9122 = vmatmul.mubr.msk.f32.gmra.mrb[56].mxu1 %vm337_vm6, %v11150_v32 }
 0x48b   : > { %9132 = vmatprep.mubr.msk.f32.mxu1 %vm9811_vm7, %v9809_v1 }
 0x48e   : > { %9133 = vmatmul.mubr.msk.f32.vlgmr.msra.gmra.mrb[58].mxu1 %vm337_vm6, %v6534_v23 }
 0x48f   : > { %9299 = vmatpush3.bf16.msra.mxu1 %v9298_v60  ;;  %9135 = vmatprep.mubr.msk.f32.mxu1 %vm9811_vm7, %v9809_v1 }
 0x490   : > { %9300 = vmatprep.subr.bf16.mxu1 %v9810_v9 }
 0x492   : > { %9136 = vmatmul.mubr.msk.f32.gmra.mrb[60].mxu1 %vm337_vm6, %v6535_v3 }
 0x493   : > { %9302 = vmatpush3.bf16.msra.mxu1 %v9301_v22  ;;  %9138 = vmatprep.mubr.msk.f32.mxu1 %vm9811_vm7, %v9809_v1 }
 0x494   : > { %9303 = vmatprep.subr.bf16.mxu1 %v9810_v9 }
 0x496   : > { %9139 = vmatmul.mubr.msk.f32.gmra.mrb[62].mxu1 %vm337_vm6, %v6536_v12 }
 0x497   : > { %9149 = vmatprep.mubr.msk.f32.mxu1 %vm9811_vm7, %v9809_v1 }
 0x49a   : > { %9150 = vmatmul.mubr.msk.f32.vlgmr.msra.gmra.mrb[64].mxu1 %vm337_vm6, %v6634_v47 }
 0x49b   : > { %9305 = vmatpush3.bf16.msra.mxu1 %v9304_v42  ;;  %9152 = vmatprep.mubr.msk.f32.mxu1 %vm9811_vm7, %v9809_v1 }
 0x49c   : > { %9306 = vmatprep.subr.bf16.mxu1 %v9810_v9 }
 0x49e   : > { %9153 = vmatmul.mubr.msk.f32.gmra.mrb[66].mxu1 %vm337_vm6, %v11189_v55 }
 0x49f   : > { %9308 = vmatpush3.bf16.msra.mxu1 %v9307_v46  ;;  %9155 = vmatprep.mubr.msk.f32.mxu1 %vm9811_vm7, %v9809_v1 }
 0x4a0   : > { %9309 = vmatprep.subr.bf16.mxu1 %v9810_v9 }
 0x4a2   : > { %9156 = vmatmul.mubr.msk.f32.gmra.mrb[68].mxu1 %vm337_vm6, %v11202_v36 }
 0x4a3   : > { %9166 = vmatprep.mubr.msk.f32.mxu1 %vm9811_vm7, %v9809_v1 }
 0x4a6   : > { %9167 = vmatmul.mubr.msk.f32.vlgmr.msra.gmra.mrb[70].mxu1 %vm337_vm6, %v6734_v45 }
 0x4a7   : > { %9311 = vmatpush3.bf16.msra.mxu1 %v9310_v0  ;;  %9169 = vmatprep.mubr.msk.f32.mxu1 %vm9811_vm7, %v9809_v1 }
 0x4a8   : > { %9312 = vmatprep.subr.bf16.mxu1 %v9810_v9 }
 0x4aa   : > { %9170 = vmatmul.mubr.msk.f32.gmra.mrb[72].mxu1 %vm337_vm6, %v6735_v43 }
 0x4ab   : > { %9314 = vmatpush3.bf16.msra.mxu1 %v9313_v7  ;;  %9172 = vmatprep.mubr.msk.f32.mxu1 %vm9811_vm7, %v9809_v1 }
 0x4ac   : > { %9315 = vmatprep.subr.bf16.mxu1 %v9810_v9 }
 0x4ae   : > { %9173 = vmatmul.mubr.msk.f32.gmra.mrb[74].mxu1 %vm337_vm6, %v6736_v30 }
 0x4af   : > { %9183 = vmatprep.mubr.msk.f32.mxu1 %vm9811_vm7, %v9809_v1 }
 0x4b2   : > { %9184 = vmatmul.mubr.msk.f32.vlgmr.msra.gmra.mrb[76].mxu1 %vm337_vm6, %v11137_v61 }
 0x4b3   : > { %9317 = vmatpush3.bf16.msra.mxu1 %v9316_v38  ;;  %9186 = vmatprep.mubr.msk.f32.mxu1 %vm9811_vm7, %v9809_v1 }
 0x4b4   : > { %9318 = vmatprep.subr.bf16.mxu1 %v9810_v9 }
 0x4b6   : > { %9187 = vmatmul.mubr.msk.f32.gmra.mrb[78].mxu1 %vm337_vm6, %v11150_v32 }
 0x4b7   : > { %9320 = vmatpush3.bf16.msra.mxu1 %v9319_v37  ;;  %9189 = vmatprep.mubr.msk.f32.mxu1 %vm9811_vm7, %v9809_v1 }
 0x4b8   : > { %9321 = vmatprep.subr.bf16.mxu1 %v9810_v9 }
 0x4ba   : > { %9190 = vmatmul.mubr.msk.f32.gmra.mrb[80].mxu1 %vm337_vm6, %v6836_v33 }
 0x4bb   : > { %9200 = vmatprep.mubr.msk.f32.mxu1 %vm9811_vm7, %v9809_v1 }
 0x4be   : > { %9201 = vmatmul.mubr.msk.f32.vlgmr.msra.gmra.mrb[82].mxu1 %vm337_vm6, %v6934_v58 }
 0x4bf   : > { %9323 = vmatpush3.bf16.msra.mxu1 %v9322_v50  ;;  %9203 = vmatprep.mubr.msk.f32.mxu1 %vm9811_vm7, %v9809_v1 }
 0x4c0   : > { %9324 = vmatprep.subr.bf16.mxu1 %v9810_v9 }
 0x4c2   : > { %9204 = vmatmul.mubr.msk.f32.gmra.mrb[84].mxu1 %vm337_vm6, %v6935_v53 }
 0x4c3   : > { %9326 = vmatpush3.bf16.msra.mxu1 %v9325_v39  ;;  %9206 = vmatprep.mubr.msk.f32.mxu1 %vm9811_vm7, %v9809_v1 }
 0x4c4   : > { %9327 = vmatprep.subr.bf16.mxu1 %v9810_v9 }
 0x4c6   : > { %9207 = vmatmul.mubr.msk.f32.gmra.mrb[86].mxu1 %vm337_vm6, %v6936_v19 }
 0x4c7   : > { %9217 = vmatprep.mubr.msk.f32.mxu1 %vm9811_vm7, %v9809_v1 }
 0x4ca   : > { %9218 = vmatmul.mubr.msk.f32.vlgmr.msra.gmra.mrb[88].mxu1 %vm337_vm6, %v7034_v18 }
 0x4cb   : > { %9329 = vmatpush3.bf16.msra.mxu1 %v9328_v24  ;;  %9220 = vmatprep.mubr.msk.f32.mxu1 %vm9811_vm7, %v9809_v1 }
 0x4cc   : > { %9330 = vmatprep.subr.bf16.mxu1 %v9810_v9  ;;  %v7136_v9 = vld [vmem:[#allocation4 + $0x1e] sm:$0xff] }
 0x4ce   : > { %9221 = vmatmul.mubr.msk.f32.gmra.mrb[90].mxu1 %vm337_vm6, %v7035_v26 }
 0x4cf   : > { %9332 = vmatpush3.bf16.msra.mxu1 %v9331_v11  ;;  %9223 = vmatprep.mubr.msk.f32.mxu1 %vm9811_vm7, %v9809_v1 }
 0x4d2   : > { %9224 = vmatmul.mubr.msk.f32.gmra.mrb[92].mxu1 %vm337_vm6, %v7036_v34 }
 0x4d3   : > { %9234 = vmatprep.mubr.msk.f32.mxu1 %vm9811_vm7, %v9809_v1 }
 0x4d6   : > { %9235 = vmatmul.mubr.msk.f32.vlgmr.msra.gmra.mrb[94].mxu1 %vm337_vm6, %v11189_v55 }
 0x4d7   : > { %9237 = vmatprep.mubr.msk.f32.mxu1 %vm9811_vm7, %v9809_v1 }
 0x4da   : > { %9238 = vmatmul.mubr.msk.f32.gmra.mrb[96].mxu1 %vm337_vm6, %v11202_v36 }
 0x4db   : > { %9240 = vmatprep.mubr.msk.f32.mxu1 %vm9811_vm7, %v9809_v1 }
 0x4de   : > { %9241 = vmatmul.mubr.msk.f32.gmra.mrb[98].mxu1 %vm337_vm6, %v7136_v9 }
 0x546   : > { %v6431_v51 = vpop.f32.mrb[46].mxu1 }
 0x547   : > { %v9100_v20 = vpop.f32.mrb[47].mxu1 }
 0x54d   : > { %v6436_v10 = vpop.f32.mrb[48].mxu1 }
 0x54e   : > { %v9103_v54 = vpop.f32.mrb[49].mxu1 }
 0x551   : > { %v6441_v17 = vpop.f32.mrb[50].mxu1 }
 0x552   : > { %v9106_v62 = vpop.f32.mrb[51].mxu1 }
 0x555   : > { %v6520_v27 = vpop.f32.mrb[52].mxu1 }
 0x556   : > { %v6521_v28 = vadd.f32 %v6520_v27, %v6431_v51  ;;  %v9117_v61 = vpop.f32.mrb[53].mxu1  ;;  %v7905_v27 = vld [vmem:[%s11362_s6] ss:$0 sm:$0xff] }
 0x559   : > { %v6525_v59 = vpop.f32.mrb[54].mxu1 }
 0x55a   : > { %v6526_v41 = vadd.f32 %v6525_v59, %v6436_v10  ;;  %v9120_v32 = vpop.f32.mrb[55].mxu1 }
 0x55d   : > { %v6530_v60 = vpop.f32.mrb[56].mxu1 }
 0x55e   : > { %v6531_v56 = vadd.f32 %v6530_v60, %v6441_v17  ;;  %v9123_v48 = vpop.f32.mrb[57].mxu1 }
 0x561   : > { %v6617_v23 = vpop.f32.mrb[58].mxu1 }
 0x562   : > { %v6631_v1 = vadd.f32 %v6617_v23, %v6521_v28  ;;  %v9134_v22 = vpop.f32.mrb[59].mxu1 }
 0x565   : > { %v6622_v3 = vpop.f32.mrb[60].mxu1 }
 0x566   : > { %v6632_v13 = vadd.f32 %v6622_v3, %v6526_v41  ;;  %v9137_v14 = vpop.f32.mrb[61].mxu1 }
 0x569   : > { %v6627_v12 = vpop.f32.mrb[62].mxu1 }
 0x56a   : > { %v6633_v42 = vadd.f32 %v6627_v12, %v6531_v56  ;;  %v9140_v35 = vpop.f32.mrb[63].mxu1 }
 0x56d   : > { %v6717_v40 = vpop.f32.mrb[64].mxu1 }
 0x56e   : > { %v6731_v47 = vadd.f32 %v6717_v40, %v6631_v1  ;;  %v9151_v46 = vpop.f32.mrb[65].mxu1 }
 0x571   : > { %v6722_v55 = vpop.f32.mrb[66].mxu1 }
 0x572   : > { %v6732_v63 = vadd.f32 %v6722_v55, %v6632_v13  ;;  %v9154_v16 = vpop.f32.mrb[67].mxu1 }
 0x575   : > { %v6727_v36 = vpop.f32.mrb[68].mxu1 }
 0x576   : > { %v6733_v0 = vadd.f32 %v6727_v36, %v6633_v42  ;;  %v9157_v44 = vpop.f32.mrb[69].mxu1 }
 0x579   : > { %v6817_v2 = vpop.f32.mrb[70].mxu1 }
 0x57a   : > { %v6831_v45 = vadd.f32 %v6817_v2, %v6731_v47  ;;  %v9168_v7 = vpop.f32.mrb[71].mxu1 }
 0x57d   : > { %v6822_v43 = vpop.f32.mrb[72].mxu1 }
 0x57e   : > { %v6832_v4 = vadd.f32 %v6822_v43, %v6732_v63  ;;  %v9171_v29 = vpop.f32.mrb[73].mxu1 }
 0x581   : > { %v6827_v30 = vpop.f32.mrb[74].mxu1 }
 0x582   : > { %v6833_v38 = vadd.f32 %v6827_v30, %v6733_v0  ;;  %v9174_v8 = vpop.f32.mrb[75].mxu1 }
 0x585   : > { %v6917_v21 = vpop.f32.mrb[76].mxu1 }
 0x586   : > { %v6931_v37 = vadd.f32 %v6917_v21, %v6831_v45  ;;  %v9185_v25 = vpop.f32.mrb[77].mxu1 }
 0x589   : > { %v6922_v15 = vpop.f32.mrb[78].mxu1 }
 0x58a   : > { %v6932_v33 = vadd.f32 %v6922_v15, %v6832_v4  ;;  %v9188_v50 = vpop.f32.mrb[79].mxu1 }
 0x58d   : > { %v6927_v49 = vpop.f32.mrb[80].mxu1 }
 0x58e   : > { %v6933_v57 = vadd.f32 %v6927_v49, %v6833_v38  ;;  %v9191_v58 = vpop.f32.mrb[81].mxu1 }
 0x591   : > { %v7017_v39 = vpop.f32.mrb[82].mxu1 }
 0x592   : > { %v7031_v53 = vadd.f32 %v7017_v39, %v6931_v37  ;;  %v9202_v52 = vpop.f32.mrb[83].mxu1 }
 0x595   : > { %v7022_v31 = vpop.f32.mrb[84].mxu1 }
 0x596   : > { %v7032_v19 = vadd.f32 %v7022_v31, %v6932_v33  ;;  %v9205_v24 = vpop.f32.mrb[85].mxu1 }
 0x599   : > { %v7027_v5 = vpop.f32.mrb[86].mxu1 }
 0x59a   : > { %v7033_v6 = vadd.f32 %v7027_v5, %v6933_v57  ;;  %v9208_v18 = vpop.f32.mrb[87].mxu1 }
 0x59d   : > { %v7117_v11 = vpop.f32.mrb[88].mxu1 }
 0x59e   : > { %v7131_v26 = vadd.f32 %v7117_v11, %v7031_v53  ;;  %v9219_v34 = vpop.f32.mrb[89].mxu1 }
 0x5a1   : > { %v7122_v9 = vpop.f32.mrb[90].mxu1 }
 0x5a2   : > { %v7132_v51 = vadd.f32 %v7122_v9, %v7032_v19  ;;  %v9222_v20 = vpop.f32.mrb[91].mxu1 }
 0x5a5   : > { %v7127_v10 = vpop.f32.mrb[92].mxu1 }
 0x5a6   : > { %v7133_v54 = vadd.f32 %v7127_v10, %v7033_v6  ;;  %v9225_v17 = vpop.f32.mrb[93].mxu1 }
 0x5a9   : > { %v7217_v62 = vpop.f32.mrb[94].mxu1 }
 0x5aa   : > { %v7231_v28 = vadd.f32 %v7217_v62, %v7131_v26  ;;  %v9236_v61 = vpop.f32.mrb[95].mxu1 }
 0x5ac   : > { %v7241_v59 = vadd.f32 %v7905_v27, %v7231_v28 }
 0x5ad   : > { %v7222_v41 = vpop.f32.mrb[96].mxu1 }
 0x5ae   : > { %v7232_v32 = vadd.f32 %v7222_v41, %v7132_v51  ;;  %v9239_v60 = vpop.f32.mrb[97].mxu1  ;;  %v7244_v56 = vmax.f32 %v7241_v59, 0.0 }
 0x5b0   : > { %v7242_v48 = vadd.f32 %v7905_v27, %v7232_v32  ;;  %v7250_v13 = vrot.slane %v7244_v56, 1 }
 0x5b1   : > { %v7227_v23 = vpop.f32.mrb[98].mxu1 }
 0x5b2   : > { %v7245_v1 = vmax.f32 %v7242_v48, 0.0  ;;  %v7233_v22 = vadd.f32 %v7227_v23, %v7133_v54  ;;  %v9242_v3 = vpop.f32.mrb[99].mxu1 }
 0x5b4   : > { %v7251_v14 = vrot.slane %v7245_v1, 1  ;;  %v7243_v12 = vadd.f32 %v7905_v27, %v7233_v22 }
 0x5b6   : > { %v7252_v42 = vsel %vm4337_vm3, %v7250_v13, %v7251_v14  ;;  %v7246_v35 = vmax.f32 %v7243_v12, 0.0 }
 0x5b7   : > { %v7258_v40 = vmax.f32 %v7244_v56, %v7252_v42 }
 0x5b8   : > { %v7253_v47 = vrot.slane %v7246_v35, 1 }
 0x5b9   : > { %v7265_v36 = vrot.slane %v7258_v40, 6 }
 0x5ba   : > { %v7254_v46 = vsel %vm4337_vm3, %v7251_v14, %v7253_v47  ;;  %v7260_v55 = vmax.f32 %v7246_v35, %v7253_v47 }
 0x5bb   : > { %v7259_v63 = vmax.f32 %v7245_v1, %v7254_v46 }
 0x5bc   : > { %v7268_v16 = vrot.slane %v7260_v55, 6 }
 0x5bd   : > { %v7266_v0 = vrot.slane %v7259_v63, 6 }
 0x5bf   : > { %v7267_v44 = vsel %vm7264_vm10, %v7265_v36, %v7266_v0  ;;  %v7269_v2 = vsel %vm7264_vm10, %v7266_v0, %v7268_v16 }
 0x5c0   : > { %v7273_v45 = vmax.f32 %v7258_v40, %v7267_v44  ;;  %v7274_v7 = vmax.f32 %v7259_v63, %v7269_v2 }
 0x5c2   : > { %7277 = vst.msk [vmem:[#allocation7] sm:$0xff] %vm7276_vm11, %v7273_v45  ;;  %7278 = vst.msk [vmem:[#allocation7 + $0x8] sm:$0xff] %vm7276_vm11, %v7274_v7 }
 0x5c9   : > { %v7281_v43 = vld [vmem:[#allocation7] ss:$2 sm:$0x3]  ;;  %v7285_v4 = vld [vmem:[#allocation7 + $0xc] ss:$2 sm:$0x3] }
 0x5ca   : > { %7283 = vst.msk [vmem:[%s271_s13] sm:$0x3] %vm7282_vm12, %v7281_v43  ;;  %7286 = vst.msk [vmem:[%s271_s13 + $0x2] sm:$0x3] %vm7282_vm12, %v7285_v4 }
 0x5cb   : > { %9758 = shalt.err (!%p9755_p3)
}
 0x5cc   : > { %s9759_s22 = scalar_lea.hbm %s11314_s17, 64  ;;  %s9763_s8 = scalar_lea.hbm %s11363_s7, 128 }
 0x5cd   : > { %p9760_p4 = scmp.ne.s32.totalorder %s11314_s17, %s9759_s22  ;;  %p9764_p9 = scmp.lt.u32.totalorder %s11314_s17, %s11363_s7 }
 0x5ce   : > { %p9765_p10 = scmp.lt.u32.totalorder %s9763_s8, %s9759_s22  ;;  %p9767_p12 = scmp.lt.u32.totalorder %s9759_s22, %s11314_s17 }
 0x5cf   : > { %p9761_p7 = pnand %p9760_p4, %p9891_p5 }
 0x5d0   : > { %p9766_p11 = por %p9765_p10, %p9764_p9 }
 0x5d1   : > { %p9762_p8 = pneg %p9761_p7 }
 0x5d2   : > { %p9768_p13 = por %p9767_p12, %p9766_p11 }
 0x5d4   : > { %p9769_p0 = pnand %p9768_p13, %p9762_p8 }
 0x5d6   : > { %9772 = shalt.err (!%p9769_p0)
}
 0x5d7   : > { %9703 = dma.vmem_to_hbm [thread:$0]  (%p9891_p5), %s11316_s14, 64, %s11314_s17, %s7288_s18  }
 0x5d8 PF: > { %p9709_p1 = scmp.ge.s32.totalorder %s9807_s27, 2  ;;  %s7313_s15 = sand.u32 1, %s9795_s24  }
 0x5d9   : > { %s7314_s16 = scalar_lea.sflag [#allocation9], %s7313_s15 }
 0x5da   : > { %p9706_p2 = pnand %p9709_p1, %p9895_p6 }
 0x5dc   : > { %9790 = dma.done.wait (!%p9706_p2), %s7314_s16, 64  }
 0x5dd   : > { %9792 = vsyncadd (!%p9706_p2), %s7314_s16, 4294967232  ;;  %p17_p3 = scmp.ge.s32.totalorder %s9878_s30, 4   ;;  %s11366_s24 = smov %s9799_s25 }
 0x5de   : > { %s11367_s25 = smov %s9803_s26  ;;  %s11368_s26 = smov %s9889_s10 }
 0x5df   : > { %s11369_s27 = smov %s9878_s30  ;;  %19 = sbr.rel (!%p17_p3) target bundleno = 3 (0x3), region = 133 }
 0x5e6   :  { %7319 = vsyncpa [#allocation9], 1 }
 0x5e7   :  { %7321 = vsyncpa [#allocation9 + $0x1], 1 }

</bundles_post_ra>
